<compile_context>
chip_gen: v7x
topology: tpu7x:2x2x1
jax: 0.10.0
libtpu: 0.0.40
codegen_flags: <defaults>
</compile_context>

<pallas_src>
import jax
import jax.numpy as jnp
from jax import lax
from jax.experimental import pallas as pl
from jax.experimental.pallas import tpu as pltpu

EPS = 1e-5  # torch InstanceNorm2d default


def _reflect_pad1(x):
    # x: (H, W, C) -> (H+2, W+2, C); ReflectionPad2d(1).
    x = jnp.concatenate([x[1:2], x, x[-2:-1]], axis=0)
    x = jnp.concatenate([x[:, 1:2], x, x[:, -2:-1]], axis=1)
    return x


def _conv_in_block(x, w_flat, gamma, beta, relu):
    """reflect-pad -> 3x3 conv (single fat-K matmul) -> instance-norm [-> relu].

    x:      (H, W, Cp) float32
    w_flat: (9*Cp, Cp) bfloat16, im2col layout (dy, dx, cin) x cout
    gamma, beta: (1, Cp) float32
    """
    H, W, C = x.shape
    # Cast once per conv, before padding/slicing, so all staging is bf16.
    xp = _reflect_pad1(x.astype(jnp.bfloat16))                     # (H+2, W+2, Cp)
    cols = jnp.concatenate(
        [xp[dy:dy + H, dx:dx + W, :] for dy in range(3) for dx in range(3)],
        axis=-1,
    ).reshape(H * W, 9 * C)                                        # (H*W, 9*Cp) bf16

    # Single MXU matmul, f32 accumulation.
    y = jnp.dot(cols, w_flat, preferred_element_type=jnp.float32)  # (H*W, Cp) f32

    # One-pass instance-norm statistics (biased variance, torch semantics).
    inv_n = 1.0 / float(H * W)
    mean = jnp.sum(y, axis=0, keepdims=True) * inv_n
    var = jnp.maximum(jnp.sum(y * y, axis=0, keepdims=True) * inv_n - mean * mean,
                      0.0)
    y = (y - mean) * lax.rsqrt(var + EPS) * gamma + beta
    if relu:
        y = jnp.maximum(y, 0.0)
    return y.reshape(H, W, C)


def resblock_kernel(x_ref, w1_ref, g1_ref, be1_ref, w2_ref, g2_ref, be2_ref, o_ref):
    x = x_ref[0]                                                   # (H, W, Cp) f32
    y = _conv_in_block(x, w1_ref[...], g1_ref[...], be1_ref[...], relu=True)
    y = _conv_in_block(y, w2_ref[...], g2_ref[...], be2_ref[...], relu=False)
    o_ref[0] = (y + x).astype(o_ref.dtype)


# ------------------------------ wrapper ------------------------------
def _round_up(x, m):
    return (x + m - 1) // m * m


def _flatten_conv_weight(w, C, Cp):
    # (3, 3, C, C) (kh, kw, cin, cout) -> zero-padded (9*Cp, Cp) bf16 im2col layout.
    wp = jnp.zeros((3, 3, Cp, Cp), jnp.float32).at[:, :, :C, :C].set(w)
    return wp.reshape(9 * Cp, Cp).astype(jnp.bfloat16)


def _pad_vec(v, Cp, fill):
    # (1, C) -> (1, Cp)
    C = v.shape[-1]
    return jnp.full((1, Cp), fill, jnp.float32).at[:, :C].set(v)


def res_block_nhwc(x, params):
    """x: (B, H, W, C) float32. params: dict of conv weights / norm affine params."""
    B, H, W, C = x.shape
    Cp = _round_up(C, 128)

    w1 = _flatten_conv_weight(params["w1"], C, Cp)
    w2 = _flatten_conv_weight(params["w2"], C, Cp)
    g1 = _pad_vec(params["g1"], Cp, 1.0)
    g2 = _pad_vec(params["g2"], Cp, 1.0)
    be1 = _pad_vec(params["be1"], Cp, 0.0)
    be2 = _pad_vec(params["be2"], Cp, 0.0)
    # Conv biases ("b1"/"b2") are intentionally NOT passed to the kernel:
    # InstanceNorm subtracts the per-channel mean right after the conv, which
    # cancels a per-channel constant bias exactly.

    xin = x if Cp == C else jnp.pad(x, ((0, 0), (0, 0), (0, 0), (0, Cp - C)))

    img_spec = pl.BlockSpec((1, H, W, Cp), lambda b: (b, 0, 0, 0))
    w_spec = pl.BlockSpec((9 * Cp, Cp), lambda b: (0, 0))
    vec_spec = pl.BlockSpec((1, Cp), lambda b: (0, 0))

    # Rough per-grid-step VMEM working set; only raise the scoped limit when it
    # outgrows the conservative per-generation defaults (kept below v7x's 64 MiB).
    n = H * W * Cp
    est = int(4 * n * 2 * 2                 # x / out blocks, double-buffered, f32
              + 2 * (H + 2) * (W + 2) * Cp  # reflect-padded bf16 image
              + 2 * n * 9                   # im2col staging, bf16
              + 4 * n * 4                   # f32 conv / norm intermediates
              + 2 * 9 * Cp * Cp * 2)        # both bf16 weight slabs
    cp_kwargs = dict(dimension_semantics=("parallel",))
    if est > 16 * 1024 * 1024:
        cp_kwargs["vmem_limit_bytes"] = min(2 * est, 60 * 1024 * 1024)

    out = pl.pallas_call(
        resblock_kernel,
        out_shape=jax.ShapeDtypeStruct((B, H, W, Cp), x.dtype),
        grid_spec=pltpu.PrefetchScalarGridSpec(
            num_scalar_prefetch=0,
            grid=(B,),
            in_specs=[img_spec, w_spec, vec_spec, vec_spec,
                      w_spec, vec_spec, vec_spec],
            out_specs=img_spec,
        ),
        compiler_params=pltpu.CompilerParams(**cp_kwargs),
    )(xin, w1, g1, be1, w2, g2, be2)
    # TODO(synk): for large images (esp. v7x's 64 MiB VMEM) add an H-row-tile
    # grid axis with a 1-row halo and a two-phase instance-norm reduction.
    return out[..., :C] if Cp != C else out


def res_block_nchw(x_nchw, params):
    """PyTorch-style NCHW entry point."""
    x = jnp.transpose(x_nchw, (0, 2, 3, 1))   # NCHW -> NHWC
    y = res_block_nhwc(x, params)
    return jnp.transpose(y, (0, 3, 1, 2))     # NHWC -> NCHW


# ---------- pure-JAX reference (correctness verification) ----------
# The reference mirrors the kernel's intentional MXU precision choice
# (bf16 conv operands, f32 accumulation) so the comparison can stay tight;
# everything else (reflect pad, bias, biased var, affine, relu, residual)
# follows the PyTorch module exactly.
def _ref_conv_block(x_nhwc, w, b, gamma, beta, relu):
    xp = jnp.pad(x_nhwc, ((0, 0), (1, 1), (1, 1), (0, 0)), mode="reflect")
    y = lax.conv_general_dilated(
        xp.astype(jnp.bfloat16), w.astype(jnp.bfloat16),
        window_strides=(1, 1), padding="VALID",
        dimension_numbers=("NHWC", "HWIO", "NHWC"),
        preferred_element_type=jnp.float32)
    y = y + b.reshape(1, 1, 1, -1)
    mean = jnp.mean(y, axis=(1, 2), keepdims=True)
    var = jnp.mean(jnp.square(y - mean), axis=(1, 2), keepdims=True)
    y = (y - mean) * lax.rsqrt(var + EPS)
    y = y * gamma.reshape(1, 1, 1, -1) + beta.reshape(1, 1, 1, -1)
    if relu:
        y = jnp.maximum(y, 0.0)
    return y


def _ref_res_block(x_nchw, p):
    x = jnp.transpose(x_nchw, (0, 2, 3, 1))
    y = _ref_conv_block(x, p["w1"], p["b1"], p["g1"], p["be1"], True)
    y = _ref_conv_block(y, p["w2"], p["b2"], p["g2"], p["be2"], False)
    return jnp.transpose(y + x, (0, 3, 1, 2))


if __name__ == "__main__":
    key = jax.random.PRNGKey(0)
    B, C, H, W = 2, 4, 16, 16

    ks = jax.random.split(key, 9)
    x_nchw = jax.random.normal(ks[0], (B, C, H, W), dtype=jnp.float32)

    # Conv weights in (kh, kw, Cin, Cout) layout; affine norm params as (1, C).
    params = {
        "w1": 0.1 * jax.random.normal(ks[1], (3, 3, C, C), dtype=jnp.float32),
        "b1": 0.1 * jax.random.normal(ks[2], (1, C), dtype=jnp.float32),
        "g1": 1.0 + 0.1 * jax.random.normal(ks[3], (1, C), dtype=jnp.float32),
        "be1": 0.1 * jax.random.normal(ks[4], (1, C), dtype=jnp.float32),
        "w2": 0.1 * jax.random.normal(ks[5], (3, 3, C, C), dtype=jnp.float32),
        "b2": 0.1 * jax.random.normal(ks[6], (1, C), dtype=jnp.float32),
        "g2": 1.0 + 0.1 * jax.random.normal(ks[7], (1, C), dtype=jnp.float32),
        "be2": 0.1 * jax.random.normal(ks[8], (1, C), dtype=jnp.float32),
    }

    out = jax.block_until_ready(res_block_nchw(x_nchw, params))
    ref = jax.block_until_ready(_ref_res_block(x_nchw, params))

    assert out.shape == (B, C, H, W)
    max_diff = float(jnp.max(jnp.abs(out - ref)))
    assert jnp.allclose(out, ref, atol=5e-3, rtol=5e-3), (
        f"mismatch vs JAX reference, max |diff| = {max_diff}")
    print("KERNEL_OK")
</pallas_src>

<mosaic_0001>
module attributes {stable_mosaic.version = 11 : i64} {
  func.func @resblock_kernel(%arg0: i32, %arg1: memref<1x16x16x128xf32, #tpu.memory_space<vmem>>, %arg2: memref<1152x128xbf16, #tpu.memory_space<vmem>>, %arg3: memref<1x128xf32, #tpu.memory_space<vmem>>, %arg4: memref<1x128xf32, #tpu.memory_space<vmem>>, %arg5: memref<1152x128xbf16, #tpu.memory_space<vmem>>, %arg6: memref<1x128xf32, #tpu.memory_space<vmem>>, %arg7: memref<1x128xf32, #tpu.memory_space<vmem>>, %arg8: memref<1x16x16x128xf32, #tpu.memory_space<vmem>>) attributes {dimension_semantics = [#tpu.dimension_semantics<parallel>], iteration_bounds = array<i64: 2>, scalar_prefetch = 0 : i64, scratch_operands = 0 : i64, tpu.core_type = #tpu.core_type<tc>, window_params = [{transform_indices = @transform_0, window_bounds = array<i64: 1, 16, 16, 128>}, {pipeline_mode = #tpu.pipeline_mode<synchronous>, transform_indices = @transform_1, window_bounds = array<i64: 1152, 128>}, {pipeline_mode = #tpu.pipeline_mode<synchronous>, transform_indices = @transform_2, window_bounds = array<i64: 1, 128>}, {pipeline_mode = #tpu.pipeline_mode<synchronous>, transform_indices = @transform_3, window_bounds = array<i64: 1, 128>}, {pipeline_mode = #tpu.pipeline_mode<synchronous>, transform_indices = @transform_4, window_bounds = array<i64: 1152, 128>}, {pipeline_mode = #tpu.pipeline_mode<synchronous>, transform_indices = @transform_5, window_bounds = array<i64: 1, 128>}, {pipeline_mode = #tpu.pipeline_mode<synchronous>, transform_indices = @transform_6, window_bounds = array<i64: 1, 128>}, {transform_indices = @transform_7, window_bounds = array<i64: 1, 16, 16, 128>}]} {
    %c0 = arith.constant 0 : index
    %c0_0 = arith.constant 0 : index
    %c0_1 = arith.constant 0 : index
    %c0_2 = arith.constant 0 : index
    %0 = vector.load %arg1[%c0, %c0_0, %c0_1, %c0_2] : memref<1x16x16x128xf32, #tpu.memory_space<vmem>>, vector<1x16x16x128xf32>
    %1 = vector.shape_cast %0 : vector<1x16x16x128xf32> to vector<16x16x128xf32>
    %c0_3 = arith.constant 0 : index
    %c0_4 = arith.constant 0 : index
    %2 = vector.load %arg2[%c0_3, %c0_4] : memref<1152x128xbf16, #tpu.memory_space<vmem>>, vector<1152x128xbf16>
    %c0_5 = arith.constant 0 : index
    %c0_6 = arith.constant 0 : index
    %3 = vector.load %arg3[%c0_5, %c0_6] : memref<1x128xf32, #tpu.memory_space<vmem>>, vector<1x128xf32>
    %c0_7 = arith.constant 0 : index
    %c0_8 = arith.constant 0 : index
    %4 = vector.load %arg4[%c0_7, %c0_8] : memref<1x128xf32, #tpu.memory_space<vmem>>, vector<1x128xf32>
    %5 = arith.truncf %1 : vector<16x16x128xf32> to vector<16x16x128xbf16>
    %6 = vector.extract_strided_slice %5 {offsets = [1, 0, 0], sizes = [1, 16, 128], strides = [1, 1, 1]} : vector<16x16x128xbf16> to vector<1x16x128xbf16>
    %7 = vector.extract_strided_slice %5 {offsets = [14, 0, 0], sizes = [1, 16, 128], strides = [1, 1, 1]} : vector<16x16x128xbf16> to vector<1x16x128xbf16>
    %8 = tpu.concatenate %6, %5, %7 in 0 : vector<1x16x128xbf16>, vector<16x16x128xbf16>, vector<1x16x128xbf16> -> vector<18x16x128xbf16>
    %9 = vector.extract_strided_slice %8 {offsets = [0, 1, 0], sizes = [18, 1, 128], strides = [1, 1, 1]} : vector<18x16x128xbf16> to vector<18x1x128xbf16>
    %10 = vector.extract_strided_slice %8 {offsets = [0, 14, 0], sizes = [18, 1, 128], strides = [1, 1, 1]} : vector<18x16x128xbf16> to vector<18x1x128xbf16>
    %11 = tpu.concatenate %9, %8, %10 in 1 : vector<18x1x128xbf16>, vector<18x16x128xbf16>, vector<18x1x128xbf16> -> vector<18x18x128xbf16>
    %12 = vector.extract_strided_slice %11 {offsets = [0, 0, 0], sizes = [16, 16, 128], strides = [1, 1, 1]} : vector<18x18x128xbf16> to vector<16x16x128xbf16>
    %13 = vector.extract_strided_slice %11 {offsets = [0, 1, 0], sizes = [16, 16, 128], strides = [1, 1, 1]} : vector<18x18x128xbf16> to vector<16x16x128xbf16>
    %14 = vector.extract_strided_slice %11 {offsets = [0, 2, 0], sizes = [16, 16, 128], strides = [1, 1, 1]} : vector<18x18x128xbf16> to vector<16x16x128xbf16>
    %15 = vector.extract_strided_slice %11 {offsets = [1, 0, 0], sizes = [16, 16, 128], strides = [1, 1, 1]} : vector<18x18x128xbf16> to vector<16x16x128xbf16>
    %16 = vector.extract_strided_slice %11 {offsets = [1, 1, 0], sizes = [16, 16, 128], strides = [1, 1, 1]} : vector<18x18x128xbf16> to vector<16x16x128xbf16>
    %17 = vector.extract_strided_slice %11 {offsets = [1, 2, 0], sizes = [16, 16, 128], strides = [1, 1, 1]} : vector<18x18x128xbf16> to vector<16x16x128xbf16>
    %18 = vector.extract_strided_slice %11 {offsets = [2, 0, 0], sizes = [16, 16, 128], strides = [1, 1, 1]} : vector<18x18x128xbf16> to vector<16x16x128xbf16>
    %19 = vector.extract_strided_slice %11 {offsets = [2, 1, 0], sizes = [16, 16, 128], strides = [1, 1, 1]} : vector<18x18x128xbf16> to vector<16x16x128xbf16>
    %20 = vector.extract_strided_slice %11 {offsets = [2, 2, 0], sizes = [16, 16, 128], strides = [1, 1, 1]} : vector<18x18x128xbf16> to vector<16x16x128xbf16>
    %21 = tpu.concatenate %12, %13, %14, %15, %16, %17, %18, %19, %20 in 2 : vector<16x16x128xbf16>, vector<16x16x128xbf16>, vector<16x16x128xbf16>, vector<16x16x128xbf16>, vector<16x16x128xbf16>, vector<16x16x128xbf16>, vector<16x16x128xbf16>, vector<16x16x128xbf16>, vector<16x16x128xbf16> -> vector<16x16x1152xbf16>
    %22 = vector.shape_cast %21 : vector<16x16x1152xbf16> to vector<256x1152xbf16>
    %cst = arith.constant dense<0.000000e+00> : vector<256x128xf32>
    %23 = tpu.matmul %22, %2, %cst {dimension_numbers = #tpu.dot_dimension_numbers<[1], [0], [0], [1], [0, 0, 1, 1], [], []>} : vector<256x1152xbf16>, vector<1152x128xbf16>, vector<256x128xf32> -> vector<256x128xf32>
    %cst_9 = arith.constant dense<0.000000e+00> : vector<128xf32>
    %24 = vector.multi_reduction <add>, %23, %cst_9 [0] : vector<256x128xf32> to vector<128xf32>
    %25 = vector.shape_cast %24 : vector<128xf32> to vector<1x128xf32>
    %cst_10 = arith.constant 3.906250e-03 : f32
    %26 = vector.broadcast %cst_10 : f32 to vector<1x128xf32>
    %27 = arith.mulf %25, %26 : vector<1x128xf32>
    %28 = arith.mulf %23, %23 : vector<256x128xf32>
    %cst_11 = arith.constant dense<0.000000e+00> : vector<128xf32>
    %29 = vector.multi_reduction <add>, %28, %cst_11 [0] : vector<256x128xf32> to vector<128xf32>
    %30 = vector.shape_cast %29 : vector<128xf32> to vector<1x128xf32>
    %cst_12 = arith.constant 3.906250e-03 : f32
    %31 = vector.broadcast %cst_12 : f32 to vector<1x128xf32>
    %32 = arith.mulf %30, %31 : vector<1x128xf32>
    %33 = arith.mulf %27, %27 : vector<1x128xf32>
    %34 = arith.subf %32, %33 : vector<1x128xf32>
    %cst_13 = arith.constant 0.000000e+00 : f32
    %35 = vector.broadcast %cst_13 : f32 to vector<1x128xf32>
    %36 = arith.maximumf %34, %35 : vector<1x128xf32>
    %37 = vector.broadcast %27 : vector<1x128xf32> to vector<256x128xf32>
    %38 = arith.subf %23, %37 : vector<256x128xf32>
    %cst_14 = arith.constant 9.99999974E-6 : f32
    %39 = vector.broadcast %cst_14 : f32 to vector<1x128xf32>
    %40 = arith.addf %36, %39 : vector<1x128xf32>
    %41 = math.rsqrt %40 : vector<1x128xf32>
    %42 = vector.broadcast %41 : vector<1x128xf32> to vector<256x128xf32>
    %43 = arith.mulf %38, %42 : vector<256x128xf32>
    %44 = vector.broadcast %3 : vector<1x128xf32> to vector<256x128xf32>
    %45 = arith.mulf %43, %44 : vector<256x128xf32>
    %46 = vector.broadcast %4 : vector<1x128xf32> to vector<256x128xf32>
    %47 = arith.addf %45, %46 : vector<256x128xf32>
    %cst_15 = arith.constant 0.000000e+00 : f32
    %48 = vector.broadcast %cst_15 : f32 to vector<256x128xf32>
    %49 = arith.maximumf %47, %48 : vector<256x128xf32>
    %50 = vector.shape_cast %49 : vector<256x128xf32> to vector<16x16x128xf32>
    %c0_16 = arith.constant 0 : index
    %c0_17 = arith.constant 0 : index
    %51 = vector.load %arg5[%c0_16, %c0_17] : memref<1152x128xbf16, #tpu.memory_space<vmem>>, vector<1152x128xbf16>
    %c0_18 = arith.constant 0 : index
    %c0_19 = arith.constant 0 : index
    %52 = vector.load %arg6[%c0_18, %c0_19] : memref<1x128xf32, #tpu.memory_space<vmem>>, vector<1x128xf32>
    %c0_20 = arith.constant 0 : index
    %c0_21 = arith.constant 0 : index
    %53 = vector.load %arg7[%c0_20, %c0_21] : memref<1x128xf32, #tpu.memory_space<vmem>>, vector<1x128xf32>
    %54 = arith.truncf %50 : vector<16x16x128xf32> to vector<16x16x128xbf16>
    %55 = vector.extract_strided_slice %54 {offsets = [1, 0, 0], sizes = [1, 16, 128], strides = [1, 1, 1]} : vector<16x16x128xbf16> to vector<1x16x128xbf16>
    %56 = vector.extract_strided_slice %54 {offsets = [14, 0, 0], sizes = [1, 16, 128], strides = [1, 1, 1]} : vector<16x16x128xbf16> to vector<1x16x128xbf16>
    %57 = tpu.concatenate %55, %54, %56 in 0 : vector<1x16x128xbf16>, vector<16x16x128xbf16>, vector<1x16x128xbf16> -> vector<18x16x128xbf16>
    %58 = vector.extract_strided_slice %57 {offsets = [0, 1, 0], sizes = [18, 1, 128], strides = [1, 1, 1]} : vector<18x16x128xbf16> to vector<18x1x128xbf16>
    %59 = vector.extract_strided_slice %57 {offsets = [0, 14, 0], sizes = [18, 1, 128], strides = [1, 1, 1]} : vector<18x16x128xbf16> to vector<18x1x128xbf16>
    %60 = tpu.concatenate %58, %57, %59 in 1 : vector<18x1x128xbf16>, vector<18x16x128xbf16>, vector<18x1x128xbf16> -> vector<18x18x128xbf16>
    %61 = vector.extract_strided_slice %60 {offsets = [0, 0, 0], sizes = [16, 16, 128], strides = [1, 1, 1]} : vector<18x18x128xbf16> to vector<16x16x128xbf16>
    %62 = vector.extract_strided_slice %60 {offsets = [0, 1, 0], sizes = [16, 16, 128], strides = [1, 1, 1]} : vector<18x18x128xbf16> to vector<16x16x128xbf16>
    %63 = vector.extract_strided_slice %60 {offsets = [0, 2, 0], sizes = [16, 16, 128], strides = [1, 1, 1]} : vector<18x18x128xbf16> to vector<16x16x128xbf16>
    %64 = vector.extract_strided_slice %60 {offsets = [1, 0, 0], sizes = [16, 16, 128], strides = [1, 1, 1]} : vector<18x18x128xbf16> to vector<16x16x128xbf16>
    %65 = vector.extract_strided_slice %60 {offsets = [1, 1, 0], sizes = [16, 16, 128], strides = [1, 1, 1]} : vector<18x18x128xbf16> to vector<16x16x128xbf16>
    %66 = vector.extract_strided_slice %60 {offsets = [1, 2, 0], sizes = [16, 16, 128], strides = [1, 1, 1]} : vector<18x18x128xbf16> to vector<16x16x128xbf16>
    %67 = vector.extract_strided_slice %60 {offsets = [2, 0, 0], sizes = [16, 16, 128], strides = [1, 1, 1]} : vector<18x18x128xbf16> to vector<16x16x128xbf16>
    %68 = vector.extract_strided_slice %60 {offsets = [2, 1, 0], sizes = [16, 16, 128], strides = [1, 1, 1]} : vector<18x18x128xbf16> to vector<16x16x128xbf16>
    %69 = vector.extract_strided_slice %60 {offsets = [2, 2, 0], sizes = [16, 16, 128], strides = [1, 1, 1]} : vector<18x18x128xbf16> to vector<16x16x128xbf16>
    %70 = tpu.concatenate %61, %62, %63, %64, %65, %66, %67, %68, %69 in 2 : vector<16x16x128xbf16>, vector<16x16x128xbf16>, vector<16x16x128xbf16>, vector<16x16x128xbf16>, vector<16x16x128xbf16>, vector<16x16x128xbf16>, vector<16x16x128xbf16>, vector<16x16x128xbf16>, vector<16x16x128xbf16> -> vector<16x16x1152xbf16>
    %71 = vector.shape_cast %70 : vector<16x16x1152xbf16> to vector<256x1152xbf16>
    %cst_22 = arith.constant dense<0.000000e+00> : vector<256x128xf32>
    %72 = tpu.matmul %71, %51, %cst_22 {dimension_numbers = #tpu.dot_dimension_numbers<[1], [0], [0], [1], [0, 0, 1, 1], [], []>} : vector<256x1152xbf16>, vector<1152x128xbf16>, vector<256x128xf32> -> vector<256x128xf32>
    %cst_23 = arith.constant dense<0.000000e+00> : vector<128xf32>
    %73 = vector.multi_reduction <add>, %72, %cst_23 [0] : vector<256x128xf32> to vector<128xf32>
    %74 = vector.shape_cast %73 : vector<128xf32> to vector<1x128xf32>
    %cst_24 = arith.constant 3.906250e-03 : f32
    %75 = vector.broadcast %cst_24 : f32 to vector<1x128xf32>
    %76 = arith.mulf %74, %75 : vector<1x128xf32>
    %77 = arith.mulf %72, %72 : vector<256x128xf32>
    %cst_25 = arith.constant dense<0.000000e+00> : vector<128xf32>
    %78 = vector.multi_reduction <add>, %77, %cst_25 [0] : vector<256x128xf32> to vector<128xf32>
    %79 = vector.shape_cast %78 : vector<128xf32> to vector<1x128xf32>
    %cst_26 = arith.constant 3.906250e-03 : f32
    %80 = vector.broadcast %cst_26 : f32 to vector<1x128xf32>
    %81 = arith.mulf %79, %80 : vector<1x128xf32>
    %82 = arith.mulf %76, %76 : vector<1x128xf32>
    %83 = arith.subf %81, %82 : vector<1x128xf32>
    %cst_27 = arith.constant 0.000000e+00 : f32
    %84 = vector.broadcast %cst_27 : f32 to vector<1x128xf32>
    %85 = arith.maximumf %83, %84 : vector<1x128xf32>
    %86 = vector.broadcast %76 : vector<1x128xf32> to vector<256x128xf32>
    %87 = arith.subf %72, %86 : vector<256x128xf32>
    %cst_28 = arith.constant 9.99999974E-6 : f32
    %88 = vector.broadcast %cst_28 : f32 to vector<1x128xf32>
    %89 = arith.addf %85, %88 : vector<1x128xf32>
    %90 = math.rsqrt %89 : vector<1x128xf32>
    %91 = vector.broadcast %90 : vector<1x128xf32> to vector<256x128xf32>
    %92 = arith.mulf %87, %91 : vector<256x128xf32>
    %93 = vector.broadcast %52 : vector<1x128xf32> to vector<256x128xf32>
    %94 = arith.mulf %92, %93 : vector<256x128xf32>
    %95 = vector.broadcast %53 : vector<1x128xf32> to vector<256x128xf32>
    %96 = arith.addf %94, %95 : vector<256x128xf32>
    %97 = vector.shape_cast %96 : vector<256x128xf32> to vector<16x16x128xf32>
    %98 = arith.addf %97, %1 : vector<16x16x128xf32>
    %c0_29 = arith.constant 0 : index
    %c0_30 = arith.constant 0 : index
    %c0_31 = arith.constant 0 : index
    %c0_32 = arith.constant 0 : index
    %99 = vector.load %arg8[%c0_29, %c0_30, %c0_31, %c0_32] : memref<1x16x16x128xf32, #tpu.memory_space<vmem>>, vector<1x16x16x128xf32>
    %100 = vector.shape_cast %99 : vector<1x16x16x128xf32> to vector<16x16x128xf32>
    %101 = vector.shape_cast %98 : vector<16x16x128xf32> to vector<1x16x16x128xf32>
    tpu.vector_store %arg8[%c0_29, %c0_30, %c0_31, %c0_32], %101 {strides = array<i32>} : memref<1x16x16x128xf32, #tpu.memory_space<vmem>>, vector<1x16x16x128xf32>,
    return
  }
  func.func @transform_0(%arg0: i32) -> (i32, i32, i32, i32) {
    %c0_i32 = arith.constant 0 : i32
    %c0_i32_0 = arith.constant 0 : i32
    %c0_i32_1 = arith.constant 0 : i32
    %c0_i32_2 = arith.constant 0 : i32
    return %arg0, %c0_i32, %c0_i32_0, %c0_i32_1 : i32, i32, i32, i32
  }
  func.func @transform_1(%arg0: i32) -> (i32, i32) {
    %c0_i32 = arith.constant 0 : i32
    %c0_i32_0 = arith.constant 0 : i32
    %c0_i32_1 = arith.constant 0 : i32
    return %c0_i32, %c0_i32_0 : i32, i32
  }
  func.func @transform_2(%arg0: i32) -> (i32, i32) {
    %c0_i32 = arith.constant 0 : i32
    %c0_i32_0 = arith.constant 0 : i32
    %c0_i32_1 = arith.constant 0 : i32
    return %c0_i32, %c0_i32_0 : i32, i32
  }
  func.func @transform_3(%arg0: i32) -> (i32, i32) {
    %c0_i32 = arith.constant 0 : i32
    %c0_i32_0 = arith.constant 0 : i32
    %c0_i32_1 = arith.constant 0 : i32
    return %c0_i32, %c0_i32_0 : i32, i32
  }
  func.func @transform_4(%arg0: i32) -> (i32, i32) {
    %c0_i32 = arith.constant 0 : i32
    %c0_i32_0 = arith.constant 0 : i32
    %c0_i32_1 = arith.constant 0 : i32
    return %c0_i32, %c0_i32_0 : i32, i32
  }
  func.func @transform_5(%arg0: i32) -> (i32, i32) {
    %c0_i32 = arith.constant 0 : i32
    %c0_i32_0 = arith.constant 0 : i32
    %c0_i32_1 = arith.constant 0 : i32
    return %c0_i32, %c0_i32_0 : i32, i32
  }
  func.func @transform_6(%arg0: i32) -> (i32, i32) {
    %c0_i32 = arith.constant 0 : i32
    %c0_i32_0 = arith.constant 0 : i32
    %c0_i32_1 = arith.constant 0 : i32
    return %c0_i32, %c0_i32_0 : i32, i32
  }
  func.func @transform_7(%arg0: i32) -> (i32, i32, i32, i32) {
    %c0_i32 = arith.constant 0 : i32
    %c0_i32_0 = arith.constant 0 : i32
    %c0_i32_1 = arith.constant 0 : i32
    %c0_i32_2 = arith.constant 0 : i32
    return %arg0, %c0_i32, %c0_i32_0, %c0_i32_1 : i32, i32, i32, i32
  }
}

</mosaic_0001>

<bundles_post_ra>
// kernel: tpu_custom_call.1
= control target key start
LH: loop header
LB: loop body
LE: loop exit
PB: predicated region body
PF: predicated region fallthrough
CT: control target
= control target key end

     0   :  { %12 = vsyncpa [#allocation3], 0  ;;  %s8994_s0 = inlined_call_operand.hbm [shape: f32[2,16,16,128], index: 0, kind: input, shape index: {}]   ;;  %s8995_s1 = inlined_call_operand.hbm [shape: bf16[1152,128], index: 1, kind: input, shape index: {}]   ;;  %s8996_s2 = inlined_call_operand.vmem [shape: f32[1,128], index: 2, kind: input, shape index: {}]   ;;  %s8997_s3 = inlined_call_operand.vmem [shape: f32[1,128], index: 3, kind: input, shape index: {}]   ;;  %s8998_s4 = inlined_call_operand.hbm [shape: bf16[1152,128], index: 4, kind: input, shape index: {}]   ;;  %s8999_s5 = inlined_call_operand.vmem [shape: f32[1,128], index: 5, kind: input, shape index: {}]   ;;  %s9000_s6 = inlined_call_operand.vmem [shape: f32[1,128], index: 6, kind: input, shape index: {}]   ;;  %s9001_s7 = inlined_call_operand.hbm [shape: f32[2,16,16,128], index: 7, kind: output, shape index: {}]  }
   0x1   :  { %14 = vsyncpa [#allocation3 + $0x1], 0 }
   0x2   :  { %15 = vsyncpa [#allocation6], 0 }
   0x3   :  { %16 = vsyncpa [#allocation4], 0 }
   0x4   :  { %18 = vsyncpa [#allocation4 + $0x1], 0  ;;  %s6595_s24 = smov 0   ;;  %s6597_s25 = smov 0  }
   0x5   :  { %s6599_s26 = smov 0   ;;  %s6601_s27 = smov 0  }
   0x6 LB: > { %s6616_s28 = sadd.s32 4294967295, %s6543_s27   ;;  %s4926_s29 = sadd.s32 4294967294, %s6543_s27   ;;  %s6543_s27 = sphi %s6601_s27, %s9038_s27   ;;  %s6539_s26 = sphi %s6599_s26, %s9037_s26   ;;  %s6535_s25 = sphi %s6597_s25, %s9036_s25   ;;  %s6531_s24 = sphi %s6595_s24, %s9035_s24  }
   0x7   : > { %p44_p0 = scmp.ne.s32.totalorder %s6535_s25, %s6531_s24  ;;  %p9002_p1 = scmp.eq.s32.totalorder %s6616_s28, 0 }
   0x8   : > { %p200_p3 = scmp.eq.s32.totalorder %s4926_s29, 1  ;;  %p4927_p5 = scmp.ge.s32.totalorder %s6543_s27, 1 }
   0x9   : > { %p6625_p4 = por %p9002_p1, %p44_p0  ;;  %p207_p7 = scmp.lt.s32.totalorder %s6543_s27, 3 }
   0xa   : > { %p6630_p6 = por %p200_p3, %p44_p0  ;;  %s6545_s10 = smov [#allocation5]  }
   0xb   : > { %s9007_s30 = scalar_select %p6625_p4, 1, 0 }
   0xc   : > { %s9008_s8 = scalar_select %p6630_p6, 1, 0 }
   0xd   : > { %p6635_p8 = pnand %p4927_p5, %p207_p7  ;;  %s219_s11 = sshll.u32 %s6545_s10, 4  ;;  %s6639_s11 = int_to_ptr.vmem [resolvable:$true] %s219_s11 }
   0xe   : > { %s6546_s13 = smov [#allocation7]   ;;  %s6387_s17 = scalar_lea.hbm %s8995_s1, 9216 }
   0xf   : > { %p6146_p9 = pneg %p6635_p8  ;;  %s238_s14 = sshll.u32 %s6546_s13, 4  ;;  %s6650_s14 = int_to_ptr.vmem [resolvable:$true] %s238_s14 }
  0x10   : > { %p6388_p12 = scmp.ne.s32.totalorder %s8995_s1, %s6387_s17  ;;  %p6394_p5 = scmp.lt.u32.totalorder %s6387_s17, %s8995_s1 }
  0x11   : > { %p6646_p11 = pnand %p6146_p9, %p9002_p1 }
  0x13   : > { %p6389_p13 = pneg %p6646_p11 }
  0x15   : > { %p6390_p0 = pnand %p6389_p13, %p6388_p12 }
  0x17   : > { %p6391_p3 = pneg %p6390_p0 }
  0x19   : > { %p6396_p7 = pnand %p6394_p5, %p6391_p3 }
  0x1b   : > { %6399 = shalt.err (!%p6396_p7)
}
  0x1c   : > { %s6400_s22 = scalar_lea.vmem %s6639_s11, 9216  ;;  %p6408_p2 = scmp.lt.s32.totalorder %s6639_s11, %s6639_s11 }
  0x1d   : > { %p6401_p9 = scmp.ne.s32.totalorder %s6639_s11, %s6400_s22  ;;  %p6409_p12 = scmp.lt.s32.totalorder %s6400_s22, %s6400_s22 }
  0x1f   : > { %p6403_p10 = pnand %p6401_p9, %p6389_p13  ;;  %p6410_p0 = por %p6409_p12, %p6408_p2 }
  0x21   : > { %p6404_p1 = pneg %p6403_p10 }
  0x23   : > { %p6411_p6 = pnand %p6410_p0, %p6404_p1 }
  0x25   : > { %6414 = shalt.err (!%p6411_p6)
}
  0x26   : > { %s6547_s23 = smov 64   ;;  %s6548_s29 = smov 4  }
  0x27   : > { %6149 = dma.hbm_to_vmem [thread:$0]  (!%p6646_p11), %s8995_s1, 9216, %s6639_s11, [#allocation6], %s6547_s23, %s6547_s23, %s6548_s29  }
  0x28   : > { %s6415_s17 = scalar_lea.hbm %s8998_s4, 9216 }
  0x29   : > { %p6416_p2 = scmp.ne.s32.totalorder %s8998_s4, %s6415_s17  ;;  %p6422_p10 = scmp.lt.u32.totalorder %s6415_s17, %s8998_s4 }
  0x2b   : > { %p6418_p1 = pnand %p6416_p2, %p6389_p13 }
  0x2d   : > { %p6419_p6 = pneg %p6418_p1 }
  0x2f   : > { %p6424_p3 = pnand %p6422_p10, %p6419_p6 }
  0x31   : > { %6427 = shalt.err (!%p6424_p3)
}
  0x32   : > { %s6428_s11 = scalar_lea.vmem %s6650_s14, 9216  ;;  %p6436_p12 = scmp.lt.s32.totalorder %s6650_s14, %s6650_s14 }
  0x33   : > { %p6429_p5 = scmp.ne.s32.totalorder %s6650_s14, %s6428_s11  ;;  %p6437_p0 = scmp.lt.s32.totalorder %s6428_s11, %s6428_s11 }
  0x35   : > { %p6431_p7 = pnand %p6429_p5, %p6389_p13  ;;  %p6438_p2 = por %p6437_p0, %p6436_p12 }
  0x37   : > { %p6432_p9 = pneg %p6431_p7 }
  0x39   : > { %p6439_p1 = pnand %p6438_p2, %p6432_p9 }
  0x3b   : > { %6442 = shalt.err (!%p6439_p1)
}
  0x3c   : > { %6152 = dma.hbm_to_vmem [thread:$0]  (!%p6646_p11), %s8998_s4, 9216, %s6650_s14, [#allocation6], %s6547_s23, %s6547_s23, %s6548_s29  }
  0x3d   : > { %s6705_s13 = sadd.s32 1, %s6543_s27   ;;  %s31_s12 = sadd.s32 1, %s6539_s26 }
  0x3e   : > { %s28_s15 = ssub.s32 %s6543_s27, %s6705_s13  ;;  %p38_p13 = scmp.ne.s32.totalorder %s6539_s26, %s6535_s25 }
  0x3f   : > { %p29_p6 = scmp.eq.s32.totalorder %s28_s15, 0  ;;  %p39_p10 = scmp.eq.s32.totalorder %s6543_s27, 0 }
  0x40   : > { %p9011_p3 = scmp.eq.s32.totalorder %s6616_s28, 1  ;;  %p6163_p7 = scmp.lt.s32.totalorder %s6543_s27, 2 }
  0x41   : > { %s6721_s17 = scalar_select %p29_p6, %s6539_s26, %s31_s12  }
  0x42   : > { %p6715_p5 = por %p9011_p3, %p38_p13  ;;  %p40_p9 = por %p39_p10, %p38_p13 }
  0x43   : > { %s258_s18 = sand.u32 1, %s6539_s26   ;;  %s5092_s14 = sshll.u32 %s6543_s27, 12 }
  0x44   : > { %s9012_s16 = scalar_select %p6715_p5, 1, 0 }
  0x45   : > { %s4931_s19 = sshll.u32 %s258_s18, 8  ;;  %s6728_s20 = scalar_lea.hbm %s8994_s0, %s5092_s14 }
  0x46   : > { %s262_s21 = scalar_lea.vmem [#allocation2], %s4931_s19  ;;  %p6732_p11 = pnand %p6163_p7, %p40_p9 }
  0x47   : > { %s269_s11 = sshll.u32 %s262_s21, 4  ;;  %s6736_s10 = scalar_lea.sflag [#allocation3], %s258_s18  ;;  %s6730_s11 = int_to_ptr.vmem [resolvable:$true] %s269_s11 }
  0x48   : > { %s6443_s12 = scalar_lea.hbm %s6728_s20, 4096  ;;  %p6445_p0 = pneg %p6732_p11 }
  0x49   : > { %p6444_p12 = scmp.ne.s32.totalorder %s6728_s20, %s6443_s12  ;;  %s6448_s14 = scalar_lea.hbm %s8994_s0, 8192 }
  0x4a   : > { %p6449_p13 = scmp.lt.u32.totalorder %s6728_s20, %s8994_s0  ;;  %p6450_p6 = scmp.lt.u32.totalorder %s6448_s14, %s6443_s12 }
  0x4b   : > { %p6446_p2 = pnand %p6445_p0, %p6444_p12  ;;  %p6452_p3 = scmp.lt.u32.totalorder %s6443_s12, %s6728_s20 }
  0x4c   : > { %p6451_p10 = por %p6450_p6, %p6449_p13 }
  0x4d   : > { %p6447_p1 = pneg %p6446_p2 }
  0x4e   : > { %p6453_p7 = por %p6452_p3, %p6451_p10 }
  0x50   : > { %p6454_p9 = pnand %p6453_p7, %p6447_p1 }
  0x52   : > { %6457 = shalt.err (!%p6454_p9)
}
  0x53   : > { %s6458_s18 = scalar_lea.vmem %s6730_s11, 4096  ;;  %s6549_s21 = smov [#allocation2]  }
  0x54   : > { %p6459_p12 = scmp.ne.s32.totalorder %s6730_s11, %s6458_s18  ;;  %s6463_s15 = sshll.u32 %s6549_s21, 4  ;;  %s6464_s15 = int_to_ptr.vmem [resolvable:$false] %s6463_s15 }
  0x55   : > { %s6465_s19 = scalar_lea.vmem %s6464_s15, 8192  ;;  %p6466_p4 = scmp.lt.s32.totalorder %s6730_s11, %s6464_s15 }
  0x56   : > { %p6461_p2 = pnand %p6459_p12, %p6445_p0  ;;  %p6467_p13 = scmp.lt.s32.totalorder %s6465_s19, %s6458_s18 }
  0x58   : > { %p6462_p5 = pneg %p6461_p2  ;;  %p6468_p6 = por %p6467_p13, %p6466_p4 }
  0x5a   : > { %p6469_p10 = pnand %p6468_p6, %p6462_p5 }
  0x5c   : > { %6472 = shalt.err (!%p6469_p10)
}
  0x5d   : > { %s6550_s12 = smov 128   ;;  %s6551_s14 = smov 8  }
  0x5e   : > { %6156 = dma.hbm_to_vmem [thread:$0]  (!%p6732_p11), %s6728_s20, 4096, %s6730_s11, %s6736_s10, %s6550_s12, %s6550_s12, %s6551_s14  }
  0x5f   : > { %281 = sbr.rel (%p6635_p8) target bundleno = 1385 (0x569), region = 48 }
  0x66   : > { %s6767_s23 = sand.u32 1, %s6535_s25   ;;  %p9014_p4 = scmp.ne.s32.totalorder %s9007_s30, 0 }
  0x67   : > { %s4935_s29 = sshll.u32 %s6767_s23, 8  ;;  %s284_s18 = scalar_lea.sflag [#allocation3], %s6767_s23 }
  0x68   : > { %s6773_s21 = scalar_lea.vmem [#allocation2], %s4935_s29 }
  0x69   : > { %6518 = dma.done.wait (%p9014_p4), %s284_s18, 4096  }
  0x6a   : > { %6520 = vsyncadd (%p9014_p4), %s284_s18, 4294963200  ;;  %p9015_p5 = scmp.eq.s32.totalorder %s6616_s28, 0 }
  0x6c   : > { %6522 = dma.done.wait (%p9015_p5), [#allocation6], 18432   ;;  %p9016_p8 = pmov %p9015_p5 }
  0x6d   : > { %v6207_v0 = vld [vmem:[#allocation5 + $0x40] sm:$0xff]   ;;  %v6211_v4 = vld [vmem:[#allocation5 + $0x48] sm:$0xff]   ;;  %v6215_v8 = vld [vmem:[#allocation5 + $0x50] sm:$0xff]   ;;  %vm713_vm0 = vcmask 1040384   ;;  %vm714_vm1 = vsmask.f32 256 }
  0x6e   : > { %6524 = vsyncadd (%p9016_p8), [#allocation6], 4294948864  ;;  %v6208_v1 = vld [vmem:[#allocation5 + $0xc0] sm:$0xff]   ;;  %5094 = vmatprep.subr.bf16.mxu0 %v6207_v0  ;;  %v6212_v5 = vld [vmem:[#allocation5 + $0xc8] sm:$0xff]   ;;  %vm748_vm3 = vsmask.f32 7424 }
  0x6f   : > { %v6209_v2 = vld [vmem:[#allocation5] sm:$0xff]   ;;  %5206 = vmatprep.subr.bf16.mxu1 %v6208_v1  ;;  %v6213_v6 = vld [vmem:[#allocation5 + $0x8] sm:$0xff]   ;;  %v6216_v9 = vld [vmem:[#allocation5 + $0xd0] sm:$0xff]   ;;  %vm974_vm4 = vcmask 1046528   ;;  %s8776_s12 = scalar_lea.vmem [#allocation8], %s4935_s29  ;;  %s5093_s14 = sshll.u32 %s6616_s28, 12 }
  0x70   : > { %v6210_v3 = vld [vmem:[#allocation5 + $0x80] sm:$0xff]   ;;  %5095 = vmatpush3.bf16.msra.mxu0 %v6209_v2  ;;  %v6214_v7 = vld [vmem:[#allocation5 + $0x88] sm:$0xff]   ;;  %v6217_v10 = vld [vmem:[#allocation5 + $0x10] sm:$0xff]   ;;  %s4834_s29 = sshll.u32 %s8776_s12, 4  ;;  %s8926_s9 = scalar_lea.hbm %s9001_s7, %s5093_s14  ;;  %s8930_s29 = int_to_ptr.vmem [resolvable:$true] %s4834_s29 }
  0x71   : > { %5207 = vmatpush3.bf16.msra.mxu1 %v6210_v3  ;;  %5096 = vmatprep.subr.bf16.mxu0 %v6211_v4  ;;  %v6218_v11 = vld [vmem:[#allocation5 + $0x90] sm:$0xff]   ;;  %v6219_v12 = vld [vmem:[#allocation5 + $0x58] sm:$0xff]   ;;  %v6223_v16 = vld [vmem:[#allocation5 + $0x60] sm:$0xff]   ;;  %s4821_s28 = scalar_lea.sflag [#allocation4], %s6767_s23  ;;  %s6473_s20 = scalar_lea.vmem %s8930_s29, 4096 }
  0x72   : > { %5208 = vmatprep.subr.bf16.mxu1 %v6212_v5  ;;  %v6220_v13 = vld [vmem:[#allocation5 + $0xd8] sm:$0xff]   ;;  %v6224_v17 = vld [vmem:[#allocation5 + $0xe0] sm:$0xff]   ;;  %v6227_v20 = vld [vmem:[#allocation5 + $0x68] sm:$0xff]   ;;  %p6474_p11 = scmp.ne.s32.totalorder %s8930_s29, %s6473_s20  ;;  %p9032_p0 = scmp.ne.s32.totalorder %s9012_s16, 0 }
  0x73   : > { %v6221_v14 = vld [vmem:[#allocation5 + $0x18] sm:$0xff]   ;;  %v6225_v18 = vld [vmem:[#allocation5 + $0x20] sm:$0xff]   ;;  %v6228_v21 = vld [vmem:[#allocation5 + $0xe8] sm:$0xff]  }
  0x74   : > { %5097 = vmatpush3.bf16.msra.mxu0 %v6213_v6  ;;  %v6222_v15 = vld [vmem:[#allocation5 + $0x98] sm:$0xff]   ;;  %v6226_v19 = vld [vmem:[#allocation5 + $0xa0] sm:$0xff]   ;;  %v6229_v22 = vld [vmem:[#allocation5 + $0x28] sm:$0xff]   ;;  %p6475_p1 = pnand %p6474_p11, %p9032_p0 }
  0x75   : > { %5209 = vmatpush3.bf16.msra.mxu1 %v6214_v7  ;;  %5098 = vmatprep.subr.bf16.mxu0 %v6215_v8  ;;  %v6230_v23 = vld [vmem:[#allocation5 + $0xa8] sm:$0xff]   ;;  %v6231_v24 = vld [vmem:[#allocation5 + $0x70] sm:$0xff]   ;;  %v6235_v28 = vld [vmem:[#allocation5 + $0x78] sm:$0xff]  }
  0x76   : > { %5210 = vmatprep.subr.bf16.mxu1 %v6216_v9  ;;  %v6232_v25 = vld [vmem:[#allocation5 + $0xf0] sm:$0xff]   ;;  %v6236_v29 = vld [vmem:[#allocation5 + $0xf8] sm:$0xff]   ;;  %v327_v34 = vld [vmem:[%s6773_s21] sm:$0xff]  ;;  %p6476_p3 = pneg %p6475_p1 }
  0x77   : > { %v6233_v26 = vld [vmem:[#allocation5 + $0x30] sm:$0xff]   ;;  %v6237_v30 = vld [vmem:[#allocation5 + $0x38] sm:$0xff]   ;;  %v328_v36 = vld [vmem:[%s6773_s21 + $0x8] sm:$0xff] }
  0x78   : > { %5099 = vmatpush3.bf16.msra.mxu0 %v6217_v10  ;;  %v6234_v27 = vld [vmem:[#allocation5 + $0xb0] sm:$0xff]   ;;  %v6238_v31 = vld [vmem:[#allocation5 + $0xb8] sm:$0xff]   ;;  %v505_v37 = vpack.c.bf16 %v328_v36, %v327_v34  ;;  %v6239_v38 = vld [vmem:[#allocation5 + $0x140] sm:$0xff]  }
  0x79   : > { %5211 = vmatpush3.bf16.msra.mxu1 %v6218_v11  ;;  %5100 = vmatprep.subr.bf16.mxu0 %v6219_v12  ;;  %v329_v32 = vld [vmem:[%s6773_s21 + $0x10] sm:$0xff]  ;;  %v330_v33 = vld [vmem:[%s6773_s21 + $0x18] sm:$0xff]  ;;  %v331_v41 = vld [vmem:[%s6773_s21 + $0x20] sm:$0xff] }
  0x7a   : > { %5212 = vmatprep.subr.bf16.mxu1 %v6220_v13  ;;  %v506_v35 = vpack.c.bf16 %v330_v33, %v329_v32  ;;  %v332_v42 = vld [vmem:[%s6773_s21 + $0x28] sm:$0xff]  ;;  %v525_v43 = vshrl.u32 %v505_v37, 16  ;;  %v590_v44 = vshll.u32 %v505_v37, 16  ;;  %vm6789_vm2 = vmand %vm713_vm0, %vm714_vm1  ;;  %v333_v62 = vld [vmem:[%s6773_s21 + $0x30] sm:$0xff] }
  0x7b   : > { %v507_v45 = vpack.c.bf16 %v332_v42, %v331_v41  ;;  %v334_v2 = vld [vmem:[%s6773_s21 + $0x38] sm:$0xff]  ;;  %v335_v3 = vld [vmem:[%s6773_s21 + $0x40] sm:$0xff]  ;;  %v336_v7 = vld [vmem:[%s6773_s21 + $0x48] sm:$0xff] }
  0x7c   : > { %5101 = vmatpush3.bf16.msra.mxu0 %v6221_v14  ;;  %v522_v39 = vshrl.u32 %v506_v35, 16  ;;  %v586_v40 = vshll.u32 %v506_v35, 16  ;;  %v589_v49 = vrot.slane %v525_v43, 7  ;;  %v682_v50 = vrot.slane %v590_v44, 7  ;;  %v6243_v36 = vld [vmem:[#allocation5 + $0x150] sm:$0xff]   ;;  %v6344_v48 = vld [vmem:[#allocation7 + $0x208] sm:$0xff]  }
  0x7d   : > { %5213 = vmatpush3.bf16.msra.mxu1 %v6222_v15  ;;  %5102 = vmatprep.subr.bf16.mxu0 %v6223_v16  ;;  %v528_v51 = vshrl.u32 %v507_v45, 16  ;;  %v594_v57 = vshll.u32 %v507_v45, 16  ;;  %v508_v15 = vpack.c.bf16 %v334_v2, %v333_v62  ;;  %v6250_v45 = vld [vmem:[#allocation5 + $0x180] sm:$0xff]   ;;  %v342_v62 = vld [vmem:[%s6773_s21 + $0x78] sm:$0xff] }
  0x7e   : > { %5214 = vmatprep.subr.bf16.mxu1 %v6224_v17  ;;  %v585_v46 = vrot.slane %v522_v39, 7  ;;  %v681_v47 = vrot.slane %v586_v40, 7  ;;  %v592_v55 = vor.u32 %v590_v44, %v589_v49  ;;  %v733_v56 = vsel %vm6789_vm2, %v589_v49, %v682_v50  ;;  %v6244_v50 = vld [vmem:[#allocation5 + $0x110] sm:$0xff]  }
  0x7f   : > { %v769_v60 = vshll.u32 %v733_v56, 16  ;;  %v593_v61 = vrot.slane %v528_v51, 7  ;;  %v683_v14 = vrot.slane %v594_v57, 7 }
  0x80   : > { %5103 = vmatpush3.bf16.msra.mxu0 %v6225_v18  ;;  %v588_v52 = vor.u32 %v586_v40, %v585_v46  ;;  %v732_v53 = vsel %vm6789_vm2, %v585_v46, %v681_v47  ;;  %v6806_v1 = vsel %vm6789_vm2, %v525_v43, %v592_v55  ;;  %v6823_v18 = vpack.c.bf16 %v336_v7, %v335_v3  ;;  %v6248_v40 = vld [vmem:[#allocation5 + $0x1c0] sm:$0xff]   ;;  %v340_v55 = vld [vmem:[%s6773_s21 + $0x68] sm:$0xff] }
  0x81   : > { %5215 = vmatpush3.bf16.msra.mxu1 %v6226_v19  ;;  %5104 = vmatprep.subr.bf16.mxu0 %v6227_v20  ;;  %v757_v54 = vshll.u32 %v732_v53, 16  ;;  %v976_v59 = vrot.slane %v732_v53, 1  ;;  %v762_v5 = vshrl.u32 %v6806_v1, 16  ;;  %v764_v6 = vshll.u32 %v6806_v1, 16  ;;  %v6240_v19 = vld [vmem:[#allocation5 + $0x100] sm:$0xff]  }
  0x82   : > { %5216 = vmatprep.subr.bf16.mxu1 %v6228_v21  ;;  %v6799_v58 = vsel %vm6789_vm2, %v522_v39, %v588_v52  ;;  %1679 = vmatprep.mubr.bf16.mxu1 %v6806_v1  ;;  %v771_v10 = vrot.slane %v769_v60, 1  ;;  %v596_v11 = vor.u32 %v594_v57, %v593_v61  ;;  %v978_v21 = vrot.slane %v6806_v1, 1  ;;  %v339_v52 = vld [vmem:[%s6773_s21 + $0x60] sm:$0xff]  ;;  %v341_v57 = vld [vmem:[%s6773_s21 + $0x70] sm:$0xff] }
  0x83   : > { %v750_v63 = vshrl.u32 %v6799_v58, 16  ;;  %v752_v0 = vshll.u32 %v6799_v58, 16  ;;  %v975_v4 = vrot.slane %v6799_v58, 1  ;;  %v759_v9 = vrot.slane %v757_v54, 1 }
  0x84   : > { %5105 = vmatpush3.bf16.msra.mxu0 %v6229_v22  ;;  %v766_v13 = vrot.slane %v764_v6, 1  ;;  %v6821_v17 = vsel %vm6789_vm2, %v528_v51, %v596_v11  ;;  %v979_v22 = vrot.slane %v733_v56, 1  ;;  %v6839_v32 = vsel %vm6789_vm2, %v593_v61, %v683_v14  ;;  %v6245_v56 = vld [vmem:[#allocation5 + $0x158] sm:$0xff]   ;;  %v344_v6 = vld [vmem:[%s6773_s21 + $0x88] sm:$0xff] }
  0x85   : > { %5217 = vmatpush3.bf16.msra.mxu1 %v6230_v23  ;;  %5106 = vmatprep.subr.bf16.mxu0 %v6231_v24  ;;  %v754_v8 = vrot.slane %v752_v0, 1  ;;  %v6816_v12 = vsel %vm974_vm4, %v975_v4, %v976_v59  ;;  %v6241_v23 = vld [vmem:[#allocation5 + $0x148] sm:$0xff]   ;;  %v337_v24 = vld [vmem:[%s6773_s21 + $0x50] sm:$0xff]  ;;  %v534_v35 = vshrl.u32 %v6823_v18, 16  ;;  %v781_v42 = vshll.u32 %v6839_v32, 16  ;;  %v6246_v4 = vld [vmem:[#allocation5 + $0x118] sm:$0xff]  }
  0x86   : > { %5218 = vmatprep.subr.bf16.mxu1 %v6232_v25  ;;  %v767_v20 = vor.u32 %v766_v13, %v762_v5  ;;  %v6845_v37 = vsel %vm974_vm4, %v978_v21, %v979_v22  ;;  %v602_v44 = vshll.u32 %v6823_v18, 16  ;;  %v981_v0 = vrot.slane %v6821_v17, 1  ;;  %v343_v5 = vld [vmem:[%s6773_s21 + $0x80] sm:$0xff]  ;;  %v6254_v11 = vld [vmem:[#allocation5 + $0x188] sm:$0xff]  }
  0x87   : > { %v755_v16 = vor.u32 %v754_v8, %v750_v63  ;;  %v601_v46 = vrot.slane %v534_v35, 7  ;;  %v783_v60 = vrot.slane %v781_v42, 1  ;;  %v6252_v63 = vld [vmem:[#allocation5 + $0x1c8] sm:$0xff]   ;;  %v982_v7 = vrot.slane %v6839_v32, 1 }
  0x88   : > { %5107 = vmatpush3.bf16.msra.mxu0 %v6233_v26  ;;  %v776_v26 = vshll.u32 %v6821_v17, 16  ;;  %v685_v51 = vrot.slane %v602_v44, 7 }
  0x89   : > { %5219 = vmatpush3.bf16.msra.mxu1 %v6234_v27  ;;  %5108 = vmatprep.subr.bf16.mxu0 %v6235_v28  ;;  %v6829_v25 = vsel %vm748_vm3, %v755_v16, %v759_v9  ;;  %v531_v27 = vshrl.u32 %v508_v15, 16  ;;  %v598_v28 = vshll.u32 %v508_v15, 16  ;;  %v604_v3 = vor.u32 %v602_v44, %v601_v46  ;;  %v6247_v16 = vld [vmem:[#allocation5 + $0x160] sm:$0xff]  }
  0x8a   : > { %5220 = vmatprep.subr.bf16.mxu1 %v6236_v29  ;;  %v338_v29 = vld [vmem:[%s6773_s21 + $0x58] sm:$0xff]  ;;  %1518 = vmatprep.mubr.bf16.mxu0 %v6829_v25  ;;  %v778_v41 = vrot.slane %v776_v26, 1  ;;  %v6881_v15 = vpack.c.bf16 %v340_v55, %v339_v52 }
  0x8b   : > { %v597_v33 = vrot.slane %v531_v27, 7  ;;  %v684_v34 = vrot.slane %v598_v28, 7  ;;  %v6848_v39 = vpack.c.bf16 %v338_v29, %v337_v24  ;;  %v6893_v21 = vsel %vm6789_vm2, %v534_v35, %v604_v3 }
  0x8c   : > { %5109 = vmatpush3.bf16.msra.mxu0 %v6237_v30  ;;  %v6835_v30 = vsel %vm748_vm3, %v767_v20, %v771_v10  ;;  %v6878_v10 = vsel %vm6789_vm2, %v601_v46, %v685_v51  ;;  %v540_v24 = vshrl.u32 %v6881_v15, 16  ;;  %v610_v26 = vshll.u32 %v6881_v15, 16  ;;  %v6253_v51 = vld [vmem:[#allocation5 + $0x128] sm:$0xff]   ;;  %v6257_v15 = vld [vmem:[#allocation5 + $0x130] sm:$0xff]  }
  0x8d   : > { %5221 = vmatpush3.bf16.msra.mxu1 %v6238_v31  ;;  %5318 = vmatprep.subr.bf16.mxu0 %v6239_v38  ;;  %v6242_v31 = vld [vmem:[#allocation5 + $0x108] sm:$0xff]   ;;  %v774_v38 = vshrl.u32 %v6821_v17, 16  ;;  %v600_v43 = vor.u32 %v598_v28, %v597_v33  ;;  %v537_v47 = vshrl.u32 %v6848_v39, 16  ;;  %v6856_v49 = vsel %vm6789_vm2, %v597_v33, %v684_v34  ;;  %v6249_v33 = vld [vmem:[#allocation5 + $0x120] sm:$0xff]  }
  0x8e   : > { %5430 = vmatprep.subr.bf16.mxu1 %v6248_v40  ;;  %v606_v54 = vshll.u32 %v6848_v39, 16  ;;  %v793_v2 = vshll.u32 %v6856_v49, 16  ;;  %v985_v9 = vrot.slane %v6856_v49, 1  ;;  %v798_v34 = vshrl.u32 %v6893_v21, 16  ;;  %v6251_v39 = vld [vmem:[#allocation5 + $0x168] sm:$0xff]  }
  0x8f   : > { %1519 = vmatmul.mubr.bf16.vlgmr.msra.gmra.mrb[0].mxu0 %v6799_v58  ;;  %v6862_v53 = vsel %vm6789_vm2, %v531_v27, %v600_v43  ;;  %v779_v59 = vor.u32 %v778_v41, %v774_v38  ;;  %v605_v61 = vrot.slane %v537_v47, 7  ;;  %v6900_v27 = vpack.c.bf16 %v344_v6, %v343_v5  ;;  %v6256_v43 = vld [vmem:[#allocation5 + $0x1d0] sm:$0xff]  }
  0x90   : > { %1680 = vmatmul.mubr.bf16.vlgmr.msra.gmra.mrb[0].mxu1 %v6816_v12  ;;  %5319 = vmatpush3.bf16.msra.mxu0 %v6240_v19  ;;  %v788_v8 = vshll.u32 %v6862_v53, 16  ;;  %v686_v14 = vrot.slane %v606_v54, 7  ;;  %v786_v19 = vshrl.u32 %v6862_v53, 16  ;;  %v6889_v20 = vrot.slane %v793_v2, 1 }
  0x91   : > { %1687 = vmatprep.mubr.bf16.mxu1 %v6799_v58  ;;  %1526 = vmatprep.mubr.bf16.mxu0 %v6835_v30  ;;  %v608_v13 = vor.u32 %v606_v54, %v605_v61  ;;  %v6886_v18 = vsel %vm748_vm3, %v779_v59, %v783_v60  ;;  %v984_v22 = vrot.slane %v6862_v53, 1  ;;  %v687_v38 = vrot.slane %v610_v26, 7  ;;  %v6258_v59 = vld [vmem:[#allocation5 + $0x190] sm:$0xff]  }
  0x92   : > { %5320 = vmatprep.subr.bf16.mxu0 %v6241_v23  ;;  %5431 = vmatpush3.bf16.msra.mxu1 %v6250_v45  ;;  %v805_v23 = vshll.u32 %v6878_v10, 16  ;;  %v790_v28 = vrot.slane %v788_v8, 1  ;;  %v6912_v35 = vsel %vm6789_vm2, %v605_v61, %v686_v14  ;;  %v800_v40 = vshll.u32 %v6893_v21, 16  ;;  %v346_v14 = vld [vmem:[%s6773_s21 + $0x98] sm:$0xff] }
  0x93   : > { %5432 = vmatprep.subr.bf16.mxu1 %v6252_v63  ;;  %v6905_v29 = vsel %vm6789_vm2, %v537_v47, %v608_v13  ;;  %v546_v45 = vshrl.u32 %v6900_v27, 16  ;;  %v6921_v46 = vsel %vm974_vm4, %v981_v0, %v982_v7  ;;  %v817_v47 = vshll.u32 %v6912_v35, 16  ;;  %v6259_v0 = vld [vmem:[#allocation5 + $0x1d8] sm:$0xff]   ;;  %v345_v13 = vld [vmem:[%s6773_s21 + $0x90] sm:$0xff] }
  0x94   : > { %5321 = vmatpush3.bf16.msra.mxu0 %v6242_v31  ;;  %v988_v31 = vrot.slane %v6878_v10, 1  ;;  %v812_v44 = vshll.u32 %v6905_v29, 16  ;;  %v791_v52 = vor.u32 %v790_v28, %v786_v19  ;;  %v6924_v54 = vrot.slane %v805_v23, 1  ;;  %v347_v19 = vld [vmem:[%s6773_s21 + $0xa0] sm:$0xff]  ;;  %v348_v23 = vld [vmem:[%s6773_s21 + $0xa8] sm:$0xff]  ;;  %v350_v28 = vld [vmem:[%s6773_s21 + $0xb8] sm:$0xff] }
  0x95   : > { %5322 = vmatprep.subr.bf16.mxu0 %v6243_v36  ;;  %v609_v36 = vrot.slane %v540_v24, 7  ;;  %v987_v55 = vrot.slane %v6893_v21, 1  ;;  %v802_v60 = vrot.slane %v800_v40, 1  ;;  %v810_v61 = vshrl.u32 %v6905_v29, 16 }
  0x96   : > { %5433 = vmatpush3.bf16.msra.mxu1 %v6254_v11  ;;  %v6933_v2 = vrot.slane %v812_v44, 1  ;;  %v990_v3 = vrot.slane %v6905_v29, 1  ;;  %v618_v5 = vshll.u32 %v6900_v27, 16  ;;  %v6940_v6 = vrot.slane %v817_v47, 1 }
  0x97   : > { %1527 = vmatmul.mubr.bf16.gmra.mrb[4].mxu0 %v6806_v1  ;;  %v6883_v1 = vpack.c.bf16 %v342_v62, %v341_v57  ;;  %v6255_v57 = vld [vmem:[#allocation5 + $0x170] sm:$0xff]   ;;  %5434 = vmatprep.subr.bf16.mxu1 %v6256_v43  ;;  %v991_v8 = vrot.slane %v6912_v35, 1  ;;  %v803_v43 = vor.u32 %v802_v60, %v798_v34  ;;  %v6263_v34 = vld [vmem:[#allocation5 + $0x1e0] sm:$0xff]  }
  0x98   : > { %1688 = vmatmul.mubr.bf16.gmra.mrb[4].mxu1 %v6845_v37  ;;  %1534 = vmatprep.mubr.bf16.mxu0 %v6829_v25 }
  0x99   : > { %1695 = vmatprep.mubr.bf16.mxu1 %v6821_v17  ;;  %5323 = vmatpush3.bf16.msra.mxu0 %v6244_v50  ;;  %v543_v32 = vshrl.u32 %v6883_v1, 16  ;;  %v614_v42 = vshll.u32 %v6883_v1, 16  ;;  %v612_v50 = vor.u32 %v610_v26, %v609_v36  ;;  %v6952_v1 = vsel %vm748_vm3, %v791_v52, %v6889_v20  ;;  %v349_v26 = vld [vmem:[%s6773_s21 + $0xb0] sm:$0xff] }
  0x9a   : > { %5324 = vmatprep.subr.bf16.mxu0 %v6245_v56  ;;  %v6929_v56 = vsel %vm6789_vm2, %v609_v36, %v687_v38  ;;  %5435 = vmatpush3.bf16.msra.mxu1 %v6258_v59  ;;  %v7021_v27 = vsel %vm748_vm3, %v803_v43, %v6924_v54 }
  0x9b   : > { %v613_v41 = vrot.slane %v543_v32, 7  ;;  %v688_v63 = vrot.slane %v614_v42, 7  ;;  %v6944_v7 = vsel %vm6789_vm2, %v540_v24, %v612_v50  ;;  %v829_v11 = vshll.u32 %v6929_v56, 16  ;;  %v6260_v24 = vld [vmem:[#allocation5 + $0x198] sm:$0xff]   ;;  %5436 = vmatprep.subr.bf16.mxu1 %v6259_v0  ;;  %v6264_v0 = vld [vmem:[#allocation5 + $0x1a0] sm:$0xff]  }
  0x9c   : > { %v994_v36 = vrot.slane %v6929_v56, 1  ;;  %v822_v49 = vshrl.u32 %v6944_v7, 16  ;;  %v824_v40 = vshll.u32 %v6944_v7, 16  ;;  %v993_v44 = vrot.slane %v6944_v7, 1  ;;  %v6262_v50 = vld [vmem:[#allocation5 + $0x138] sm:$0xff]  }
  0x9d   : > { %5325 = vmatpush3.bf16.msra.mxu0 %v6246_v4  ;;  %v616_v62 = vor.u32 %v614_v42, %v613_v41  ;;  %v617_v4 = vrot.slane %v546_v45, 7  ;;  %v6972_v38 = vsel %vm6789_vm2, %v613_v41, %v688_v63  ;;  %v351_v42 = vld [vmem:[%s6773_s21 + $0xc0] sm:$0xff]  ;;  %v6984_v41 = vrot.slane %v829_v11, 1 }
  0x9e   : > { %5326 = vmatprep.subr.bf16.mxu0 %v6247_v16  ;;  %v689_v16 = vrot.slane %v618_v5, 7  ;;  %v841_v52 = vshll.u32 %v6972_v38, 16  ;;  %5437 = vmatpush3.bf16.msra.mxu1 %v6260_v24  ;;  %v6998_v63 = vpack.c.bf16 %v350_v28, %v349_v26  ;;  %v6266_v24 = vld [vmem:[#allocation5 + $0x1a8] sm:$0xff]  }
  0x9f   : > { %1535 = vmatmul.mubr.bf16.gmra.mrb[8].mxu0 %v6799_v58  ;;  %v6967_v20 = vsel %vm6789_vm2, %v543_v32, %v616_v62  ;;  %v352_v32 = vld [vmem:[%s6773_s21 + $0xc8] sm:$0xff]  ;;  %v6996_v62 = vpack.c.bf16 %v348_v23, %v347_v19  ;;  %5438 = vmatprep.subr.bf16.mxu1 %v6263_v34  ;;  %v997_v19 = vrot.slane %v6972_v38, 1  ;;  %v6268_v34 = vld [vmem:[#allocation5 + $0x1b0] sm:$0xff]  }
  0xa0   : > { %1696 = vmatmul.mubr.bf16.gmra.mrb[8].mxu1 %v6816_v12  ;;  %1542 = vmatprep.mubr.bf16.mxu0 %v6886_v18  ;;  %v834_v47 = vshrl.u32 %v6967_v20, 16  ;;  %v7030_v26 = vrot.slane %v841_v52, 1  ;;  %v555_v54 = vshrl.u32 %v6998_v63, 16 }
  0xa1   : > { %1703 = vmatprep.mubr.bf16.mxu1 %v6862_v53  ;;  %5327 = vmatpush3.bf16.msra.mxu0 %v6249_v33  ;;  %v6963_v33 = vsel %vm974_vm4, %v984_v22, %v985_v9  ;;  %v620_v9 = vor.u32 %v618_v5, %v617_v4  ;;  %v6977_v22 = vpack.c.bf16 %v346_v14, %v345_v13  ;;  %v826_v5 = vrot.slane %v824_v40, 1 }
  0xa2   : > { %5328 = vmatprep.subr.bf16.mxu0 %v6251_v39  ;;  %v6261_v39 = vld [vmem:[#allocation5 + $0x178] sm:$0xff]   ;;  %v552_v10 = vshrl.u32 %v6996_v62, 16  ;;  %5439 = vmatpush3.bf16.msra.mxu1 %v6264_v0  ;;  %v626_v28 = vshll.u32 %v6996_v62, 16  ;;  %v629_v62 = vrot.slane %v555_v54, 7  ;;  %v630_v0 = vshll.u32 %v6998_v63, 16 }
  0xa3   : > { %v549_v59 = vshrl.u32 %v6977_v22, 16  ;;  %v622_v60 = vshll.u32 %v6977_v22, 16  ;;  %v7012_v11 = vsel %vm6789_vm2, %v546_v45, %v620_v9  ;;  %v815_v45 = vor.u32 %v6933_v2, %v810_v61  ;;  %v353_v22 = vld [vmem:[%s6773_s21 + $0xd0] sm:$0xff] }
  0xa4   : > { %v848_v2 = vshll.u32 %v7012_v11, 16  ;;  %v625_v9 = vrot.slane %v552_v10, 7  ;;  %v691_v43 = vrot.slane %v626_v28, 7 }
  0xa5   : > { %5329 = vmatpush3.bf16.msra.mxu0 %v6253_v51  ;;  %v836_v51 = vshll.u32 %v6967_v20, 16  ;;  %v621_v13 = vrot.slane %v549_v59, 7 }
  0xa6   : > { %5330 = vmatprep.subr.bf16.mxu0 %v6255_v57  ;;  %v6992_v57 = vsel %vm6789_vm2, %v617_v4, %v689_v16  ;;  %v7006_v4 = vsel %vm974_vm4, %v987_v55, %v988_v31  ;;  %v7017_v16 = vpack.c.bf16 %v352_v32, %v351_v42  ;;  %v6265_v31 = vld [vmem:[#allocation5 + $0x1e8] sm:$0xff]   ;;  %v996_v55 = vrot.slane %v6967_v20, 1 }
  0xa7   : > { %1543 = vmatmul.mubr.bf16.gmra.mrb[12].mxu0 %v6821_v17  ;;  %v853_v14 = vshll.u32 %v6992_v57, 16  ;;  %v7028_v23 = vrot.slane %v836_v51, 1  ;;  %5440 = vmatprep.subr.bf16.mxu1 %v6265_v31  ;;  %v624_v40 = vor.u32 %v622_v60, %v621_v13  ;;  %v354_v51 = vld [vmem:[%s6773_s21 + $0xd8] sm:$0xff]  ;;  %v7053_v31 = vld [vmem:[#allocation5 + $0x200] sm:$0xff]   ;;  %v628_v52 = vor.u32 %v626_v28, %v625_v9 }
  0xa8   : > { %1704 = vmatmul.mubr.bf16.gmra.mrb[12].mxu1 %v6921_v46  ;;  %1550 = vmatprep.mubr.bf16.mxu0 %v6952_v1  ;;  %v7067_v63 = vsel %vm6789_vm2, %v625_v9, %v691_v43  ;;  %v634_v28 = vshll.u32 %v7017_v16, 16  ;;  %v632_v43 = vor.u32 %v630_v0, %v629_v62 }
  0xa9   : > { %1711 = vmatprep.mubr.bf16.mxu1 %v6893_v21  ;;  %5331 = vmatpush3.bf16.msra.mxu0 %v6257_v15  ;;  %v690_v15 = vrot.slane %v622_v60, 7  ;;  %v7039_v42 = vrot.slane %v853_v14, 1  ;;  %v7050_v60 = vsel %vm748_vm3, %v815_v45, %v6940_v6  ;;  %v6269_v14 = vld [vmem:[#allocation5 + $0x1f8] sm:$0xff]   ;;  %v7063_v6 = vrot.slane %v848_v2, 1 }
  0xaa   : > { %5332 = vmatprep.subr.bf16.mxu0 %v6261_v39  ;;  %v6267_v39 = vld [vmem:[#allocation5 + $0x1f0] sm:$0xff]   ;;  %5441 = vmatpush3.bf16.msra.mxu1 %v6266_v24  ;;  %v6270_v2 = vld [vmem:[#allocation5 + $0x1b8] sm:$0xff]  }
  0xab   : > { %v7043_v32 = vsel %vm6789_vm2, %v621_v13, %v690_v15  ;;  %5442 = vmatprep.subr.bf16.mxu1 %v6267_v39  ;;  %v7058_v13 = vsel %vm6789_vm2, %v549_v59, %v624_v40  ;;  %v518_v39 = vpack.c.bf16 %v354_v51, %v353_v22  ;;  %v827_v59 = vor.u32 %v826_v5, %v822_v49  ;;  %v355_v51 = vld [vmem:[%s6773_s21 + $0xe0] sm:$0xff]  ;;  %v356_v40 = vld [vmem:[%s6773_s21 + $0xe8] sm:$0xff] }
  0xac   : > { %v865_v24 = vshll.u32 %v7043_v32, 16  ;;  %v692_v15 = vrot.slane %v630_v0, 7  ;;  %v860_v9 = vshll.u32 %v7058_v13, 16  ;;  %v7082_v49 = vsel %vm974_vm4, %v990_v3, %v991_v8 }
  0xad   : > { %5333 = vmatpush3.bf16.msra.mxu0 %v6262_v50  ;;  %v558_v50 = vshrl.u32 %v7017_v16, 16  ;;  %v7088_v16 = vsel %vm6789_vm2, %v552_v10, %v628_v52  ;;  %v877_v22 = vshll.u32 %v7067_v63, 16  ;;  %v693_v0 = vrot.slane %v634_v28, 7 }
  0xae   : > { %6038 = vmatprep.subr.bf16.mxu0 %v7053_v31  ;;  %5443 = vmatpush3.bf16.msra.mxu1 %v6268_v34  ;;  %v7084_v5 = vrot.slane %v865_v24, 1  ;;  %v638_v35 = vshll.u32 %v518_v39, 16  ;;  %v7096_v3 = vsel %vm748_vm3, %v827_v59, %v6984_v41  ;;  %v7101_v10 = vsel %vm6789_vm2, %v555_v54, %v632_v43 }
  0xaf   : > { %1551 = vmatmul.mubr.bf16.gmra.mrb[16].mxu0 %v6862_v53  ;;  %v633_v45 = vrot.slane %v558_v50, 7  ;;  %5444 = vmatprep.subr.bf16.mxu1 %v6269_v14  ;;  %v561_v14 = vshrl.u32 %v518_v39, 16  ;;  %v7105_v52 = vsel %vm6789_vm2, %v629_v62, %v692_v15  ;;  %v862_v39 = vrot.slane %v860_v9, 1 }
  0xb0   : > { %1712 = vmatmul.mubr.bf16.gmra.mrb[16].mxu1 %v6963_v33  ;;  %1558 = vmatprep.mubr.bf16.mxu0 %v7021_v27  ;;  %v872_v41 = vshll.u32 %v7088_v16, 16  ;;  %v7119_v15 = vpack.c.bf16 %v356_v40, %v355_v51  ;;  %v884_v9 = vshll.u32 %v7101_v10, 16  ;;  %v889_v43 = vshll.u32 %v7105_v52, 16 }
  0xb1   : > { %1719 = vmatprep.mubr.bf16.mxu1 %v6905_v29  ;;  %v636_v34 = vor.u32 %v634_v28, %v633_v45  ;;  %v637_v24 = vrot.slane %v561_v14, 7  ;;  %v7125_v28 = vsel %vm6789_vm2, %v633_v45, %v693_v0  ;;  %v694_v8 = vrot.slane %v638_v35, 7 }
  0xb2   : > { %5445 = vmatpush3.bf16.msra.mxu1 %v6270_v2  ;;  %v7112_v2 = vrot.slane %v877_v22, 1  ;;  %v882_v22 = vshrl.u32 %v7101_v10, 16  ;;  %v874_v54 = vrot.slane %v872_v41, 1  ;;  %v7138_v45 = vsel %vm974_vm4, %v993_v44, %v994_v36 }
  0xb3   : > { %v7117_v62 = vsel %vm6789_vm2, %v558_v50, %v636_v34  ;;  %v640_v59 = vor.u32 %v638_v35, %v637_v24  ;;  %v839_v34 = vor.u32 %v7028_v23, %v834_v47  ;;  %v901_v0 = vshll.u32 %v7125_v28, 16 }
  0xb4   : > { %v896_v51 = vshll.u32 %v7117_v62, 16  ;;  %v564_v35 = vshrl.u32 %v7119_v15, 16  ;;  %v886_v41 = vrot.slane %v884_v9, 1  ;;  %v891_v50 = vrot.slane %v889_v43, 1 }
  0xb5   : > { %v894_v40 = vshrl.u32 %v7117_v62, 16  ;;  %v7148_v56 = vsel %vm6789_vm2, %v561_v14, %v640_v59  ;;  %v7152_v36 = vsel %vm6789_vm2, %v637_v24, %v694_v8  ;;  %v1011_v47 = vrot.slane %v7117_v62, 1 }
  0xb6   : > { %v898_v44 = vrot.slane %v896_v51, 1  ;;  %v1012_v23 = vrot.slane %v7125_v28, 1  ;;  %v642_v9 = vshll.u32 %v7119_v15, 16  ;;  %v903_v43 = vrot.slane %v901_v0, 1 }
  0xb7   : > { %1559 = vmatmul.mubr.bf16.gmra.mrb[20].mxu0 %v6893_v21  ;;  %v906_v61 = vshrl.u32 %v7148_v56, 16  ;;  %v908_v14 = vshll.u32 %v7148_v56, 16  ;;  %v641_v59 = vrot.slane %v564_v35, 7  ;;  %v7163_v8 = vsel %vm748_vm3, %v839_v34, %v7030_v26 }
  0xb8   : > { %1720 = vmatmul.mubr.bf16.gmra.mrb[20].mxu1 %v7006_v4  ;;  %1566 = vmatprep.mubr.bf16.mxu0 %v7050_v60  ;;  %v913_v24 = vshll.u32 %v7152_v36, 16  ;;  %v695_v51 = vrot.slane %v642_v9, 7  ;;  %v7173_v28 = vsel %vm974_vm4, %v996_v55, %v997_v19  ;;  %v9020_v15 = vshrl.u32 %v7012_v11, 16 }
  0xb9   : > { %1727 = vmatprep.mubr.bf16.mxu1 %v6944_v7  ;;  %9019 = vst [vmem:[#allocation12_spill] sm:$0xff] %v7173_v28  ;;  %v910_v38 = vrot.slane %v908_v14, 1  ;;  %v9021_v55 = vrot.slane %v6992_v57, 1  ;;  %v9022_v19 = vrot.slane %v7012_v11, 1  ;;  %v357_v14 = vld [vmem:[%s6773_s21 + $0xf0] sm:$0xff]  ;;  %v9024_v57 = vrot.slane %v7043_v32, 1 }
  0xba   : > { %v851_v26 = vor.u32 %v7063_v6, %v9020_v15  ;;  %v915_v0 = vrot.slane %v913_v24, 1  ;;  %v9023_v15 = vshrl.u32 %v7058_v13, 16  ;;  %v358_v24 = vld [vmem:[%s6773_s21 + $0xf8] sm:$0xff] }
  0xbb   : > { %v7191_v6 = vsel %vm974_vm4, %v9022_v19, %v9021_v55  ;;  %v9026_v55 = vshrl.u32 %v7088_v16, 16 }
  0xbc   : > { %v7182_v34 = vsel %vm748_vm3, %v851_v26, %v7039_v42  ;;  %v9025_v26 = vrot.slane %v7058_v13, 1 }
  0xbd   : > { %v875_v19 = vor.u32 %v874_v54, %v9026_v55 }
  0xbf   : > { %1567 = vmatmul.mubr.bf16.gmra.mrb[24].mxu0 %v6905_v29 }
  0xc0   : > { %1728 = vmatmul.mubr.bf16.gmra.mrb[24].mxu1 %v7082_v49  ;;  %1574 = vmatprep.mubr.bf16.mxu0 %v7096_v3 }
  0xc1   : > { %1735 = vmatprep.mubr.bf16.mxu1 %v6967_v20 }
  0xc7   : > { %1575 = vmatmul.mubr.bf16.gmra.mrb[28].mxu0 %v6944_v7 }
  0xc8   : > { %1736 = vmatmul.mubr.bf16.gmra.mrb[28].mxu1 %v7138_v45  ;;  %1582 = vmatprep.mubr.bf16.mxu0 %v7163_v8 }
  0xc9   : > { %1743 = vmatprep.mubr.bf16.mxu1 %v7012_v11 }
  0xcf   : > { %1583 = vmatmul.mubr.bf16.gmra.mrb[32].mxu0 %v6967_v20 }
  0xd0   : > { %1744 = vmatmul.mubr.bf16.gmra.mrb[32].mxu1 %v7173_v28  ;;  %1590 = vmatprep.mubr.bf16.mxu0 %v7182_v34  ;;  %v863_v28 = vor.u32 %v862_v39, %v9023_v15  ;;  %v7210_v39 = vsel %vm974_vm4, %v9025_v26, %v9024_v57  ;;  %v9027_v57 = vrot.slane %v7067_v63, 1  ;;  %v9028_v26 = vrot.slane %v7088_v16, 1 }
  0xd1   : > { %1751 = vmatprep.mubr.bf16.mxu1 %v7058_v13  ;;  %v9030_v63 = vrot.slane %v7101_v10, 1 }
  0xd2   : > { %v7199_v42 = vsel %vm748_vm3, %v863_v28, %v7084_v5  ;;  %v520_v5 = vpack.c.bf16 %v358_v24, %v357_v14  ;;  %v7218_v28 = vsel %vm748_vm3, %v875_v19, %v7112_v2  ;;  %v7227_v54 = vsel %vm974_vm4, %v9028_v26, %v9027_v57 }
  0xd3   : > { %v887_v14 = vor.u32 %v886_v41, %v882_v22  ;;  %v9029_v24 = vrot.slane %v7105_v52, 1  ;;  %v644_v19 = vor.u32 %v642_v9, %v641_v59  ;;  %v899_v22 = vor.u32 %v898_v44, %v894_v40 }
  0xd4   : > { %v567_v32 = vshrl.u32 %v520_v5, 16  ;;  %v646_v15 = vshll.u32 %v520_v5, 16  ;;  %v7256_v40 = vsel %vm974_vm4, %v1011_v47, %v1012_v23  ;;  %v911_v44 = vor.u32 %v910_v38, %v906_v61 }
  0xd5   : > { %v7232_v2 = vsel %vm748_vm3, %v887_v14, %v891_v50  ;;  %v7241_v55 = vsel %vm974_vm4, %v9030_v63, %v9029_v24  ;;  %v7247_v50 = vsel %vm6789_vm2, %v564_v35, %v644_v19  ;;  %v7250_v41 = vsel %vm748_vm3, %v899_v22, %v903_v43  ;;  %v6273_v22 = vld [vmem:[#allocation5 + $0x210] sm:$0xff]  }
  0xd6   : > { %v920_v52 = vshll.u32 %v7247_v50, 16  ;;  %v645_v5 = vrot.slane %v567_v32, 7  ;;  %v746_v9 = vsel %vm6789_vm2, %v641_v59, %v695_v51  ;;  %v1014_v35 = vrot.slane %v7148_v56, 1 }
  0xd7   : > { %1591 = vmatmul.mubr.bf16.gmra.mrb[36].mxu0 %v7012_v11  ;;  %v1015_v43 = vrot.slane %v7152_v36, 1  ;;  %v918_v57 = vshrl.u32 %v7247_v50, 16  ;;  %v7266_v26 = vsel %vm748_vm3, %v911_v44, %v915_v0  ;;  %v925_v47 = vshll.u32 %v746_v9, 16 }
  0xd8   : > { %1752 = vmatmul.mubr.bf16.gmra.mrb[36].mxu1 %v7191_v6  ;;  %1598 = vmatprep.mubr.bf16.mxu0 %v7199_v42  ;;  %v922_v14 = vrot.slane %v920_v52, 1  ;;  %v648_v23 = vor.u32 %v646_v15, %v645_v5  ;;  %v696_v59 = vrot.slane %v646_v15, 7  ;;  %v1017_v24 = vrot.slane %v7247_v50, 1  ;;  %v6272_v15 = vld [vmem:[#allocation5 + $0x208] sm:$0xff]  }
  0xd9   : > { %1759 = vmatprep.mubr.bf16.mxu1 %v7088_v16  ;;  %v7271_v61 = vsel %vm974_vm4, %v1014_v35, %v1015_v43  ;;  %v927_v38 = vrot.slane %v925_v47, 1  ;;  %v1018_v63 = vrot.slane %v746_v9, 1 }
  0xda   : > { %v923_v51 = vor.u32 %v922_v14, %v918_v57  ;;  %v7275_v36 = vsel %vm6789_vm2, %v567_v32, %v648_v23  ;;  %v7279_v0 = vsel %vm6789_vm2, %v645_v5, %v696_v59 }
  0xdb   : > { %v7290_v32 = vsel %vm974_vm4, %v1017_v24, %v1018_v63  ;;  %v1036_v5 = vshrl.u32 %v7275_v36, 16  ;;  %v1043_v9 = vshll.u32 %v7279_v0, 16 }
  0xdc   : > { %v7285_v19 = vsel %vm748_vm3, %v923_v51, %v927_v38 }
  0xdd   : > { %v1045_v59 = vrot.slane %v1043_v9, 1 }
  0xdf   : > { %1599 = vmatmul.mubr.bf16.gmra.mrb[40].mxu0 %v7058_v13 }
  0xe0   : > { %1760 = vmatmul.mubr.bf16.gmra.mrb[40].mxu1 %v7210_v39  ;;  %1606 = vmatprep.mubr.bf16.mxu0 %v7218_v28 }
  0xe1   : > { %1767 = vmatprep.mubr.bf16.mxu1 %v7101_v10 }
  0xe7   : > { %1607 = vmatmul.mubr.bf16.gmra.mrb[44].mxu0 %v7088_v16 }
  0xe8   : > { %1768 = vmatmul.mubr.bf16.gmra.mrb[44].mxu1 %v7227_v54  ;;  %1614 = vmatprep.mubr.bf16.mxu0 %v7232_v2 }
  0xe9   : > { %1775 = vmatprep.mubr.bf16.mxu1 %v7117_v62 }
  0xef   : > { %1615 = vmatmul.mubr.bf16.gmra.mrb[48].mxu0 %v7101_v10 }
  0xf0   : > { %1776 = vmatmul.mubr.bf16.gmra.mrb[48].mxu1 %v7241_v55  ;;  %1622 = vmatprep.mubr.bf16.mxu0 %v7250_v41 }
  0xf1   : > { %1783 = vmatprep.mubr.bf16.mxu1 %v7148_v56 }
  0xf7   : > { %1623 = vmatmul.mubr.bf16.gmra.mrb[52].mxu0 %v7117_v62 }
  0xf8   : > { %1784 = vmatmul.mubr.bf16.gmra.mrb[52].mxu1 %v7256_v40  ;;  %1630 = vmatprep.mubr.bf16.mxu0 %v7266_v26 }
  0xf9   : > { %1791 = vmatprep.mubr.bf16.mxu1 %v7247_v50 }
  0xff   : > { %1631 = vmatmul.mubr.bf16.gmra.mrb[56].mxu0 %v7148_v56 }
 0x100   : > { %1792 = vmatmul.mubr.bf16.gmra.mrb[56].mxu1 %v7271_v61  ;;  %1638 = vmatprep.mubr.bf16.mxu0 %v7285_v19 }
 0x101   : > { %1799 = vmatprep.mubr.bf16.mxu1 %v7275_v36 }
 0x107   : > { %1639 = vmatmul.mubr.bf16.gmra.mrb[60].mxu0 %v7247_v50 }
 0x108   : > { %1800 = vmatmul.mubr.bf16.gmra.mrb[60].mxu1 %v7290_v32  ;;  %1840 = vmatprep.mubr.bf16.mxu0 %v6845_v37  ;;  %v6274_v37 = vld [vmem:[#allocation5 + $0x218] sm:$0xff]  }
 0x109   : > { %2001 = vmatprep.mubr.bf16.mxu1 %v6829_v25 }
 0x10f   : > { %1841 = vmatmul.mubr.bf16.vlgmr.msra.gmra.mrb[64].mxu0 %v6835_v30  ;;  %v6276_v30 = vld [vmem:[#allocation5 + $0x228] sm:$0xff]  }
 0x110   : > { %2002 = vmatmul.mubr.bf16.vlgmr.msra.gmra.mrb[64].mxu1 %v6799_v58  ;;  %6039 = vmatpush3.bf16.msra.mxu0 %v7053_v31  ;;  %v6275_v58 = vld [vmem:[#allocation5 + $0x220] sm:$0xff]  }
 0x111   : > { %2009 = vmatprep.mubr.bf16.mxu1 %v6886_v18  ;;  %1848 = vmatprep.mubr.bf16.mxu0 %v6816_v12 }
 0x112   : > { %6040 = vmatprep.subr.bf16.mxu0 %v6272_v15 }
 0x114   : > { %6041 = vmatpush3.bf16.msra.mxu0 %v6272_v15 }
 0x115   : > { %6042 = vmatprep.subr.bf16.mxu0 %v6273_v22 }
 0x117   : > { %1849 = vmatmul.mubr.bf16.gmra.mrb[68].mxu0 %v6829_v25  ;;  %v6278_v25 = vld [vmem:[#allocation5 + $0x238] sm:$0xff]  }
 0x118   : > { %2010 = vmatmul.mubr.bf16.gmra.mrb[68].mxu1 %v6821_v17  ;;  %1856 = vmatprep.mubr.bf16.mxu0 %v6921_v46  ;;  %v6277_v17 = vld [vmem:[#allocation5 + $0x230] sm:$0xff]  }
 0x119   : > { %2017 = vmatprep.mubr.bf16.mxu1 %v6952_v1  ;;  %6043 = vmatpush3.bf16.msra.mxu0 %v6273_v22 }
 0x11a   : > { %6044 = vmatprep.subr.bf16.mxu0 %v6274_v37 }
 0x11d   : > { %6045 = vmatpush3.bf16.msra.mxu0 %v6274_v37 }
 0x11e   : > { %6046 = vmatprep.subr.bf16.mxu0 %v6275_v58 }
 0x11f   : > { %1857 = vmatmul.mubr.bf16.gmra.mrb[72].mxu0 %v6886_v18 }
 0x120   : > { %2018 = vmatmul.mubr.bf16.gmra.mrb[72].mxu1 %v6862_v53  ;;  %1864 = vmatprep.mubr.bf16.mxu0 %v6963_v33  ;;  %v9031_v53 = vld [vmem:[#allocation12_spill] sm:$0xff] }
 0x121   : > { %2025 = vmatprep.mubr.bf16.mxu1 %v7021_v27  ;;  %6047 = vmatpush3.bf16.msra.mxu0 %v6275_v58 }
 0x122   : > { %6048 = vmatprep.subr.bf16.mxu0 %v6276_v30 }
 0x125   : > { %6049 = vmatpush3.bf16.msra.mxu0 %v6276_v30 }
 0x126   : > { %6050 = vmatprep.subr.bf16.mxu0 %v6277_v17 }
 0x127   : > { %1865 = vmatmul.mubr.bf16.gmra.mrb[76].mxu0 %v6952_v1 }
 0x128   : > { %2026 = vmatmul.mubr.bf16.gmra.mrb[76].mxu1 %v6893_v21  ;;  %1872 = vmatprep.mubr.bf16.mxu0 %v7006_v4 }
 0x129   : > { %2033 = vmatprep.mubr.bf16.mxu1 %v7050_v60  ;;  %6051 = vmatpush3.bf16.msra.mxu0 %v6277_v17 }
 0x12a   : > { %6052 = vmatprep.subr.bf16.mxu0 %v6278_v25 }
 0x12d   : > { %6053 = vmatpush3.bf16.msra.mxu0 %v6278_v25 }
 0x12f   : > { %1873 = vmatmul.mubr.bf16.gmra.mrb[80].mxu0 %v7021_v27 }
 0x130   : > { %2034 = vmatmul.mubr.bf16.gmra.mrb[80].mxu1 %v6905_v29  ;;  %1880 = vmatprep.mubr.bf16.mxu0 %v7082_v49 }
 0x131   : > { %2041 = vmatprep.mubr.bf16.mxu1 %v7096_v3 }
 0x137   : > { %1881 = vmatmul.mubr.bf16.gmra.mrb[84].mxu0 %v7050_v60 }
 0x138   : > { %2042 = vmatmul.mubr.bf16.gmra.mrb[84].mxu1 %v6944_v7  ;;  %1888 = vmatprep.mubr.bf16.mxu0 %v7138_v45 }
 0x139   : > { %2049 = vmatprep.mubr.bf16.mxu1 %v7163_v8 }
 0x13f   : > { %1889 = vmatmul.mubr.bf16.gmra.mrb[88].mxu0 %v7096_v3 }
 0x140   : > { %2050 = vmatmul.mubr.bf16.gmra.mrb[88].mxu1 %v6967_v20  ;;  %1896 = vmatprep.mubr.bf16.mxu0 %v9031_v53 }
 0x141   : > { %2057 = vmatprep.mubr.bf16.mxu1 %v7182_v34 }
 0x147   : > { %1897 = vmatmul.mubr.bf16.gmra.mrb[92].mxu0 %v7163_v8 }
 0x148   : > { %2058 = vmatmul.mubr.bf16.gmra.mrb[92].mxu1 %v7012_v11  ;;  %1904 = vmatprep.mubr.bf16.mxu0 %v7191_v6 }
 0x149   : > { %2065 = vmatprep.mubr.bf16.mxu1 %v7199_v42 }
 0x14f   : > { %1905 = vmatmul.mubr.bf16.gmra.mrb[96].mxu0 %v7182_v34 }
 0x150   : > { %2066 = vmatmul.mubr.bf16.gmra.mrb[96].mxu1 %v7058_v13  ;;  %1912 = vmatprep.mubr.bf16.mxu0 %v7210_v39 }
 0x151   : > { %2073 = vmatprep.mubr.bf16.mxu1 %v7218_v28 }
 0x157   : > { %1913 = vmatmul.mubr.bf16.gmra.mrb[100].mxu0 %v7199_v42 }
 0x158   : > { %2074 = vmatmul.mubr.bf16.gmra.mrb[100].mxu1 %v7088_v16  ;;  %1920 = vmatprep.mubr.bf16.mxu0 %v7227_v54  ;;  %v1038_v16 = vshll.u32 %v7275_v36, 16 }
 0x159   : > { %2081 = vmatprep.mubr.bf16.mxu1 %v7232_v2 }
 0x15a   : > { %v1040_v44 = vrot.slane %v1038_v16, 1  ;;  %v1051_v16 = vrot.slane %v7279_v0, 1 }
 0x15c   : > { %v1041_v23 = vor.u32 %v1040_v44, %v1036_v5 }
 0x15e   : > { %v1046_v58 = vsel %vm748_vm3, %v1041_v23, %v1045_v59 }
 0x15f   : > { %1921 = vmatmul.mubr.bf16.gmra.mrb[104].mxu0 %v7218_v28 }
 0x160   : > { %2082 = vmatmul.mubr.bf16.gmra.mrb[104].mxu1 %v7101_v10  ;;  %1928 = vmatprep.mubr.bf16.mxu0 %v7241_v55 }
 0x161   : > { %2089 = vmatprep.mubr.bf16.mxu1 %v7250_v41 }
 0x162   : > { %v5110_v20 = vpop.f32.mrb[0].mxu0 }
 0x163   : > { %v5222_v18 = vpop.f32.mrb[0].mxu1  ;;  %v5111_v27 = vpop.f32.mrb[1].mxu0 }
 0x164   : > { %v5223_v21 = vpop.f32.mrb[1].mxu1  ;;  %v5112_v60 = vadd.f32 %v5111_v27, %v5110_v20  ;;  %v5113_v31 = vpop.f32.mrb[2].mxu0 }
 0x165   : > { %v5224_v29 = vadd.f32 %v5223_v21, %v5222_v18  ;;  %v5225_v7 = vpop.f32.mrb[2].mxu1  ;;  %v5114_v13 = vpop.f32.mrb[3].mxu0 }
 0x166   : > { %v5226_v1 = vpop.f32.mrb[3].mxu1  ;;  %v5115_v3 = vadd.f32 %v5114_v13, %v5113_v31  ;;  %v1050_v13 = vrot.slane %v7275_v36, 1 }
 0x167   : > { %v5227_v11 = vadd.f32 %v5226_v1, %v5225_v7  ;;  %v7344_v8 = vadd.f32 %v5224_v29, %v5112_v60  ;;  %1929 = vmatmul.mubr.bf16.gmra.mrb[108].mxu0 %v7232_v2 }
 0x168   : > { %2090 = vmatmul.mubr.bf16.gmra.mrb[108].mxu1 %v7117_v62  ;;  %1936 = vmatprep.mubr.bf16.mxu0 %v7256_v40 }
 0x169   : > { %2097 = vmatprep.mubr.bf16.mxu1 %v7266_v26  ;;  %v7348_v52 = vadd.f32 %v5227_v11, %v5115_v3 }
 0x16a   : > { %v5116_v35 = vpop.f32.mrb[4].mxu0 }
 0x16b   : > { %v5228_v10 = vpop.f32.mrb[4].mxu1  ;;  %v5117_v57 = vpop.f32.mrb[5].mxu0 }
 0x16c   : > { %v5229_v34 = vpop.f32.mrb[5].mxu1  ;;  %v5118_v14 = vadd.f32 %v5117_v57, %v5116_v35  ;;  %v5119_v2 = vpop.f32.mrb[6].mxu0 }
 0x16d   : > { %v5230_v42 = vadd.f32 %v5229_v34, %v5228_v10  ;;  %v5231_v28 = vpop.f32.mrb[6].mxu1  ;;  %v5120_v47 = vpop.f32.mrb[7].mxu0 }
 0x16e   : > { %v5232_v62 = vpop.f32.mrb[7].mxu1  ;;  %v5121_v51 = vadd.f32 %v5120_v47, %v5119_v2 }
 0x16f   : > { %v5233_v43 = vadd.f32 %v5232_v62, %v5231_v28  ;;  %v7354_v24 = vadd.f32 %v5230_v42, %v5118_v14  ;;  %1937 = vmatmul.mubr.bf16.gmra.mrb[112].mxu0 %v7250_v41  ;;  %v7373_v62 = vsel %vm974_vm4, %v1050_v13, %v1051_v16 }
 0x170   : > { %2098 = vmatmul.mubr.bf16.gmra.mrb[112].mxu1 %v7148_v56  ;;  %1944 = vmatprep.mubr.bf16.mxu0 %v7271_v61 }
 0x171   : > { %2105 = vmatprep.mubr.bf16.mxu1 %v7285_v19  ;;  %v7358_v37 = vadd.f32 %v5233_v43, %v5121_v51 }
 0x172   : > { %v5122_v30 = vpop.f32.mrb[8].mxu0 }
 0x173   : > { %v5234_v38 = vpop.f32.mrb[8].mxu1  ;;  %v5123_v25 = vpop.f32.mrb[9].mxu0 }
 0x174   : > { %v5235_v63 = vpop.f32.mrb[9].mxu1  ;;  %v5124_v18 = vadd.f32 %v5123_v25, %v5122_v30  ;;  %v5125_v21 = vpop.f32.mrb[10].mxu0 }
 0x175   : > { %v5236_v15 = vadd.f32 %v5235_v63, %v5234_v38  ;;  %v5237_v22 = vpop.f32.mrb[10].mxu1  ;;  %v5126_v29 = vpop.f32.mrb[11].mxu0 }
 0x176   : > { %v5238_v56 = vpop.f32.mrb[11].mxu1  ;;  %v5127_v41 = vadd.f32 %v5126_v29, %v5125_v21 }
 0x177   : > { %v5239_v17 = vadd.f32 %v5238_v56, %v5237_v22  ;;  %v7362_v1 = vadd.f32 %v5236_v15, %v5124_v18  ;;  %1945 = vmatmul.mubr.bf16.gmra.mrb[116].mxu0 %v7266_v26 }
 0x178   : > { %2106 = vmatmul.mubr.bf16.gmra.mrb[116].mxu1 %v7247_v50  ;;  %1952 = vmatprep.mubr.bf16.mxu0 %v7290_v32 }
 0x179   : > { %2113 = vmatprep.mubr.bf16.mxu1 %v1046_v58  ;;  %v7366_v60 = vadd.f32 %v5239_v17, %v5127_v41 }
 0x17a   : > { %v5128_v3 = vpop.f32.mrb[12].mxu0 }
 0x17b   : > { %v5240_v7 = vpop.f32.mrb[12].mxu1  ;;  %v5129_v34 = vpop.f32.mrb[13].mxu0 }
 0x17c   : > { %v5241_v20 = vpop.f32.mrb[13].mxu1  ;;  %v5130_v42 = vadd.f32 %v5129_v34, %v5128_v3  ;;  %v5131_v28 = vpop.f32.mrb[14].mxu0 }
 0x17d   : > { %v5242_v11 = vadd.f32 %v5241_v20, %v5240_v7  ;;  %v5243_v27 = vpop.f32.mrb[14].mxu1  ;;  %v5132_v26 = vpop.f32.mrb[15].mxu0 }
 0x17e   : > { %v5244_v31 = vpop.f32.mrb[15].mxu1  ;;  %v5133_v5 = vadd.f32 %v5132_v26, %v5131_v28 }
 0x17f   : > { %v5245_v10 = vadd.f32 %v5244_v31, %v5243_v27  ;;  %v7375_v9 = vadd.f32 %v5242_v11, %v5130_v42  ;;  %1953 = vmatmul.mubr.bf16.gmra.mrb[120].mxu0 %v7285_v19 }
 0x180   : > { %2114 = vmatmul.mubr.bf16.gmra.mrb[120].mxu1 %v7275_v36  ;;  %1960 = vmatprep.mubr.bf16.mxu0 %v7373_v62 }
 0x181   : > { %2121 = vmatprep.mubr.bf16.mxu1 %v7285_v19  ;;  %v7379_v36 = vadd.f32 %v5245_v10, %v5133_v5 }
 0x182   : > { %v5134_v14 = vpop.f32.mrb[16].mxu0 }
 0x183   : > { %v5246_v44 = vpop.f32.mrb[16].mxu1  ;;  %v5135_v47 = vpop.f32.mrb[17].mxu0 }
 0x184   : > { %v5247_v0 = vpop.f32.mrb[17].mxu1  ;;  %v5136_v23 = vadd.f32 %v5135_v47, %v5134_v14  ;;  %v5137_v59 = vpop.f32.mrb[18].mxu0 }
 0x185   : > { %v5248_v35 = vadd.f32 %v5247_v0, %v5246_v44  ;;  %v5249_v43 = vpop.f32.mrb[18].mxu1  ;;  %v5138_v51 = vpop.f32.mrb[19].mxu0 }
 0x186   : > { %v5250_v57 = vpop.f32.mrb[19].mxu1  ;;  %v5139_v38 = vadd.f32 %v5138_v51, %v5137_v59 }
 0x187   : > { %v5251_v2 = vadd.f32 %v5250_v57, %v5249_v43  ;;  %v7382_v15 = vadd.f32 %v5248_v35, %v5136_v23  ;;  %1961 = vmatmul.mubr.bf16.gmra.mrb[124].mxu0 %v1046_v58 }
 0x188   : > { %2122 = vmatmul.mubr.bf16.gmra.mrb[124].mxu1 %v7247_v50  ;;  %6054 = vmatprep.mubr.bf16.mxu0 %v6816_v12 }
 0x189   : > { %v7385_v30 = vadd.f32 %v5251_v2, %v5139_v38 }
 0x18a   : > { %v5140_v25 = vpop.f32.mrb[20].mxu0 }
 0x18b   : > { %v5252_v63 = vpop.f32.mrb[20].mxu1  ;;  %v5141_v21 = vpop.f32.mrb[21].mxu0 }
 0x18c   : > { %v5253_v19 = vpop.f32.mrb[21].mxu1  ;;  %v5142_v50 = vadd.f32 %v5141_v21, %v5140_v25  ;;  %v5143_v29 = vpop.f32.mrb[22].mxu0 }
 0x18d   : > { %v5254_v22 = vadd.f32 %v5253_v19, %v5252_v63  ;;  %v5255_v56 = vpop.f32.mrb[22].mxu1  ;;  %v5144_v41 = vpop.f32.mrb[23].mxu0 }
 0x18e   : > { %v5256_v17 = vpop.f32.mrb[23].mxu1  ;;  %v5145_v7 = vadd.f32 %v5144_v41, %v5143_v29 }
 0x18f   : > { %v5257_v18 = vadd.f32 %v5256_v17, %v5255_v56  ;;  %v7387_v11 = vadd.f32 %v5254_v22, %v5142_v50  ;;  %6055 = vmatmul.mubr.bf16.vlgmr.msra.gmra.mrb[128].mxu0 %v6921_v46 }
 0x190   : > { %6058 = vmatprep.mubr.bf16.mxu0 %v6963_v33 }
 0x191   : > { %v7391_v12 = vadd.f32 %v5257_v18, %v5145_v7 }
 0x192   : > { %v5146_v16 = vpop.f32.mrb[24].mxu0 }
 0x193   : > { %v5258_v20 = vpop.f32.mrb[24].mxu1  ;;  %v5147_v10 = vpop.f32.mrb[25].mxu0 }
 0x194   : > { %v5259_v58 = vpop.f32.mrb[25].mxu1  ;;  %v5148_v34 = vadd.f32 %v5147_v10, %v5146_v16  ;;  %v5149_v42 = vpop.f32.mrb[26].mxu0 }
 0x195   : > { %v5260_v27 = vadd.f32 %v5259_v58, %v5258_v20  ;;  %v5261_v31 = vpop.f32.mrb[26].mxu1  ;;  %v5150_v28 = vpop.f32.mrb[27].mxu0 }
 0x196   : > { %v5262_v13 = vpop.f32.mrb[27].mxu1  ;;  %v5151_v26 = vadd.f32 %v5150_v28, %v5149_v42 }
 0x197   : > { %v5263_v3 = vadd.f32 %v5262_v13, %v5261_v31  ;;  %v7393_v44 = vadd.f32 %v5260_v27, %v5148_v34  ;;  %6059 = vmatmul.mubr.bf16.gmra.mrb[132].mxu0 %v7006_v4 }
 0x198   : > { %6062 = vmatprep.mubr.bf16.mxu0 %v7082_v49 }
 0x199   : > { %v7397_v33 = vadd.f32 %v5263_v3, %v5151_v26 }
 0x19a   : > { %v5152_v57 = vpop.f32.mrb[28].mxu0 }
 0x19b   : > { %v5264_v5 = vpop.f32.mrb[28].mxu1  ;;  %v5153_v2 = vpop.f32.mrb[29].mxu0 }
 0x19c   : > { %v5265_v46 = vpop.f32.mrb[29].mxu1  ;;  %v5154_v47 = vadd.f32 %v5153_v2, %v5152_v57  ;;  %v5155_v23 = vpop.f32.mrb[30].mxu0 }
 0x19d   : > { %v5266_v0 = vadd.f32 %v5265_v46, %v5264_v5  ;;  %v5267_v35 = vpop.f32.mrb[30].mxu1  ;;  %v5156_v59 = vpop.f32.mrb[31].mxu0 }
 0x19e   : > { %v5268_v43 = vpop.f32.mrb[31].mxu1  ;;  %v5157_v51 = vadd.f32 %v5156_v59, %v5155_v23 }
 0x19f   : > { %v5269_v14 = vadd.f32 %v5268_v43, %v5267_v35  ;;  %v7399_v63 = vadd.f32 %v5266_v0, %v5154_v47  ;;  %6063 = vmatmul.mubr.bf16.gmra.mrb[136].mxu0 %v7138_v45 }
 0x1a0   : > { %6066 = vmatprep.mubr.bf16.mxu0 %v9031_v53 }
 0x1a1   : > { %v7403_v49 = vadd.f32 %v5269_v14, %v5157_v51 }
 0x1a2   : > { %v5158_v17 = vpop.f32.mrb[32].mxu0 }
 0x1a3   : > { %v5270_v38 = vpop.f32.mrb[32].mxu1  ;;  %v5159_v18 = vpop.f32.mrb[33].mxu0 }
 0x1a4   : > { %v5271_v4 = vpop.f32.mrb[33].mxu1  ;;  %v5160_v21 = vadd.f32 %v5159_v18, %v5158_v17  ;;  %v5161_v50 = vpop.f32.mrb[34].mxu0 }
 0x1a5   : > { %v5272_v19 = vadd.f32 %v5271_v4, %v5270_v38  ;;  %v5273_v22 = vpop.f32.mrb[34].mxu1  ;;  %v5162_v29 = vpop.f32.mrb[35].mxu0 }
 0x1a6   : > { %v5274_v56 = vpop.f32.mrb[35].mxu1  ;;  %v5163_v7 = vadd.f32 %v5162_v29, %v5161_v50 }
 0x1a7   : > { %v5275_v25 = vadd.f32 %v5274_v56, %v5273_v22  ;;  %v7405_v41 = vadd.f32 %v5272_v19, %v5160_v21  ;;  %6067 = vmatmul.mubr.bf16.gmra.mrb[140].mxu0 %v7191_v6 }
 0x1a8   : > { %6070 = vmatprep.mubr.bf16.mxu0 %v7210_v39 }
 0x1a9   : > { %v7408_v58 = vadd.f32 %v5275_v25, %v5163_v7 }
 0x1aa   : > { %v5164_v13 = vpop.f32.mrb[36].mxu0 }
 0x1ab   : > { %v5276_v20 = vpop.f32.mrb[36].mxu1  ;;  %v5165_v3 = vpop.f32.mrb[37].mxu0 }
 0x1ac   : > { %v5277_v45 = vpop.f32.mrb[37].mxu1  ;;  %v5166_v10 = vadd.f32 %v5165_v3, %v5164_v13  ;;  %v5167_v34 = vpop.f32.mrb[38].mxu0 }
 0x1ad   : > { %v5278_v27 = vadd.f32 %v5277_v45, %v5276_v20  ;;  %v5279_v53 = vpop.f32.mrb[38].mxu1  ;;  %v5168_v42 = vpop.f32.mrb[39].mxu0 }
 0x1ae   : > { %v5280_v31 = vpop.f32.mrb[39].mxu1  ;;  %v5169_v26 = vadd.f32 %v5168_v42, %v5167_v34 }
 0x1af   : > { %v5281_v16 = vadd.f32 %v5280_v31, %v5279_v53  ;;  %v7411_v28 = vadd.f32 %v5278_v27, %v5166_v10  ;;  %6071 = vmatmul.mubr.bf16.gmra.mrb[144].mxu0 %v7227_v54 }
 0x1b0   : > { %6074 = vmatprep.mubr.bf16.mxu0 %v7241_v55 }
 0x1b1   : > { %v7414_v46 = vadd.f32 %v5281_v16, %v5169_v26 }
 0x1b2   : > { %v5170_v43 = vpop.f32.mrb[40].mxu0 }
 0x1b3   : > { %v5282_v5 = vpop.f32.mrb[40].mxu1  ;;  %v5171_v14 = vpop.f32.mrb[41].mxu0 }
 0x1b4   : > { %v5283_v6 = vpop.f32.mrb[41].mxu1  ;;  %v5172_v2 = vadd.f32 %v5171_v14, %v5170_v43  ;;  %v5173_v47 = vpop.f32.mrb[42].mxu0 }
 0x1b5   : > { %v5284_v0 = vadd.f32 %v5283_v6, %v5282_v5  ;;  %v5285_v35 = vpop.f32.mrb[42].mxu1  ;;  %v5174_v23 = vpop.f32.mrb[43].mxu0 }
 0x1b6   : > { %v5286_v39 = vpop.f32.mrb[43].mxu1  ;;  %v5175_v51 = vadd.f32 %v5174_v23, %v5173_v47 }
 0x1b7   : > { %v5287_v57 = vadd.f32 %v5286_v39, %v5285_v35  ;;  %v7417_v59 = vadd.f32 %v5284_v0, %v5172_v2  ;;  %6075 = vmatmul.mubr.bf16.gmra.mrb[148].mxu0 %v7256_v40 }
 0x1b8   : > { %6078 = vmatprep.mubr.bf16.mxu0 %v7271_v61 }
 0x1b9   : > { %v7420_v4 = vadd.f32 %v5287_v57, %v5175_v51 }
 0x1ba   : > { %v5176_v56 = vpop.f32.mrb[44].mxu0 }
 0x1bb   : > { %v5288_v38 = vpop.f32.mrb[44].mxu1  ;;  %v5177_v25 = vpop.f32.mrb[45].mxu0 }
 0x1bc   : > { %v5289_v54 = vpop.f32.mrb[45].mxu1  ;;  %v5178_v18 = vadd.f32 %v5177_v25, %v5176_v56  ;;  %v5179_v21 = vpop.f32.mrb[46].mxu0 }
 0x1bd   : > { %v5290_v19 = vadd.f32 %v5289_v54, %v5288_v38  ;;  %v5291_v22 = vpop.f32.mrb[46].mxu1  ;;  %v5180_v50 = vpop.f32.mrb[47].mxu0 }
 0x1be   : > { %v5292_v55 = vpop.f32.mrb[47].mxu1  ;;  %v5181_v7 = vadd.f32 %v5180_v50, %v5179_v21 }
 0x1bf   : > { %v5293_v17 = vadd.f32 %v5292_v55, %v5291_v22  ;;  %v7423_v29 = vadd.f32 %v5290_v19, %v5178_v18  ;;  %6079 = vmatmul.mubr.bf16.gmra.mrb[152].mxu0 %v7290_v32 }
 0x1c0   : > { %6082 = vmatprep.mubr.bf16.mxu0 %v7373_v62 }
 0x1c1   : > { %v7426_v45 = vadd.f32 %v5293_v17, %v5181_v7 }
 0x1c2   : > { %v5182_v31 = vpop.f32.mrb[48].mxu0 }
 0x1c3   : > { %v5294_v20 = vpop.f32.mrb[48].mxu1  ;;  %v5183_v16 = vpop.f32.mrb[49].mxu0 }
 0x1c4   : > { %v5295_v40 = vpop.f32.mrb[49].mxu1  ;;  %v5184_v3 = vadd.f32 %v5183_v16, %v5182_v31  ;;  %v5185_v10 = vpop.f32.mrb[50].mxu0 }
 0x1c5   : > { %v5296_v27 = vadd.f32 %v5295_v40, %v5294_v20  ;;  %v5297_v53 = vpop.f32.mrb[50].mxu1  ;;  %v5186_v34 = vpop.f32.mrb[51].mxu0 }
 0x1c6   : > { %v5298_v61 = vpop.f32.mrb[51].mxu1  ;;  %v5187_v26 = vadd.f32 %v5186_v34, %v5185_v10 }
 0x1c7   : > { %v5299_v13 = vadd.f32 %v5298_v61, %v5297_v53  ;;  %v7429_v42 = vadd.f32 %v5296_v27, %v5184_v3  ;;  %6083 = vmatmul.mubr.bf16.gmra.mrb[156].mxu0 %v7290_v32 }
 0x1c9   : > { %v7432_v0 = vadd.f32 %v5299_v13, %v5187_v26 }
 0x1ca   : > { %v5188_v62 = vpop.f32.mrb[52].mxu0 }
 0x1cb   : > { %v5300_v5 = vpop.f32.mrb[52].mxu1  ;;  %v5189_v14 = vpop.f32.mrb[53].mxu0 }
 0x1cc   : > { %v5301_v6 = vpop.f32.mrb[53].mxu1  ;;  %v5190_v2 = vadd.f32 %v5189_v14, %v5188_v62  ;;  %v5191_v47 = vpop.f32.mrb[54].mxu0 }
 0x1cd   : > { %v5302_v35 = vadd.f32 %v5301_v6, %v5300_v5  ;;  %v5303_v39 = vpop.f32.mrb[54].mxu1  ;;  %v5192_v23 = vpop.f32.mrb[55].mxu0 }
 0x1ce   : > { %v5304_v43 = vpop.f32.mrb[55].mxu1  ;;  %v5193_v38 = vadd.f32 %v5192_v23, %v5191_v47  ;;  %v6279_v47 = vld [vmem:[#allocation7 + $0x40] sm:$0xff]  }
 0x1cf   : > { %v5305_v57 = vadd.f32 %v5304_v43, %v5303_v39  ;;  %v7434_v51 = vadd.f32 %v5302_v35, %v5190_v2  ;;  %v6280_v23 = vld [vmem:[#allocation7] sm:$0xff]   ;;  %5566 = vmatprep.subr.bf16.mxu1 %v6279_v47 }
 0x1d0   : > { %5567 = vmatpush3.bf16.msra.mxu1 %v6280_v23 }
 0x1d1   : > { %v7436_v22 = vadd.f32 %v5305_v57, %v5193_v38 }
 0x1d2   : > { %v5194_v17 = vpop.f32.mrb[56].mxu0 }
 0x1d3   : > { %v5306_v54 = vpop.f32.mrb[56].mxu1  ;;  %v5195_v18 = vpop.f32.mrb[57].mxu0 }
 0x1d4   : > { %v5307_v19 = vpop.f32.mrb[57].mxu1  ;;  %v5196_v21 = vadd.f32 %v5195_v18, %v5194_v17  ;;  %v5197_v50 = vpop.f32.mrb[58].mxu0 }
 0x1d5   : > { %v5308_v32 = vadd.f32 %v5307_v19, %v5306_v54  ;;  %v5309_v55 = vpop.f32.mrb[58].mxu1  ;;  %v5198_v7 = vpop.f32.mrb[59].mxu0 }
 0x1d6   : > { %v5310_v56 = vpop.f32.mrb[59].mxu1  ;;  %v5199_v40 = vadd.f32 %v5198_v7, %v5197_v50 }
 0x1d7   : > { %v5311_v25 = vadd.f32 %v5310_v56, %v5309_v55  ;;  %v7438_v20 = vadd.f32 %v5308_v32, %v5196_v21 }
 0x1d9   : > { %v7440_v61 = vadd.f32 %v5311_v25, %v5199_v40 }
 0x1da   : > { %v5200_v3 = vpop.f32.mrb[60].mxu0 }
 0x1db   : > { %v5312_v27 = vpop.f32.mrb[60].mxu1  ;;  %v5201_v34 = vpop.f32.mrb[61].mxu0 }
 0x1dc   : > { %v5313_v53 = vpop.f32.mrb[61].mxu1  ;;  %v5202_v26 = vadd.f32 %v5201_v34, %v5200_v3  ;;  %v5203_v5 = vpop.f32.mrb[62].mxu0 }
 0x1dd   : > { %v5314_v31 = vadd.f32 %v5313_v53, %v5312_v27  ;;  %v5315_v13 = vpop.f32.mrb[62].mxu1  ;;  %v5204_v6 = vpop.f32.mrb[63].mxu0 }
 0x1de   : > { %v5316_v16 = vpop.f32.mrb[63].mxu1  ;;  %v5205_v39 = vadd.f32 %v5204_v6, %v5203_v5 }
 0x1df   : > { %v5317_v10 = vadd.f32 %v5316_v16, %v5315_v13  ;;  %v7442_v35 = vadd.f32 %v5314_v31, %v5202_v26 }
 0x1e1   : > { %v7444_v57 = vadd.f32 %v5317_v10, %v5205_v39 }
 0x1e2   : > { %v5334_v54 = vpop.f32.mrb[64].mxu0 }
 0x1e3   : > { %v5446_v43 = vpop.f32.mrb[64].mxu1  ;;  %v5335_v32 = vpop.f32.mrb[65].mxu0 }
 0x1e4   : > { %v5447_v62 = vpop.f32.mrb[65].mxu1  ;;  %v5336_v55 = vadd.f32 %v5335_v32, %v5334_v54  ;;  %v5337_v56 = vpop.f32.mrb[66].mxu0 }
 0x1e5   : > { %v5448_v14 = vadd.f32 %v5447_v62, %v5446_v43  ;;  %v5449_v2 = vpop.f32.mrb[66].mxu1  ;;  %v5338_v17 = vpop.f32.mrb[67].mxu0 }
 0x1e6   : > { %v5450_v38 = vpop.f32.mrb[67].mxu1  ;;  %v1843_v25 = vadd.f32 %v5336_v55, %v7344_v8  ;;  %v5339_v18 = vadd.f32 %v5338_v17, %v5337_v56  ;;  %v6281_v56 = vld [vmem:[#allocation7 + $0x48] sm:$0xff]  }
 0x1e7   : > { %v5451_v19 = vadd.f32 %v5450_v38, %v5449_v2  ;;  %v6282_v17 = vld [vmem:[#allocation7 + $0x8] sm:$0xff]   ;;  %5568 = vmatprep.subr.bf16.mxu1 %v6281_v56 }
 0x1e8   : > { %v1846_v7 = vadd.f32 %v5339_v18, %v7348_v52  ;;  %v7448_v53 = vadd.f32 %v5448_v14, %v1843_v25  ;;  %5569 = vmatpush3.bf16.msra.mxu1 %v6282_v17  ;;  %v6283_v17 = vld [vmem:[#allocation7 + $0x50] sm:$0xff]  }
 0x1e9   : > { %5570 = vmatprep.subr.bf16.mxu1 %v6283_v17 }
 0x1ea   : > { %v5340_v13 = vpop.f32.mrb[68].mxu0  ;;  %v7450_v3 = vadd.f32 %v5451_v19, %v1846_v7 }
 0x1eb   : > { %v5452_v21 = vpop.f32.mrb[68].mxu1  ;;  %v5341_v10 = vpop.f32.mrb[69].mxu0 }
 0x1ec   : > { %v5453_v50 = vpop.f32.mrb[69].mxu1  ;;  %v5342_v34 = vadd.f32 %v5341_v10, %v5340_v13  ;;  %v5343_v26 = vpop.f32.mrb[70].mxu0 }
 0x1ed   : > { %v5454_v40 = vadd.f32 %v5453_v50, %v5452_v21  ;;  %v5455_v27 = vpop.f32.mrb[70].mxu1  ;;  %v5344_v5 = vpop.f32.mrb[71].mxu0 }
 0x1ee   : > { %v5456_v31 = vpop.f32.mrb[71].mxu1  ;;  %v1851_v8 = vadd.f32 %v5342_v34, %v7354_v24  ;;  %v5345_v6 = vadd.f32 %v5344_v5, %v5343_v26 }
 0x1ef   : > { %v5457_v16 = vadd.f32 %v5456_v31, %v5455_v27 }
 0x1f0   : > { %v1854_v52 = vadd.f32 %v5345_v6, %v7358_v37  ;;  %v7454_v14 = vadd.f32 %v5454_v40, %v1851_v8 }
 0x1f2   : > { %v5346_v23 = vpop.f32.mrb[72].mxu0  ;;  %v7456_v54 = vadd.f32 %v5457_v16, %v1854_v52 }
 0x1f3   : > { %v5458_v39 = vpop.f32.mrb[72].mxu1  ;;  %v5347_v19 = vpop.f32.mrb[73].mxu0 }
 0x1f4   : > { %v5459_v43 = vpop.f32.mrb[73].mxu1  ;;  %v5348_v32 = vadd.f32 %v5347_v19, %v5346_v23  ;;  %v5349_v55 = vpop.f32.mrb[74].mxu0 }
 0x1f5   : > { %v5460_v62 = vadd.f32 %v5459_v43, %v5458_v39  ;;  %v5461_v2 = vpop.f32.mrb[74].mxu1  ;;  %v5350_v24 = vpop.f32.mrb[75].mxu0 }
 0x1f6   : > { %v5462_v47 = vpop.f32.mrb[75].mxu1  ;;  %v1859_v25 = vadd.f32 %v5348_v32, %v7362_v1  ;;  %v5351_v18 = vadd.f32 %v5350_v24, %v5349_v55  ;;  %v6284_v24 = vld [vmem:[#allocation7 + $0x10] sm:$0xff]  }
 0x1f7   : > { %v5463_v38 = vadd.f32 %v5462_v47, %v5461_v2  ;;  %5571 = vmatpush3.bf16.msra.mxu1 %v6284_v24  ;;  %v6285_v24 = vld [vmem:[#allocation7 + $0x58] sm:$0xff]  }
 0x1f8   : > { %v1862_v50 = vadd.f32 %v5351_v18, %v7366_v60  ;;  %v7460_v27 = vadd.f32 %v5460_v62, %v1859_v25  ;;  %5572 = vmatprep.subr.bf16.mxu1 %v6285_v24 }
 0x1fa   : > { %v5352_v13 = vpop.f32.mrb[76].mxu0  ;;  %v7462_v10 = vadd.f32 %v5463_v38, %v1862_v50 }
 0x1fb   : > { %v5464_v21 = vpop.f32.mrb[76].mxu1  ;;  %v5353_v34 = vpop.f32.mrb[77].mxu0 }
 0x1fc   : > { %v5465_v37 = vpop.f32.mrb[77].mxu1  ;;  %v5354_v26 = vadd.f32 %v5353_v34, %v5352_v13  ;;  %v5355_v5 = vpop.f32.mrb[78].mxu0 }
 0x1fd   : > { %v5466_v7 = vadd.f32 %v5465_v37, %v5464_v21  ;;  %v5467_v40 = vpop.f32.mrb[78].mxu1  ;;  %v5356_v1 = vpop.f32.mrb[79].mxu0 }
 0x1fe   : > { %v5468_v31 = vpop.f32.mrb[79].mxu1  ;;  %v1867_v8 = vadd.f32 %v5354_v26, %v7375_v9  ;;  %v5357_v6 = vadd.f32 %v5356_v1, %v5355_v5 }
 0x1ff   : > { %v5469_v16 = vadd.f32 %v5468_v31, %v5467_v40 }
 0x200   : > { %v1870_v60 = vadd.f32 %v5357_v6, %v7379_v36  ;;  %v7466_v62 = vadd.f32 %v5466_v7, %v1867_v8 }
 0x202   : > { %v5358_v23 = vpop.f32.mrb[80].mxu0  ;;  %v7468_v38 = vadd.f32 %v5469_v16, %v1870_v60 }
 0x203   : > { %v5470_v39 = vpop.f32.mrb[80].mxu1  ;;  %v5359_v32 = vpop.f32.mrb[81].mxu0 }
 0x204   : > { %v5471_v43 = vpop.f32.mrb[81].mxu1  ;;  %v5360_v55 = vadd.f32 %v5359_v32, %v5358_v23  ;;  %v5361_v56 = vpop.f32.mrb[82].mxu0 }
 0x205   : > { %v5472_v52 = vadd.f32 %v5471_v43, %v5470_v39  ;;  %v5473_v2 = vpop.f32.mrb[82].mxu1  ;;  %v5362_v9 = vpop.f32.mrb[83].mxu0 }
 0x206   : > { %v5474_v47 = vpop.f32.mrb[83].mxu1  ;;  %v1875_v25 = vadd.f32 %v5360_v55, %v7382_v15  ;;  %v5363_v18 = vadd.f32 %v5362_v9, %v5361_v56  ;;  %v6286_v9 = vld [vmem:[#allocation7 + $0x18] sm:$0xff]  }
 0x207   : > { %v5475_v19 = vadd.f32 %v5474_v47, %v5473_v2  ;;  %5573 = vmatpush3.bf16.msra.mxu1 %v6286_v9 }
 0x208   : > { %v1878_v37 = vadd.f32 %v5363_v18, %v7385_v30  ;;  %v7472_v40 = vadd.f32 %v5472_v52, %v1875_v25 }
 0x20a   : > { %v5364_v13 = vpop.f32.mrb[84].mxu0  ;;  %v7474_v34 = vadd.f32 %v5475_v19, %v1878_v37 }
 0x20b   : > { %v5476_v21 = vpop.f32.mrb[84].mxu1  ;;  %v5365_v26 = vpop.f32.mrb[85].mxu0 }
 0x20c   : > { %v5477_v36 = vpop.f32.mrb[85].mxu1  ;;  %v5366_v5 = vadd.f32 %v5365_v26, %v5364_v13  ;;  %v5367_v1 = vpop.f32.mrb[86].mxu0 }
 0x20d   : > { %v5478_v50 = vadd.f32 %v5477_v36, %v5476_v21  ;;  %v5479_v7 = vpop.f32.mrb[86].mxu1  ;;  %v5368_v15 = vpop.f32.mrb[87].mxu0 }
 0x20e   : > { %v5480_v31 = vpop.f32.mrb[87].mxu1  ;;  %v1883_v8 = vadd.f32 %v5366_v5, %v7387_v11  ;;  %v5369_v6 = vadd.f32 %v5368_v15, %v5367_v1 }
 0x20f   : > { %v5481_v16 = vadd.f32 %v5480_v31, %v5479_v7 }
 0x210   : > { %v1886_v30 = vadd.f32 %v5369_v6, %v7391_v12  ;;  %v7478_v52 = vadd.f32 %v5478_v50, %v1883_v8 }
 0x212   : > { %v5370_v23 = vpop.f32.mrb[88].mxu0  ;;  %v7480_v19 = vadd.f32 %v5481_v16, %v1886_v30 }
 0x213   : > { %v5482_v39 = vpop.f32.mrb[88].mxu1  ;;  %v5371_v55 = vpop.f32.mrb[89].mxu0 }
 0x214   : > { %v5483_v43 = vpop.f32.mrb[89].mxu1  ;;  %v5372_v56 = vadd.f32 %v5371_v55, %v5370_v23  ;;  %v5373_v17 = vpop.f32.mrb[90].mxu0 }
 0x215   : > { %v5484_v60 = vadd.f32 %v5483_v43, %v5482_v39  ;;  %v5485_v2 = vpop.f32.mrb[90].mxu1  ;;  %v5374_v11 = vpop.f32.mrb[91].mxu0 }
 0x216   : > { %v5486_v47 = vpop.f32.mrb[91].mxu1  ;;  %v1891_v25 = vadd.f32 %v5372_v56, %v7393_v44  ;;  %v5375_v18 = vadd.f32 %v5374_v11, %v5373_v17 }
 0x217   : > { %v5487_v32 = vadd.f32 %v5486_v47, %v5485_v2 }
 0x218   : > { %v1894_v36 = vadd.f32 %v5375_v18, %v7397_v33  ;;  %v7484_v7 = vadd.f32 %v5484_v60, %v1891_v25 }
 0x21a   : > { %v5376_v13 = vpop.f32.mrb[92].mxu0  ;;  %v7486_v26 = vadd.f32 %v5487_v32, %v1894_v36 }
 0x21b   : > { %v5488_v21 = vpop.f32.mrb[92].mxu1  ;;  %v5377_v5 = vpop.f32.mrb[93].mxu0 }
 0x21c   : > { %v5489_v12 = vpop.f32.mrb[93].mxu1  ;;  %v5378_v1 = vadd.f32 %v5377_v5, %v5376_v13  ;;  %v5379_v15 = vpop.f32.mrb[94].mxu0 }
 0x21d   : > { %v5490_v37 = vadd.f32 %v5489_v12, %v5488_v21  ;;  %v5491_v50 = vpop.f32.mrb[94].mxu1  ;;  %v5380_v44 = vpop.f32.mrb[95].mxu0 }
 0x21e   : > { %v5492_v31 = vpop.f32.mrb[95].mxu1  ;;  %v1899_v8 = vadd.f32 %v5378_v1, %v7399_v63  ;;  %v5381_v6 = vadd.f32 %v5380_v44, %v5379_v15 }
 0x21f   : > { %v5493_v16 = vadd.f32 %v5492_v31, %v5491_v50 }
 0x220   : > { %v1902_v33 = vadd.f32 %v5381_v6, %v7403_v49  ;;  %v7490_v60 = vadd.f32 %v5490_v37, %v1899_v8 }
 0x222   : > { %v5382_v23 = vpop.f32.mrb[96].mxu0  ;;  %v7492_v32 = vadd.f32 %v5493_v16, %v1902_v33 }
 0x223   : > { %v5494_v39 = vpop.f32.mrb[96].mxu1  ;;  %v5383_v56 = vpop.f32.mrb[97].mxu0 }
 0x224   : > { %v5495_v43 = vpop.f32.mrb[97].mxu1  ;;  %v5384_v17 = vadd.f32 %v5383_v56, %v5382_v23  ;;  %v5385_v24 = vpop.f32.mrb[98].mxu0 }
 0x225   : > { %v5496_v30 = vadd.f32 %v5495_v43, %v5494_v39  ;;  %v5497_v2 = vpop.f32.mrb[98].mxu1  ;;  %v5386_v9 = vpop.f32.mrb[99].mxu0 }
 0x226   : > { %v5498_v47 = vpop.f32.mrb[99].mxu1  ;;  %v1907_v63 = vadd.f32 %v5384_v17, %v7405_v41  ;;  %v5387_v11 = vadd.f32 %v5386_v9, %v5385_v24 }
 0x227   : > { %v5499_v55 = vadd.f32 %v5498_v47, %v5497_v2 }
 0x228   : > { %v1910_v49 = vadd.f32 %v5387_v11, %v7408_v58  ;;  %v7496_v36 = vadd.f32 %v5496_v30, %v1907_v63 }
 0x22a   : > { %v5388_v50 = vpop.f32.mrb[100].mxu0  ;;  %v7498_v13 = vadd.f32 %v5499_v55, %v1910_v49 }
 0x22b   : > { %v5500_v25 = vpop.f32.mrb[100].mxu1  ;;  %v5389_v16 = vpop.f32.mrb[101].mxu0 }
 0x22c   : > { %v5501_v18 = vpop.f32.mrb[101].mxu1  ;;  %v5390_v5 = vadd.f32 %v5389_v16, %v5388_v50  ;;  %v5391_v1 = vpop.f32.mrb[102].mxu0 }
 0x22d   : > { %v5502_v21 = vadd.f32 %v5501_v18, %v5500_v25  ;;  %v5503_v12 = vpop.f32.mrb[102].mxu1  ;;  %v5392_v15 = vpop.f32.mrb[103].mxu0 }
 0x22e   : > { %v5504_v37 = vpop.f32.mrb[103].mxu1  ;;  %v1915_v41 = vadd.f32 %v5390_v5, %v7411_v28  ;;  %v5393_v44 = vadd.f32 %v5392_v15, %v5391_v1 }
 0x22f   : > { %v5505_v31 = vadd.f32 %v5504_v37, %v5503_v12 }
 0x230   : > { %v1918_v58 = vadd.f32 %v5393_v44, %v7414_v46  ;;  %v7502_v33 = vadd.f32 %v5502_v21, %v1915_v41 }
 0x232   : > { %v5394_v2 = vpop.f32.mrb[104].mxu0  ;;  %v7504_v23 = vadd.f32 %v5505_v31, %v1918_v58 }
 0x233   : > { %v5506_v8 = vpop.f32.mrb[104].mxu1  ;;  %v5395_v55 = vpop.f32.mrb[105].mxu0 }
 0x234   : > { %v5507_v6 = vpop.f32.mrb[105].mxu1  ;;  %v5396_v56 = vadd.f32 %v5395_v55, %v5394_v2  ;;  %v5397_v17 = vpop.f32.mrb[106].mxu0 }
 0x235   : > { %v5508_v39 = vadd.f32 %v5507_v6, %v5506_v8  ;;  %v5509_v43 = vpop.f32.mrb[106].mxu1  ;;  %v5398_v24 = vpop.f32.mrb[107].mxu0 }
 0x236   : > { %v5510_v30 = vpop.f32.mrb[107].mxu1  ;;  %v1923_v28 = vadd.f32 %v5396_v56, %v7417_v59  ;;  %v5399_v9 = vadd.f32 %v5398_v24, %v5397_v17 }
 0x237   : > { %v5511_v47 = vadd.f32 %v5510_v30, %v5509_v43 }
 0x238   : > { %v1926_v46 = vadd.f32 %v5399_v9, %v7420_v4  ;;  %v7508_v49 = vadd.f32 %v5508_v39, %v1923_v28 }
 0x23a   : > { %v5400_v12 = vpop.f32.mrb[108].mxu0  ;;  %v7510_v50 = vadd.f32 %v5511_v47, %v1926_v46 }
 0x23b   : > { %v5512_v63 = vpop.f32.mrb[108].mxu1  ;;  %v5401_v31 = vpop.f32.mrb[109].mxu0 }
 0x23c   : > { %v5513_v11 = vpop.f32.mrb[109].mxu1  ;;  %v5402_v16 = vadd.f32 %v5401_v31, %v5400_v12  ;;  %v5403_v5 = vpop.f32.mrb[110].mxu0 }
 0x23d   : > { %v5514_v25 = vadd.f32 %v5513_v11, %v5512_v63  ;;  %v5515_v18 = vpop.f32.mrb[110].mxu1  ;;  %v5404_v1 = vpop.f32.mrb[111].mxu0 }
 0x23e   : > { %v5516_v21 = vpop.f32.mrb[111].mxu1  ;;  %v1931_v59 = vadd.f32 %v5402_v16, %v7423_v29  ;;  %v5405_v15 = vadd.f32 %v5404_v1, %v5403_v5 }
 0x23f   : > { %v5517_v37 = vadd.f32 %v5516_v21, %v5515_v18 }
 0x240   : > { %v1934_v4 = vadd.f32 %v5405_v15, %v7426_v45  ;;  %v7514_v58 = vadd.f32 %v5514_v25, %v1931_v59 }
 0x242   : > { %v5406_v43 = vpop.f32.mrb[112].mxu0  ;;  %v7516_v2 = vadd.f32 %v5517_v37, %v1934_v4 }
 0x243   : > { %v5518_v41 = vpop.f32.mrb[112].mxu1  ;;  %v5407_v47 = vpop.f32.mrb[113].mxu0 }
 0x244   : > { %v5519_v44 = vpop.f32.mrb[113].mxu1  ;;  %v5408_v55 = vadd.f32 %v5407_v47, %v5406_v43  ;;  %v5409_v56 = vpop.f32.mrb[114].mxu0 }
 0x245   : > { %v5520_v8 = vadd.f32 %v5519_v44, %v5518_v41  ;;  %v5521_v6 = vpop.f32.mrb[114].mxu1  ;;  %v5410_v17 = vpop.f32.mrb[115].mxu0 }
 0x246   : > { %v5522_v39 = vpop.f32.mrb[115].mxu1  ;;  %v1939_v29 = vadd.f32 %v5408_v55, %v7429_v42  ;;  %v5411_v24 = vadd.f32 %v5410_v17, %v5409_v56  ;;  %v6291_v17 = vld [vmem:[#allocation7 + $0xc0] sm:$0xff]  }
 0x247   : > { %v5523_v30 = vadd.f32 %v5522_v39, %v5521_v6  ;;  %5678 = vmatprep.subr.bf16.mxu0 %v6291_v17 }
 0x248   : > { %v1942_v45 = vadd.f32 %v5411_v24, %v7432_v0  ;;  %v7520_v46 = vadd.f32 %v5520_v8, %v1939_v29 }
 0x24a   : > { %v5412_v18 = vpop.f32.mrb[116].mxu0  ;;  %v7522_v12 = vadd.f32 %v5523_v30, %v1942_v45 }
 0x24b   : > { %v5524_v28 = vpop.f32.mrb[116].mxu1  ;;  %v5413_v37 = vpop.f32.mrb[117].mxu0 }
 0x24c   : > { %v5525_v9 = vpop.f32.mrb[117].mxu1  ;;  %v5414_v31 = vadd.f32 %v5413_v37, %v5412_v18  ;;  %v5415_v16 = vpop.f32.mrb[118].mxu0  ;;  %v6293_v18 = vld [vmem:[#allocation7 + $0xc8] sm:$0xff]  }
 0x24d   : > { %v5526_v63 = vadd.f32 %v5525_v9, %v5524_v28  ;;  %v5527_v11 = vpop.f32.mrb[118].mxu1  ;;  %v5416_v5 = vpop.f32.mrb[119].mxu0  ;;  %v6292_v28 = vld [vmem:[#allocation7 + $0x80] sm:$0xff]  }
 0x24e   : > { %v5528_v25 = vpop.f32.mrb[119].mxu1  ;;  %v1947_v42 = vadd.f32 %v5414_v31, %v7434_v51  ;;  %v5417_v1 = vadd.f32 %v5416_v5, %v5415_v16  ;;  %5679 = vmatpush3.bf16.msra.mxu0 %v6292_v28  ;;  %v6295_v16 = vld [vmem:[#allocation7 + $0x88] sm:$0xff]  }
 0x24f   : > { %v5529_v21 = vadd.f32 %v5528_v25, %v5527_v11  ;;  %5680 = vmatprep.subr.bf16.mxu0 %v6293_v18 }
 0x250   : > { %v1950_v0 = vadd.f32 %v5417_v1, %v7436_v22  ;;  %v7526_v4 = vadd.f32 %v5526_v63, %v1947_v42 }
 0x252   : > { %v5418_v6 = vpop.f32.mrb[120].mxu0  ;;  %v7528_v43 = vadd.f32 %v5529_v21, %v1950_v0  ;;  %5681 = vmatpush3.bf16.msra.mxu0 %v6295_v16  ;;  %v6298_v0 = vld [vmem:[#allocation7 + $0x90] sm:$0xff]   ;;  %v6288_v16 = vld [vmem:[#allocation7 + $0x20] sm:$0xff]  }
 0x253   : > { %v5530_v59 = vpop.f32.mrb[120].mxu1  ;;  %v5419_v30 = vpop.f32.mrb[121].mxu0 }
 0x254   : > { %v5531_v15 = vpop.f32.mrb[121].mxu1  ;;  %v5420_v47 = vadd.f32 %v5419_v30, %v5418_v6  ;;  %v5421_v55 = vpop.f32.mrb[122].mxu0  ;;  %v6300_v30 = vld [vmem:[#allocation7 + $0x98] sm:$0xff]  }
 0x255   : > { %v5532_v41 = vadd.f32 %v5531_v15, %v5530_v59  ;;  %v5533_v44 = vpop.f32.mrb[122].mxu1  ;;  %v5422_v56 = vpop.f32.mrb[123].mxu0  ;;  %v6297_v59 = vld [vmem:[#allocation7 + $0xd0] sm:$0xff]  }
 0x256   : > { %v5534_v8 = vpop.f32.mrb[123].mxu1  ;;  %v1955_v51 = vadd.f32 %v5420_v47, %v7438_v20  ;;  %v5423_v29 = vadd.f32 %v5422_v56, %v5421_v55  ;;  %5682 = vmatprep.subr.bf16.mxu0 %v6297_v59 }
 0x257   : > { %v5535_v39 = vadd.f32 %v5534_v8, %v5533_v44  ;;  %5683 = vmatpush3.bf16.msra.mxu0 %v6298_v0  ;;  %v6299_v8 = vld [vmem:[#allocation7 + $0xd8] sm:$0xff]   ;;  %v6307_v0 = vld [vmem:[#allocation7 + $0xf0] sm:$0xff]  }
 0x258   : > { %v1958_v9 = vadd.f32 %v5423_v29, %v7440_v61  ;;  %v7532_v11 = vadd.f32 %v5532_v41, %v1955_v51  ;;  %5684 = vmatprep.subr.bf16.mxu0 %v6299_v8  ;;  %v6301_v51 = vld [vmem:[#allocation7 + $0xe0] sm:$0xff]  }
 0x25a   : > { %v5424_v21 = vpop.f32.mrb[124].mxu0  ;;  %v7534_v31 = vadd.f32 %v5535_v39, %v1958_v9 }
 0x25b   : > { %v5536_v24 = vpop.f32.mrb[124].mxu1  ;;  %v5425_v20 = vpop.f32.mrb[125].mxu0  ;;  %5685 = vmatpush3.bf16.msra.mxu0 %v6300_v30 }
 0x25c   : > { %v5537_v22 = vpop.f32.mrb[125].mxu1  ;;  %v5426_v5 = vadd.f32 %v5425_v20, %v5424_v21  ;;  %v5427_v42 = vpop.f32.mrb[126].mxu0  ;;  %5686 = vmatprep.subr.bf16.mxu0 %v6301_v51  ;;  %v6289_v20 = vld [vmem:[#allocation7 + $0x68] sm:$0xff]  }
 0x25d   : > { %v5538_v45 = vadd.f32 %v5537_v22, %v5536_v24  ;;  %v5539_v63 = vpop.f32.mrb[126].mxu1  ;;  %v5428_v1 = vpop.f32.mrb[127].mxu0  ;;  %v6302_v24 = vld [vmem:[#allocation7 + $0xa0] sm:$0xff]   ;;  %v6303_v22 = vld [vmem:[#allocation7 + $0xe8] sm:$0xff]  }
 0x25e   : > { %v5540_v25 = vpop.f32.mrb[127].mxu1  ;;  %v1963_v61 = vadd.f32 %v5426_v5, %v7442_v35  ;;  %v5429_v15 = vadd.f32 %v5428_v1, %v5427_v42 }
 0x25f   : > { %v5541_v37 = vadd.f32 %v5540_v25, %v5539_v63  ;;  %5687 = vmatpush3.bf16.msra.mxu0 %v6302_v24  ;;  %v6287_v63 = vld [vmem:[#allocation7 + $0x60] sm:$0xff]   ;;  %v6305_v25 = vld [vmem:[#allocation7 + $0xa8] sm:$0xff]   ;;  %v6310_v24 = vld [vmem:[#allocation7 + $0xb8] sm:$0xff]  }
 0x260   : > { %v1966_v41 = vadd.f32 %v5429_v15, %v7444_v57  ;;  %v7538_v44 = vadd.f32 %v5538_v45, %v1963_v61  ;;  %5688 = vmatprep.subr.bf16.mxu0 %v6303_v22  ;;  %5574 = vmatprep.subr.bf16.mxu1 %v6287_v63 }
 0x261   : > { %5575 = vmatpush3.bf16.msra.mxu1 %v6288_v16 }
 0x262   : > { %v6056_v6 = vpop.f32.mrb[128].mxu0  ;;  %v7540_v39 = vadd.f32 %v5541_v37, %v1966_v41  ;;  %v6308_v41 = vld [vmem:[#allocation7 + $0xb0] sm:$0xff]   ;;  %5576 = vmatprep.subr.bf16.mxu1 %v6289_v20 }
 0x263   : > { %v7543_v47 = vadd.f32 %v6056_v6, %v7454_v14  ;;  %v2164_v55 = vpop.f32.mrb[129].mxu0  ;;  %5689 = vmatpush3.bf16.msra.mxu0 %v6305_v25 }
 0x264   : > { %v7546_v35 = vadd.f32 %v2164_v55, %v7448_v53  ;;  %v6057_v56 = vpop.f32.mrb[130].mxu0  ;;  %v6294_v55 = vld [vmem:[#allocation7 + $0x70] sm:$0xff]   ;;  %5690 = vmatprep.subr.bf16.mxu0 %v6307_v0 }
 0x265   : > { %v7549_v57 = vadd.f32 %v6057_v56, %v7456_v54  ;;  %v2167_v17 = vpop.f32.mrb[131].mxu0  ;;  %v2331_v54 = vmul.f32 %v7543_v47, %v7543_v47  ;;  %v6309_v56 = vld [vmem:[#allocation7 + $0xf8] sm:$0xff]  }
 0x266   : > { %v7552_v29 = vadd.f32 %v2167_v17, %v7450_v3  ;;  %v2329_v14 = vmul.f32 %v7546_v35, %v7546_v35 }
 0x267   : > { %v2332_v18 = vmul.f32 %v7549_v57, %v7549_v57  ;;  %5691 = vmatpush3.bf16.msra.mxu0 %v6308_v41 }
 0x268   : > { %v2291_v28 = vadd.f32 %v7552_v29, %v7546_v35  ;;  %v2330_v53 = vmul.f32 %v7552_v29, %v7552_v29  ;;  %5692 = vmatprep.subr.bf16.mxu0 %v6309_v56 }
 0x26a   : > { %v2292_v9 = vadd.f32 %v2291_v28, %v7543_v47  ;;  %v2361_v3 = vadd.f32 %v2330_v53, %v2329_v14  ;;  %v6060_v45 = vpop.f32.mrb[132].mxu0  ;;  %v6296_v14 = vld [vmem:[#allocation7 + $0x30] sm:$0xff]  }
 0x26b   : > { %v7566_v21 = vadd.f32 %v6060_v45, %v7466_v62  ;;  %v2180_v37 = vpop.f32.mrb[133].mxu0  ;;  %v6290_v62 = vld [vmem:[#allocation7 + $0x28] sm:$0xff]   ;;  %5693 = vmatpush3.bf16.msra.mxu0 %v6310_v24 }
 0x26c   : > { %v2362_v5 = vadd.f32 %v2361_v3, %v2331_v54  ;;  %v7569_v42 = vadd.f32 %v2180_v37, %v7460_v27  ;;  %v2293_v1 = vadd.f32 %v2292_v9, %v7549_v57  ;;  %v6061_v59 = vpop.f32.mrb[134].mxu0  ;;  %5577 = vmatpush3.bf16.msra.mxu1 %v6290_v62  ;;  %v6304_v54 = vld [vmem:[#allocation7 + $0x78] sm:$0xff]  }
 0x26d   : > { %v7573_v61 = vadd.f32 %v6061_v59, %v7468_v38  ;;  %v2183_v15 = vpop.f32.mrb[135].mxu0  ;;  %v2335_v28 = vmul.f32 %v7566_v21, %v7566_v21  ;;  %5578 = vmatprep.subr.bf16.mxu1 %v6294_v55 }
 0x26e   : > { %v2294_v8 = vadd.f32 %v2293_v1, %v7569_v42  ;;  %v2333_v6 = vmul.f32 %v7569_v42, %v7569_v42  ;;  %v2363_v27 = vadd.f32 %v2362_v5, %v2332_v18  ;;  %v7579_v30 = vadd.f32 %v2183_v15, %v7462_v10  ;;  %v6306_v5 = vld [vmem:[#allocation7 + $0x38] sm:$0xff]  }
 0x26f   : > { %v2336_v45 = vmul.f32 %v7573_v61, %v7573_v61 }
 0x270   : > { %v2364_v38 = vadd.f32 %v2363_v27, %v2333_v6  ;;  %v2295_v17 = vadd.f32 %v2294_v8, %v7579_v30  ;;  %v2334_v51 = vmul.f32 %v7579_v30, %v7579_v30  ;;  %5579 = vmatpush3.bf16.msra.mxu1 %v6296_v14  ;;  %v6311_v27 = vld [vmem:[#allocation7 + $0x140] sm:$0xff]  }
 0x271   : > { %5580 = vmatprep.subr.bf16.mxu1 %v6304_v54 }
 0x272   : > { %v2296_v10 = vadd.f32 %v2295_v17, %v7566_v21  ;;  %v2365_v53 = vadd.f32 %v2364_v38, %v2334_v51  ;;  %v6064_v22 = vpop.f32.mrb[136].mxu0 }
 0x273   : > { %v7588_v9 = vadd.f32 %v6064_v22, %v7478_v52  ;;  %v2196_v3 = vpop.f32.mrb[137].mxu0 }
 0x274   : > { %v2366_v63 = vadd.f32 %v2365_v53, %v2335_v28  ;;  %v7593_v25 = vadd.f32 %v2196_v3, %v7472_v40  ;;  %v2297_v18 = vadd.f32 %v2296_v10, %v7573_v61  ;;  %v6065_v37 = vpop.f32.mrb[138].mxu0  ;;  %5581 = vmatpush3.bf16.msra.mxu1 %v6306_v5 }
 0x275   : > { %v7597_v16 = vadd.f32 %v6065_v37, %v7480_v19  ;;  %v2199_v20 = vpop.f32.mrb[139].mxu0  ;;  %v2339_v0 = vmul.f32 %v7588_v9, %v7588_v9  ;;  %5790 = vmatprep.subr.bf16.mxu1 %v6311_v27 }
 0x276   : > { %v2298_v52 = vadd.f32 %v2297_v18, %v7593_v25  ;;  %v2337_v1 = vmul.f32 %v7593_v25, %v7593_v25  ;;  %v2367_v59 = vadd.f32 %v2366_v63, %v2336_v45  ;;  %v7603_v15 = vadd.f32 %v2199_v20, %v7474_v34 }
 0x277   : > { %v2340_v56 = vmul.f32 %v7597_v16, %v7597_v16 }
 0x278   : > { %v2368_v40 = vadd.f32 %v2367_v59, %v2337_v1  ;;  %v2299_v62 = vadd.f32 %v2298_v52, %v7603_v15  ;;  %v2338_v19 = vmul.f32 %v7603_v15, %v7603_v15 }
 0x27a   : > { %v2300_v41 = vadd.f32 %v2299_v62, %v7588_v9  ;;  %v2369_v8 = vadd.f32 %v2368_v40, %v2338_v19  ;;  %v6068_v6 = vpop.f32.mrb[140].mxu0 }
 0x27b   : > { %v7612_v55 = vadd.f32 %v6068_v6, %v7490_v60  ;;  %v2212_v34 = vpop.f32.mrb[141].mxu0 }
 0x27c   : > { %v2370_v38 = vadd.f32 %v2369_v8, %v2339_v0  ;;  %v7617_v17 = vadd.f32 %v2212_v34, %v7484_v7  ;;  %v2301_v51 = vadd.f32 %v2300_v41, %v7597_v16  ;;  %v6069_v24 = vpop.f32.mrb[142].mxu0 }
 0x27d   : > { %v7621_v14 = vadd.f32 %v6069_v24, %v7492_v32  ;;  %v2215_v28 = vpop.f32.mrb[143].mxu0  ;;  %v2343_v32 = vmul.f32 %v7612_v55, %v7612_v55 }
 0x27e   : > { %v2302_v10 = vadd.f32 %v2301_v51, %v7617_v17  ;;  %v2341_v60 = vmul.f32 %v7617_v17, %v7617_v17  ;;  %v2371_v53 = vadd.f32 %v2370_v38, %v2340_v56  ;;  %v7627_v22 = vadd.f32 %v2215_v28, %v7486_v26 }
 0x27f   : > { %v2344_v26 = vmul.f32 %v7621_v14, %v7621_v14 }
 0x280   : > { %v2372_v54 = vadd.f32 %v2371_v53, %v2341_v60  ;;  %v2303_v7 = vadd.f32 %v2302_v10, %v7627_v22  ;;  %v2342_v3 = vmul.f32 %v7627_v22, %v7627_v22 }
 0x282   : > { %v2304_v45 = vadd.f32 %v2303_v7, %v7612_v55  ;;  %v2373_v63 = vadd.f32 %v2372_v54, %v2342_v3  ;;  %v6072_v18 = vpop.f32.mrb[144].mxu0 }
 0x283   : > { %v7636_v37 = vadd.f32 %v6072_v18, %v7502_v33  ;;  %v2228_v20 = vpop.f32.mrb[145].mxu0 }
 0x284   : > { %v2374_v5 = vadd.f32 %v2373_v63, %v2343_v32  ;;  %v7641_v52 = vadd.f32 %v2228_v20, %v7496_v36  ;;  %v2305_v1 = vadd.f32 %v2304_v45, %v7621_v14  ;;  %v6073_v59 = vpop.f32.mrb[146].mxu0 }
 0x285   : > { %v7645_v40 = vadd.f32 %v6073_v59, %v7504_v23  ;;  %v2231_v62 = vpop.f32.mrb[147].mxu0  ;;  %v2347_v23 = vmul.f32 %v7636_v37, %v7636_v37 }
 0x286   : > { %v2306_v19 = vadd.f32 %v2305_v1, %v7641_v52  ;;  %v2345_v33 = vmul.f32 %v7641_v52, %v7641_v52  ;;  %v2375_v0 = vadd.f32 %v2374_v5, %v2344_v26  ;;  %v7651_v41 = vadd.f32 %v2231_v62, %v7498_v13 }
 0x287   : > { %v2348_v13 = vmul.f32 %v7645_v40, %v7645_v40 }
 0x288   : > { %v2376_v8 = vadd.f32 %v2375_v0, %v2345_v33  ;;  %v2307_v36 = vadd.f32 %v2306_v19, %v7651_v41  ;;  %v2346_v6 = vmul.f32 %v7651_v41, %v7651_v41 }
 0x28a   : > { %v2308_v27 = vadd.f32 %v2307_v36, %v7636_v37  ;;  %v2377_v34 = vadd.f32 %v2376_v8, %v2346_v6  ;;  %v6076_v56 = vpop.f32.mrb[148].mxu0 }
 0x28b   : > { %v7660_v38 = vadd.f32 %v6076_v56, %v7514_v58  ;;  %v2244_v51 = vpop.f32.mrb[149].mxu0 }
 0x28c   : > { %v2378_v24 = vadd.f32 %v2377_v34, %v2347_v23  ;;  %v7665_v28 = vadd.f32 %v2244_v51, %v7508_v49  ;;  %v2309_v10 = vadd.f32 %v2308_v27, %v7645_v40  ;;  %v6077_v60 = vpop.f32.mrb[150].mxu0 }
 0x28d   : > { %v7669_v53 = vadd.f32 %v6077_v60, %v7516_v2  ;;  %v2247_v54 = vpop.f32.mrb[151].mxu0  ;;  %v2351_v2 = vmul.f32 %v7660_v38, %v7660_v38 }
 0x28e   : > { %v2310_v7 = vadd.f32 %v2309_v10, %v7665_v28  ;;  %v2349_v58 = vmul.f32 %v7665_v28, %v7665_v28  ;;  %v2379_v3 = vadd.f32 %v2378_v24, %v2348_v13  ;;  %v7675_v32 = vadd.f32 %v2247_v54, %v7510_v50 }
 0x28f   : > { %v2352_v50 = vmul.f32 %v7669_v53, %v7669_v53 }
 0x290   : > { %v2380_v45 = vadd.f32 %v2379_v3, %v2349_v58  ;;  %v2311_v49 = vadd.f32 %v2310_v7, %v7675_v32  ;;  %v2350_v63 = vmul.f32 %v7675_v32, %v7675_v32 }
 0x292   : > { %v2312_v18 = vadd.f32 %v2311_v49, %v7660_v38  ;;  %v2381_v20 = vadd.f32 %v2380_v45, %v2350_v63  ;;  %v6080_v26 = vpop.f32.mrb[152].mxu0 }
 0x293   : > { %v7684_v5 = vadd.f32 %v6080_v26, %v7526_v4  ;;  %v2260_v1 = vpop.f32.mrb[153].mxu0 }
 0x294   : > { %v2382_v59 = vadd.f32 %v2381_v20, %v2351_v2  ;;  %v7689_v62 = vadd.f32 %v2260_v1, %v7520_v46  ;;  %v2313_v19 = vadd.f32 %v2312_v18, %v7669_v53  ;;  %v6081_v33 = vpop.f32.mrb[154].mxu0 }
 0x295   : > { %v7693_v0 = vadd.f32 %v6081_v33, %v7528_v43  ;;  %v2263_v8 = vpop.f32.mrb[155].mxu0  ;;  %v2355_v43 = vmul.f32 %v7684_v5, %v7684_v5 }
 0x296   : > { %v2314_v36 = vadd.f32 %v2313_v19, %v7689_v62  ;;  %v2353_v4 = vmul.f32 %v7689_v62, %v7689_v62  ;;  %v2383_v6 = vadd.f32 %v2382_v59, %v2352_v50  ;;  %v7699_v23 = vadd.f32 %v2263_v8, %v7522_v12 }
 0x297   : > { %v2356_v12 = vmul.f32 %v7693_v0, %v7693_v0 }
 0x298   : > { %v2384_v27 = vadd.f32 %v2383_v6, %v2353_v4  ;;  %v2315_v46 = vadd.f32 %v2314_v36, %v7699_v23  ;;  %v2354_v34 = vmul.f32 %v7699_v23, %v7699_v23 }
 0x29a   : > { %v2316_v56 = vadd.f32 %v2315_v46, %v7684_v5  ;;  %v2385_v51 = vadd.f32 %v2384_v27, %v2354_v34  ;;  %v6084_v13 = vpop.f32.mrb[156].mxu0 }
 0x29b   : > { %v7708_v24 = vadd.f32 %v6084_v13, %v7538_v44  ;;  %v2276_v10 = vpop.f32.mrb[157].mxu0 }
 0x29c   : > { %v2386_v60 = vadd.f32 %v2385_v51, %v2355_v43  ;;  %v7713_v54 = vadd.f32 %v2276_v10, %v7532_v11  ;;  %v2317_v7 = vadd.f32 %v2316_v56, %v7693_v0  ;;  %v6085_v58 = vpop.f32.mrb[158].mxu0 }
 0x29d   : > { %v7717_v3 = vadd.f32 %v6085_v58, %v7540_v39  ;;  %v2279_v45 = vpop.f32.mrb[159].mxu0  ;;  %v2359_v39 = vmul.f32 %v7708_v24, %v7708_v24 }
 0x29e   : > { %v2318_v49 = vadd.f32 %v2317_v7, %v7713_v54  ;;  %v2357_v44 = vmul.f32 %v7713_v54, %v7713_v54  ;;  %v2387_v63 = vadd.f32 %v2386_v60, %v2356_v12  ;;  %v7723_v2 = vadd.f32 %v2279_v45, %v7534_v31 }
 0x29f   : > { %v2360_v50 = vmul.f32 %v7717_v3, %v7717_v3 }
 0x2a0   : > { %v2388_v18 = vadd.f32 %v2387_v63, %v2357_v44  ;;  %v2319_v11 = vadd.f32 %v2318_v49, %v7723_v2  ;;  %v2358_v20 = vmul.f32 %v7723_v2, %v7723_v2 }
 0x2a2   : > { %v2320_v26 = vadd.f32 %v2319_v11, %v7708_v24  ;;  %v2389_v1 = vadd.f32 %v2388_v18, %v2358_v20 }
 0x2a4   : > { %v2321_v59 = vadd.f32 %v2320_v26, %v7717_v3  ;;  %v2390_v19 = vadd.f32 %v2389_v1, %v2359_v39 }
 0x2a6   : > { %v2322_v31 = vrot.slane %v2321_v59, 4  ;;  %v2391_v33 = vadd.f32 %v2390_v19, %v2360_v50  ;;  %v7810_v19 = vld [vmem:[%s8997_s3] ss:$0 sm:$0xff] }
 0x2a8   : > { %v2323_v8 = vadd.f32 %v2322_v31, %v2321_v59  ;;  %v2392_v36 = vrot.slane %v2391_v33, 4 }
 0x2aa   : > { %v2324_v4 = vrot.slane %v2323_v8, 2  ;;  %v2393_v6 = vadd.f32 %v2392_v36, %v2391_v33 }
 0x2ac   : > { %v2325_v27 = vadd.f32 %v2324_v4, %v2323_v8  ;;  %v2394_v46 = vrot.slane %v2393_v6, 2 }
 0x2ae   : > { %v2326_v34 = vrot.slane %v2325_v27, 1  ;;  %v2395_v43 = vadd.f32 %v2394_v46, %v2393_v6 }
 0x2b0   : > { %v2327_v56 = vadd.f32 %v2326_v34, %v2325_v27  ;;  %v2396_v51 = vrot.slane %v2395_v43, 1 }
 0x2b2   : > { %v7734_v13 = vmul.f32 0.00390625, %v2327_v56  ;;  %v2397_v10 = vadd.f32 %v2396_v51, %v2395_v43 }
 0x2b4   : > { %v2398_v12 = vmul.f32 0.00390625, %v2397_v10  ;;  %v2399_v60 = vmul.f32 %v7734_v13, %v7734_v13  ;;  %v2430_v7 = vsub.f32 %v7713_v54, %v7734_v13  ;;  %v2431_v58 = vsub.f32 %v7723_v2, %v7734_v13 }
 0x2b5   : > { %v2411_v49 = vsub.f32 %v7603_v15, %v7734_v13  ;;  %v2414_v63 = vsub.f32 %v7617_v17, %v7734_v13  ;;  %v2415_v18 = vsub.f32 %v7627_v22, %v7734_v13  ;;  %v2416_v11 = vsub.f32 %v7612_v55, %v7734_v13  ;;  %v6320_v55 = vld [vmem:[#allocation7 + $0x1c0] sm:$0xff]  }
 0x2b6   : > { %v2400_v45 = vsub.f32 %v2398_v12, %v2399_v60  ;;  %v2417_v54 = vsub.f32 %v7621_v14, %v7734_v13  ;;  %v2418_v2 = vsub.f32 %v7641_v52, %v7734_v13  ;;  %v2419_v20 = vsub.f32 %v7651_v41, %v7734_v13  ;;  %5902 = vmatprep.subr.bf16.mxu0 %v6320_v55 }
 0x2b7   : > { %v2420_v39 = vsub.f32 %v7636_v37, %v7734_v13  ;;  %v2421_v17 = vsub.f32 %v7645_v40, %v7734_v13  ;;  %v2422_v22 = vsub.f32 %v7665_v28, %v7734_v13  ;;  %v2423_v14 = vsub.f32 %v7675_v32, %v7734_v13 }
 0x2b8   : > { %v2401_v44 = vmax.f32 %v2400_v45, 0.0  ;;  %v2424_v52 = vsub.f32 %v7660_v38, %v7734_v13  ;;  %v2425_v41 = vsub.f32 %v7669_v53, %v7734_v13  ;;  %v2426_v26 = vsub.f32 %v7689_v62, %v7734_v13 }
 0x2b9   : > { %v2427_v37 = vsub.f32 %v7699_v23, %v7734_v13  ;;  %v2428_v40 = vsub.f32 %v7684_v5, %v7734_v13  ;;  %v2429_v28 = vsub.f32 %v7693_v0, %v7734_v13  ;;  %v2432_v38 = vsub.f32 %v7708_v24, %v7734_v13 }
 0x2ba   : > { %v2434_v15 = vadd.f32 1e-05, %v2401_v44  ;;  %v2433_v53 = vsub.f32 %v7717_v3, %v7734_v13  ;;  %v2402_v32 = vsub.f32 %v7546_v35, %v7734_v13  ;;  %v2403_v62 = vsub.f32 %v7552_v29, %v7734_v13  ;;  %v7797_v35 = vld [vmem:[%s8996_s2] ss:$0 sm:$0xff] }
 0x2bb   : > { %v2404_v23 = vsub.f32 %v7543_v47, %v7734_v13  ;;  %v2405_v5 = vsub.f32 %v7549_v57, %v7734_v13  ;;  %v2406_v0 = vsub.f32 %v7569_v42, %v7734_v13  ;;  %v2407_v24 = vsub.f32 %v7579_v30, %v7734_v13 }
 0x2bc   : > { %6351 = vrsqrt.f32 %v2434_v15  ;;  %v2408_v3 = vsub.f32 %v7566_v21, %v7734_v13  ;;  %v2409_v47 = vsub.f32 %v7573_v61, %v7734_v13  ;;  %v2410_v57 = vsub.f32 %v7593_v25, %v7734_v13 }
 0x2bd   : > { %v2412_v29 = vsub.f32 %v7588_v9, %v7734_v13  ;;  %v2413_v42 = vsub.f32 %v7597_v16, %v7734_v13 }
 0x2c6   : > { %v6352_v1 = vpop.eup %6351 }
 0x2c7   : > { %v2464_v30 = vmul.f32 %v6352_v1, %v2430_v7  ;;  %v2465_v21 = vmul.f32 %v6352_v1, %v2431_v58  ;;  %v2436_v50 = vmul.f32 %v6352_v1, %v2402_v32  ;;  %v2437_v59 = vmul.f32 %v6352_v1, %v2403_v62 }
 0x2c8   : > { %v2438_v31 = vmul.f32 %v6352_v1, %v2404_v23  ;;  %v2439_v61 = vmul.f32 %v6352_v1, %v2405_v5  ;;  %v2440_v33 = vmul.f32 %v6352_v1, %v2406_v0  ;;  %v2441_v8 = vmul.f32 %v6352_v1, %v2407_v24 }
 0x2c9   : > { %v2502_v25 = vmul.f32 %v7797_v35, %v2464_v30  ;;  %v2503_v9 = vmul.f32 %v7797_v35, %v2465_v21  ;;  %v2442_v36 = vmul.f32 %v6352_v1, %v2408_v3  ;;  %v2443_v4 = vmul.f32 %v6352_v1, %v2409_v47 }
 0x2ca   : > { %v2444_v16 = vmul.f32 %v6352_v1, %v2410_v57  ;;  %v2445_v6 = vmul.f32 %v6352_v1, %v2411_v49  ;;  %v2446_v27 = vmul.f32 %v6352_v1, %v2412_v29  ;;  %v2447_v46 = vmul.f32 %v6352_v1, %v2413_v42 }
 0x2cb   : > { %v2540_v34 = vadd.f32 %v7810_v19, %v2502_v25  ;;  %v2541_v43 = vadd.f32 %v7810_v19, %v2503_v9  ;;  %v2448_v56 = vmul.f32 %v6352_v1, %v2414_v63  ;;  %v2449_v51 = vmul.f32 %v6352_v1, %v2415_v18 }
 0x2cc   : > { %v2450_v13 = vmul.f32 %v6352_v1, %v2416_v11  ;;  %v2451_v10 = vmul.f32 %v6352_v1, %v2417_v54  ;;  %v2452_v12 = vmul.f32 %v6352_v1, %v2418_v2  ;;  %v2453_v60 = vmul.f32 %v6352_v1, %v2419_v20 }
 0x2cd   : > { %v2572_v7 = vmax.f32 %v2540_v34, 0.0  ;;  %v2573_v58 = vmax.f32 %v2541_v43, 0.0  ;;  %v2454_v45 = vmul.f32 %v6352_v1, %v2420_v39  ;;  %v2455_v44 = vmul.f32 %v6352_v1, %v2421_v17 }
 0x2ce   : > { %v2456_v15 = vmul.f32 %v6352_v1, %v2422_v22  ;;  %v2457_v55 = vmul.f32 %v6352_v1, %v2423_v14  ;;  %v2458_v32 = vmul.f32 %v6352_v1, %v2424_v52  ;;  %v2459_v49 = vmul.f32 %v6352_v1, %v2425_v41 }
 0x2cf   : > { %v7816_v62 = vpack.c.bf16 %v2573_v58, %v2572_v7  ;;  %v2460_v23 = vmul.f32 %v6352_v1, %v2426_v26  ;;  %v2461_v5 = vmul.f32 %v6352_v1, %v2427_v37  ;;  %v2462_v0 = vmul.f32 %v6352_v1, %v2428_v40 }
 0x2d0   : > { %v2463_v24 = vmul.f32 %v6352_v1, %v2429_v28  ;;  %v2466_v63 = vmul.f32 %v6352_v1, %v2432_v38  ;;  %v2467_v18 = vmul.f32 %v6352_v1, %v2433_v53  ;;  %v2474_v11 = vmul.f32 %v7797_v35, %v2436_v50 }
 0x2d1   : > { %v2475_v54 = vmul.f32 %v7797_v35, %v2437_v59  ;;  %v2476_v2 = vmul.f32 %v7797_v35, %v2438_v31  ;;  %v2477_v20 = vmul.f32 %v7797_v35, %v2439_v61  ;;  %v2478_v39 = vmul.f32 %v7797_v35, %v2440_v33 }
 0x2d2   : > { %v2479_v17 = vmul.f32 %v7797_v35, %v2441_v8  ;;  %v2480_v22 = vmul.f32 %v7797_v35, %v2442_v36  ;;  %v2481_v14 = vmul.f32 %v7797_v35, %v2443_v4  ;;  %v2482_v52 = vmul.f32 %v7797_v35, %v2444_v16 }
 0x2d3   : > { %v2483_v41 = vmul.f32 %v7797_v35, %v2445_v6  ;;  %v2484_v26 = vmul.f32 %v7797_v35, %v2446_v27  ;;  %v2485_v37 = vmul.f32 %v7797_v35, %v2447_v46  ;;  %v2486_v40 = vmul.f32 %v7797_v35, %v2448_v56 }
 0x2d4   : > { %v2487_v28 = vmul.f32 %v7797_v35, %v2449_v51  ;;  %v2488_v38 = vmul.f32 %v7797_v35, %v2450_v13  ;;  %v2489_v53 = vmul.f32 %v7797_v35, %v2451_v10  ;;  %v2492_v3 = vmul.f32 %v7797_v35, %v2454_v45 }
 0x2d5   : > { %v2493_v1 = vmul.f32 %v7797_v35, %v2455_v44  ;;  %v2494_v47 = vmul.f32 %v7797_v35, %v2456_v15  ;;  %v2495_v57 = vmul.f32 %v7797_v35, %v2457_v55  ;;  %v2496_v29 = vmul.f32 %v7797_v35, %v2458_v32 }
 0x2d6   : > { %v2497_v42 = vmul.f32 %v7797_v35, %v2459_v49  ;;  %v2498_v30 = vmul.f32 %v7797_v35, %v2460_v23  ;;  %v2499_v21 = vmul.f32 %v7797_v35, %v2461_v5  ;;  %v2500_v50 = vmul.f32 %v7797_v35, %v2462_v0 }
 0x2d7   : > { %v2501_v59 = vmul.f32 %v7797_v35, %v2463_v24  ;;  %v2504_v31 = vmul.f32 %v7797_v35, %v2466_v63  ;;  %v2505_v61 = vmul.f32 %v7797_v35, %v2467_v18  ;;  %v2490_v33 = vmul.f32 %v7797_v35, %v2452_v12 }
 0x2d8   : > { %v2491_v8 = vmul.f32 %v7797_v35, %v2453_v60  ;;  %v7849_v25 = vadd.f32 %v7810_v19, %v2474_v11  ;;  %v7852_v9 = vadd.f32 %v7810_v19, %v2475_v54  ;;  %v2514_v36 = vadd.f32 %v7810_v19, %v2476_v2 }
 0x2d9   : > { %v2515_v4 = vadd.f32 %v7810_v19, %v2477_v20  ;;  %v2516_v16 = vadd.f32 %v7810_v19, %v2478_v39  ;;  %v2517_v6 = vadd.f32 %v7810_v19, %v2479_v17  ;;  %v2518_v27 = vadd.f32 %v7810_v19, %v2480_v22 }
 0x2da   : > { %v2519_v46 = vadd.f32 %v7810_v19, %v2481_v14  ;;  %v2520_v35 = vadd.f32 %v7810_v19, %v2482_v52  ;;  %v2521_v34 = vadd.f32 %v7810_v19, %v2483_v41  ;;  %v2522_v43 = vadd.f32 %v7810_v19, %v2484_v26 }
 0x2db   : > { %v2523_v56 = vadd.f32 %v7810_v19, %v2485_v37  ;;  %v2524_v51 = vadd.f32 %v7810_v19, %v2486_v40  ;;  %v2525_v13 = vadd.f32 %v7810_v19, %v2487_v28  ;;  %v2526_v10 = vadd.f32 %v7810_v19, %v2488_v38 }
 0x2dc   : > { %v2527_v12 = vadd.f32 %v7810_v19, %v2489_v53  ;;  %v2530_v60 = vadd.f32 %v7810_v19, %v2492_v3  ;;  %v2531_v7 = vadd.f32 %v7810_v19, %v2493_v1  ;;  %v2532_v58 = vadd.f32 %v7810_v19, %v2494_v47 }
 0x2dd   : > { %v2533_v45 = vadd.f32 %v7810_v19, %v2495_v57  ;;  %v2534_v44 = vadd.f32 %v7810_v19, %v2496_v29  ;;  %v2535_v15 = vadd.f32 %v7810_v19, %v2497_v42  ;;  %v2536_v55 = vadd.f32 %v7810_v19, %v2498_v30 }
 0x2de   : > { %v2537_v32 = vadd.f32 %v7810_v19, %v2499_v21  ;;  %v2538_v49 = vadd.f32 %v7810_v19, %v2500_v50  ;;  %v2539_v23 = vadd.f32 %v7810_v19, %v2501_v59  ;;  %v2528_v5 = vadd.f32 %v7810_v19, %v2490_v33 }
 0x2df   : > { %v2529_v0 = vadd.f32 %v7810_v19, %v2491_v8  ;;  %v7881_v24 = vadd.f32 %v7810_v19, %v2504_v31  ;;  %v7884_v63 = vadd.f32 %v7810_v19, %v2505_v61  ;;  %v2546_v18 = vmax.f32 %v2514_v36, 0.0 }
 0x2e0   : > { %v2547_v11 = vmax.f32 %v2515_v4, 0.0  ;;  %v2548_v54 = vmax.f32 %v2516_v16, 0.0  ;;  %v2549_v2 = vmax.f32 %v2517_v6, 0.0  ;;  %v2550_v20 = vmax.f32 %v2518_v27, 0.0 }
 0x2e1   : > { %v2551_v39 = vmax.f32 %v2519_v46, 0.0  ;;  %v2552_v17 = vmax.f32 %v2520_v35, 0.0  ;;  %v2553_v22 = vmax.f32 %v2521_v34, 0.0  ;;  %v2554_v14 = vmax.f32 %v2522_v43, 0.0 }
 0x2e2   : > { %v2555_v52 = vmax.f32 %v2523_v56, 0.0  ;;  %v2556_v41 = vmax.f32 %v2524_v51, 0.0  ;;  %v2557_v26 = vmax.f32 %v2525_v13, 0.0  ;;  %v2558_v37 = vmax.f32 %v2526_v10, 0.0 }
 0x2e3   : > { %v2559_v40 = vmax.f32 %v2527_v12, 0.0  ;;  %v2560_v28 = vmax.f32 %v2528_v5, 0.0  ;;  %v2561_v38 = vmax.f32 %v2529_v0, 0.0  ;;  %v2562_v53 = vmax.f32 %v2530_v60, 0.0 }
 0x2e4   : > { %v2563_v3 = vmax.f32 %v2531_v7, 0.0  ;;  %v2564_v19 = vmax.f32 %v2532_v58, 0.0  ;;  %v2565_v1 = vmax.f32 %v2533_v45, 0.0  ;;  %v2566_v47 = vmax.f32 %v2534_v44, 0.0 }
 0x2e5   : > { %v2567_v57 = vmax.f32 %v2535_v15, 0.0  ;;  %v2568_v29 = vmax.f32 %v2536_v55, 0.0  ;;  %v2569_v42 = vmax.f32 %v2537_v32, 0.0  ;;  %v2544_v30 = vmax.f32 %v7849_v25, 0.0 }
 0x2e6   : > { %v2545_v21 = vmax.f32 %v7852_v9, 0.0  ;;  %v2570_v50 = vmax.f32 %v2538_v49, 0.0  ;;  %v2571_v59 = vmax.f32 %v2539_v23, 0.0  ;;  %v2723_v31 = vpack.c.bf16 %v2547_v11, %v2546_v18  ;;  %v6322_v18 = vld [vmem:[#allocation7 + $0x180] sm:$0xff]  }
 0x2e7   : > { %v7888_v61 = vpack.c.bf16 %v2549_v2, %v2548_v54  ;;  %v7890_v33 = vpack.c.bf16 %v2551_v39, %v2550_v20  ;;  %v7892_v8 = vpack.c.bf16 %v2553_v22, %v2552_v17  ;;  %v7894_v36 = vpack.c.bf16 %v2555_v52, %v2554_v14  ;;  %v6324_v20 = vld [vmem:[#allocation7 + $0x1c8] sm:$0xff]  }
 0x2e8   : > { %v7896_v4 = vpack.c.bf16 %v2557_v26, %v2556_v41  ;;  %v7898_v16 = vpack.c.bf16 %v2559_v40, %v2558_v37  ;;  %v7900_v6 = vpack.c.bf16 %v2561_v38, %v2560_v28  ;;  %v7902_v25 = vpack.c.bf16 %v2563_v3, %v2562_v53  ;;  %v6326_v28 = vld [vmem:[#allocation7 + $0x188] sm:$0xff]   ;;  %v6312_v38 = vld [vmem:[#allocation7 + $0x100] sm:$0xff]  }
 0x2e9   : > { %v7904_v9 = vpack.c.bf16 %v2565_v1, %v2564_v19  ;;  %v7906_v27 = vpack.c.bf16 %v2567_v57, %v2566_v47  ;;  %v7908_v46 = vpack.c.bf16 %v2569_v42, %v2568_v29  ;;  %v7910_v35 = vpack.c.bf16 %v2571_v59, %v2570_v50  ;;  %v6313_v29 = vld [vmem:[#allocation7 + $0x148] sm:$0xff]   ;;  %v6328_v42 = vld [vmem:[#allocation7 + $0x1d0] sm:$0xff]  }
 0x2ea   : > { %v2739_v34 = vshrl.u32 %v2723_v31, 16  ;;  %v2803_v43 = vshll.u32 %v2723_v31, 16  ;;  %v2722_v56 = vpack.c.bf16 %v2545_v21, %v2544_v30  ;;  %v2745_v60 = vshrl.u32 %v7888_v61, 16  ;;  %v6330_v50 = vld [vmem:[#allocation7 + $0x190] sm:$0xff]  }
 0x2eb   : > { %v2811_v52 = vshll.u32 %v7888_v61, 16  ;;  %v2748_v3 = vshrl.u32 %v7890_v33, 16  ;;  %v6314_v61 = vld [vmem:[#allocation7 + $0x108] sm:$0xff]  }
 0x2ec   : > { %v2742_v51 = vshrl.u32 %v2722_v56, 16  ;;  %v2807_v13 = vshll.u32 %v2722_v56, 16  ;;  %v2802_v10 = vrot.slane %v2739_v34, 7  ;;  %v2898_v12 = vrot.slane %v2803_v43, 7  ;;  %v6315_v56 = vld [vmem:[#allocation7 + $0x150] sm:$0xff]  }
 0x2ed   : > { %v2810_v2 = vrot.slane %v2745_v60, 7  ;;  %v2814_v31 = vrot.slane %v2748_v3, 7 }
 0x2ee   : > { %v2806_v7 = vrot.slane %v2742_v51, 7  ;;  %v2805_v58 = vor.u32 %v2803_v43, %v2802_v10  ;;  %v2946_v45 = vsel %vm6789_vm2, %v2802_v10, %v2898_v12  ;;  %v2899_v44 = vrot.slane %v2807_v13, 7  ;;  %v6332_v12 = vld [vmem:[#allocation7 + $0x198] sm:$0xff]  }
 0x2ef   : > { %v3188_v23 = vrot.slane %v2946_v45, 1  ;;  %v2970_v0 = vshll.u32 %v2946_v45, 16  ;;  %v2813_v53 = vor.u32 %v2811_v52, %v2810_v2  ;;  %v6317_v45 = vld [vmem:[#allocation7 + $0x158] sm:$0xff]  }
 0x2f0   : > { %v2809_v15 = vor.u32 %v2807_v13, %v2806_v7  ;;  %v7917_v55 = vsel %vm6789_vm2, %v2739_v34, %v2805_v58  ;;  %v2947_v32 = vsel %vm6789_vm2, %v2806_v7, %v2899_v44  ;;  %v6331_v34 = vld [vmem:[#allocation7 + $0x1d8] sm:$0xff]   ;;  %v2900_v13 = vrot.slane %v2811_v52, 7  ;;  %v6316_v58 = vld [vmem:[#allocation7 + $0x110] sm:$0xff]   ;;  %v6333_v44 = vld [vmem:[#allocation7 + $0x1e0] sm:$0xff]  }
 0x2f1   : > { %v3187_v49 = vrot.slane %v7917_v55, 1  ;;  %v2965_v5 = vshll.u32 %v7917_v55, 16  ;;  %v2963_v54 = vshrl.u32 %v7917_v55, 16  ;;  %v2982_v14 = vshll.u32 %v2947_v32, 16 }
 0x2f2   : > { %v2931_v11 = vsel %vm6789_vm2, %v2742_v51, %v2809_v15  ;;  %v2972_v26 = vrot.slane %v2970_v0, 1  ;;  %v3191_v21 = vrot.slane %v2947_v32, 1  ;;  %v7944_v59 = vsel %vm6789_vm2, %v2745_v60, %v2813_v53  ;;  %v6334_v32 = vld [vmem:[#allocation7 + $0x1a0] sm:$0xff]   ;;  %v6335_v0 = vld [vmem:[#allocation7 + $0x1e8] sm:$0xff]  }
 0x2f3   : > { %3891 = vmatprep.mubr.bf16.mxu0 %v2931_v11  ;;  %v7927_v39 = vsel %vm974_vm4, %v3187_v49, %v3188_v23  ;;  %v2967_v17 = vrot.slane %v2965_v5, 1  ;;  %v2977_v22 = vshll.u32 %v2931_v11, 16  ;;  %v2975_v37 = vshrl.u32 %v2931_v11, 16  ;;  %v6318_v5 = vld [vmem:[#allocation7 + $0x118] sm:$0xff]  }
 0x2f4   : > { %3892 = vmatmul.mubr.bf16.vlgmr.msra.gmra.mrb[160].mxu0 %v7927_v39  ;;  %v2984_v47 = vrot.slane %v2982_v14, 1  ;;  %v3190_v57 = vrot.slane %v2931_v11, 1  ;;  %v2815_v51 = vshll.u32 %v7890_v33, 16  ;;  %v2989_v10 = vshll.u32 %v7944_v59, 16  ;;  %v6337_v14 = vld [vmem:[#allocation7 + $0x1a8] sm:$0xff]  }
 0x2f5   : > { %3899 = vmatprep.mubr.bf16.mxu0 %v7917_v55  ;;  %v2968_v41 = vor.u32 %v2967_v17, %v2963_v54  ;;  %v2979_v40 = vrot.slane %v2977_v22, 1  ;;  %5903 = vmatpush3.bf16.msra.mxu0 %v6322_v18  ;;  %v2751_v7 = vshrl.u32 %v7892_v8, 16  ;;  %v2948_v15 = vsel %vm6789_vm2, %v2810_v2, %v2900_v13  ;;  %v6319_v2 = vld [vmem:[#allocation7 + $0x160] sm:$0xff]  }
 0x2f6   : > { %5904 = vmatprep.subr.bf16.mxu0 %v6324_v20  ;;  %v7947_v43 = vsel %vm974_vm4, %v3190_v57, %v3191_v21  ;;  %v2817_v60 = vor.u32 %v2815_v51, %v2814_v31  ;;  %v2991_v33 = vrot.slane %v2989_v10, 1  ;;  %v2987_v18 = vshrl.u32 %v7944_v59, 16  ;;  %v6341_v21 = vld [vmem:[#allocation7 + $0x1f8] sm:$0xff]  }
 0x2f7   : > { %v7934_v19 = vsel %vm748_vm3, %v2968_v41, %v2972_v26  ;;  %v2980_v1 = vor.u32 %v2979_v40, %v2975_v37  ;;  %v7961_v23 = vrot.slane %v2751_v7, 7  ;;  %v2994_v54 = vshll.u32 %v2948_v15, 16  ;;  %v6321_v26 = vld [vmem:[#allocation7 + $0x120] sm:$0xff]  }
 0x2f8   : > { %3730 = vmatprep.mubr.bf16.mxu1 %v7934_v19  ;;  %v7959_v49 = vsel %vm6789_vm2, %v2748_v3, %v2817_v60  ;;  %v2901_v20 = vrot.slane %v2815_v51, 7  ;;  %v2992_v17 = vor.u32 %v2991_v33, %v2987_v18  ;;  %v2754_v41 = vshrl.u32 %v7894_v36, 16 }
 0x2f9   : > { %3731 = vmatmul.mubr.bf16.vlgmr.msra.gmra.mrb[128].mxu1 %v7917_v55  ;;  %v7939_v30 = vsel %vm748_vm3, %v2980_v1, %v2984_v47  ;;  %5905 = vmatpush3.bf16.msra.mxu0 %v6326_v28  ;;  %v3001_v22 = vshll.u32 %v7959_v49, 16  ;;  %v2996_v37 = vrot.slane %v2994_v54, 1  ;;  %v3193_v40 = vrot.slane %v7944_v59, 1  ;;  %v6339_v28 = vld [vmem:[#allocation7 + $0x1f0] sm:$0xff]   ;;  %v6338_v54 = vld [vmem:[#allocation7 + $0x138] sm:$0xff]  }
 0x2fa   : > { %3738 = vmatprep.mubr.bf16.mxu1 %v7939_v30  ;;  %5791 = vmatpush3.bf16.msra.mxu1 %v6312_v38  ;;  %v2949_v38 = vsel %vm6789_vm2, %v2814_v31, %v2901_v20  ;;  %v3194_v3 = vrot.slane %v2948_v15, 1  ;;  %v6340_v47 = vld [vmem:[#allocation7 + $0x1b0] sm:$0xff]   ;;  %v2999_v31 = vshrl.u32 %v7959_v49, 16  ;;  %v6336_v15 = vld [vmem:[#allocation7 + $0x178] sm:$0xff]   ;;  %v8008_v20 = vld [vmem:[#allocation7 + $0x200] sm:$0xff]  }
 0x2fb   : > { %5792 = vmatprep.subr.bf16.mxu1 %v6313_v29  ;;  %5906 = vmatprep.subr.bf16.mxu0 %v6328_v42  ;;  %v7975_v53 = vsel %vm748_vm3, %v2992_v17, %v2996_v37  ;;  %v3003_v1 = vrot.slane %v3001_v22, 1  ;;  %v2822_v29 = vrot.slane %v2754_v41, 7  ;;  %v6325_v42 = vld [vmem:[#allocation7 + $0x128] sm:$0xff]   ;;  %v2827_v17 = vshll.u32 %v7896_v4, 16 }
 0x2fc   : > { %3900 = vmatmul.mubr.bf16.gmra.mrb[164].mxu0 %v7947_v43 }
 0x2fd   : > { %3907 = vmatprep.mubr.bf16.mxu0 %v7944_v59  ;;  %5907 = vmatpush3.bf16.msra.mxu0 %v6330_v50  ;;  %v7983_v50 = vsel %vm974_vm4, %v3193_v40, %v3194_v3  ;;  %v3004_v13 = vor.u32 %v3003_v1, %v2999_v31  ;;  %v2904_v31 = vrot.slane %v2827_v17, 7 }
 0x2fe   : > { %5793 = vmatpush3.bf16.msra.mxu1 %v6314_v61  ;;  %5908 = vmatprep.subr.bf16.mxu0 %v6331_v34  ;;  %v3006_v61 = vshll.u32 %v2949_v38, 16  ;;  %v6327_v34 = vld [vmem:[#allocation7 + $0x170] sm:$0xff]  }
 0x2ff   : > { %5794 = vmatprep.subr.bf16.mxu1 %v6315_v56  ;;  %v2823_v56 = vshll.u32 %v7894_v36, 16 }
 0x301   : > { %3739 = vmatmul.mubr.bf16.gmra.mrb[132].mxu1 %v2931_v11  ;;  %5909 = vmatpush3.bf16.msra.mxu0 %v6332_v12  ;;  %v2819_v11 = vshll.u32 %v7892_v8, 16  ;;  %v6323_v8 = vld [vmem:[#allocation7 + $0x168] sm:$0xff]   ;;  %v6342_v12 = vld [vmem:[#allocation7 + $0x1b8] sm:$0xff]   ;;  %v2825_v60 = vor.u32 %v2823_v56, %v2822_v29  ;;  %v2903_v22 = vrot.slane %v2823_v56, 7 }
 0x302   : > { %3746 = vmatprep.mubr.bf16.mxu1 %v7934_v19  ;;  %5795 = vmatpush3.bf16.msra.mxu1 %v6316_v58  ;;  %v6329_v58 = vld [vmem:[#allocation7 + $0x130] sm:$0xff]  }
 0x303   : > { %5796 = vmatprep.subr.bf16.mxu1 %v6317_v45  ;;  %5910 = vmatprep.subr.bf16.mxu0 %v6333_v44  ;;  %v2821_v52 = vor.u32 %v2819_v11, %v7961_v23  ;;  %v2902_v51 = vrot.slane %v2819_v11, 7  ;;  %v3008_v45 = vrot.slane %v3006_v61, 1  ;;  %v3196_v44 = vrot.slane %v7959_v49, 1 }
 0x304   : > { %3908 = vmatmul.mubr.bf16.gmra.mrb[168].mxu0 %v7927_v39 }
 0x305   : > { %3915 = vmatprep.mubr.bf16.mxu0 %v7959_v49  ;;  %5911 = vmatpush3.bf16.msra.mxu0 %v6334_v32  ;;  %v7980_v57 = vsel %vm6789_vm2, %v2751_v7, %v2821_v52  ;;  %v2757_v7 = vshrl.u32 %v7896_v4, 16  ;;  %v2950_v36 = vsel %vm6789_vm2, %v7961_v23, %v2902_v51  ;;  %v7997_v33 = vsel %vm748_vm3, %v3004_v13, %v3008_v45 }
 0x306   : > { %5797 = vmatpush3.bf16.msra.mxu1 %v6318_v5  ;;  %5912 = vmatprep.subr.bf16.mxu0 %v6335_v0  ;;  %v3013_v10 = vshll.u32 %v7980_v57, 16  ;;  %v3197_v32 = vrot.slane %v2949_v38, 1  ;;  %v8002_v0 = vsel %vm6789_vm2, %v2754_v41, %v2825_v60  ;;  %v3011_v23 = vshrl.u32 %v7980_v57, 16 }
 0x307   : > { %5798 = vmatprep.subr.bf16.mxu1 %v6319_v2  ;;  %v2826_v18 = vrot.slane %v2757_v7, 7  ;;  %v3018_v11 = vshll.u32 %v2950_v36, 16  ;;  %v3025_v52 = vshll.u32 %v8002_v0, 16  ;;  %v3199_v40 = vrot.slane %v7980_v57, 1 }
 0x308   : > { %v3015_v5 = vrot.slane %v3013_v10, 1  ;;  %v8005_v2 = vsel %vm974_vm4, %v3196_v44, %v3197_v32  ;;  %v2763_v51 = vshrl.u32 %v7900_v6, 16  ;;  %v3202_v10 = vrot.slane %v8002_v0, 1 }
 0x309   : > { %3747 = vmatmul.mubr.bf16.gmra.mrb[136].mxu1 %v7917_v55  ;;  %5913 = vmatpush3.bf16.msra.mxu0 %v6337_v14  ;;  %v2829_v41 = vor.u32 %v2827_v17, %v2826_v18  ;;  %v3020_v37 = vrot.slane %v3018_v11, 1  ;;  %v3027_v38 = vrot.slane %v3025_v52, 1  ;;  %v2952_v60 = vsel %vm6789_vm2, %v2826_v18, %v2904_v31 }
 0x30a   : > { %3754 = vmatprep.mubr.bf16.mxu1 %v7975_v53  ;;  %5799 = vmatpush3.bf16.msra.mxu1 %v6321_v26  ;;  %v3016_v14 = vor.u32 %v3015_v5, %v3011_v23  ;;  %v2760_v26 = vshrl.u32 %v7898_v16, 16  ;;  %v2835_v32 = vshll.u32 %v7900_v6, 16  ;;  %v2766_v17 = vshrl.u32 %v7902_v25, 16 }
 0x30b   : > { %5800 = vmatprep.subr.bf16.mxu1 %v6323_v8  ;;  %5914 = vmatprep.subr.bf16.mxu0 %v6339_v28  ;;  %v2951_v8 = vsel %vm6789_vm2, %v2822_v29, %v2903_v22  ;;  %v3200_v28 = vrot.slane %v2950_v36, 1  ;;  %v8026_v3 = vsel %vm6789_vm2, %v2757_v7, %v2829_v41  ;;  %v2575_v7 = vmax.f32 %v7884_v63, 0.0 }
 0x30c   : > { %3916 = vmatmul.mubr.bf16.gmra.mrb[172].mxu0 %v7983_v50  ;;  %v8021_v4 = vsel %vm748_vm3, %v3016_v14, %v3020_v37  ;;  %v2830_v1 = vrot.slane %v2760_v26, 7  ;;  %v3030_v29 = vshll.u32 %v2951_v8, 16  ;;  %v3035_v36 = vshrl.u32 %v8026_v3, 16 }
 0x30d   : > { %3923 = vmatprep.mubr.bf16.mxu0 %v7980_v57  ;;  %5915 = vmatpush3.bf16.msra.mxu0 %v6340_v47  ;;  %v8029_v47 = vsel %vm974_vm4, %v3199_v40, %v3200_v28  ;;  %v3042_v63 = vshll.u32 %v2952_v60, 16  ;;  %v3205_v14 = vrot.slane %v8026_v3, 1 }
 0x30e   : > { %5801 = vmatpush3.bf16.msra.mxu1 %v6325_v42  ;;  %5916 = vmatprep.subr.bf16.mxu0 %v6341_v21  ;;  %v3023_v42 = vshrl.u32 %v8002_v0, 16  ;;  %v2831_v21 = vshll.u32 %v7898_v16, 16  ;;  %v3032_v13 = vrot.slane %v3030_v29, 1 }
 0x30f   : > { %5802 = vmatprep.subr.bf16.mxu1 %v6327_v34  ;;  %v3037_v34 = vshll.u32 %v8026_v3, 16  ;;  %v3044_v22 = vrot.slane %v3042_v63, 1 }
 0x310   : > { %v3028_v61 = vor.u32 %v3027_v38, %v3023_v42  ;;  %v2833_v56 = vor.u32 %v2831_v21, %v2830_v1  ;;  %v2905_v5 = vrot.slane %v2831_v21, 7 }
 0x311   : > { %3755 = vmatmul.mubr.bf16.gmra.mrb[140].mxu1 %v7944_v59  ;;  %5917 = vmatpush3.bf16.msra.mxu0 %v6342_v12  ;;  %v2574_v12 = vmax.f32 %v7881_v24, 0.0  ;;  %v3039_v45 = vrot.slane %v3037_v34, 1  ;;  %v2906_v34 = vrot.slane %v2835_v32, 7 }
 0x312   : > { %3762 = vmatprep.mubr.bf16.mxu1 %v7997_v33  ;;  %5803 = vmatpush3.bf16.msra.mxu1 %v6329_v58  ;;  %v8044_v16 = vsel %vm748_vm3, %v3028_v61, %v3032_v13  ;;  %v3203_v58 = vrot.slane %v2951_v8, 1  ;;  %v8049_v44 = vsel %vm6789_vm2, %v2760_v26, %v2833_v56  ;;  %v3206_v26 = vrot.slane %v2952_v60, 1 }
 0x313   : > { %5804 = vmatprep.subr.bf16.mxu1 %v6336_v15  ;;  %v2834_v15 = vrot.slane %v2763_v51, 7  ;;  %v3040_v18 = vor.u32 %v3039_v45, %v3035_v36  ;;  %v8059_v23 = vpack.c.bf16 %v2575_v7, %v2574_v12  ;;  %v2953_v6 = vsel %vm6789_vm2, %v2830_v1, %v2905_v5 }
 0x314   : > { %3924 = vmatmul.mubr.bf16.gmra.mrb[176].mxu0 %v8005_v2  ;;  %v8052_v24 = vsel %vm974_vm4, %v3202_v10, %v3203_v58  ;;  %v2838_v1 = vrot.slane %v2766_v17, 7  ;;  %v8083_v42 = vsel %vm974_vm4, %v3205_v14, %v3206_v26  ;;  %v3047_v29 = vshrl.u32 %v8049_v44, 16 }
 0x315   : > { %3931 = vmatprep.mubr.bf16.mxu0 %v8002_v0  ;;  %v2837_v11 = vor.u32 %v2835_v32, %v2834_v15  ;;  %v2784_v52 = vshrl.u32 %v8059_v23, 16  ;;  %v2863_v41 = vshll.u32 %v8059_v23, 16  ;;  %v8069_v37 = vsel %vm748_vm3, %v3040_v18, %v3044_v22 }
 0x316   : > { %5805 = vmatpush3.bf16.msra.mxu1 %v6338_v54  ;;  %v3049_v54 = vshll.u32 %v8049_v44, 16  ;;  %v3054_v21 = vshll.u32 %v2953_v6, 16  ;;  %v2839_v61 = vshll.u32 %v7902_v25, 16  ;;  %v2769_v10 = vshrl.u32 %v7904_v9, 16 }
 0x317   : > { %6086 = vmatprep.subr.bf16.mxu1 %v8008_v20  ;;  %v8073_v8 = vrot.slane %v2784_v52, 7  ;;  %v2913_v28 = vrot.slane %v2863_v41, 7  ;;  %v8080_v38 = vsel %vm6789_vm2, %v2763_v51, %v2837_v11  ;;  %v3208_v60 = vrot.slane %v8049_v44, 1 }
 0x318   : > { %v3051_v40 = vrot.slane %v3049_v54, 1  ;;  %v3061_v51 = vshll.u32 %v8080_v38, 16  ;;  %v2841_v13 = vor.u32 %v2839_v61, %v2838_v1  ;;  %v3056_v12 = vrot.slane %v3054_v21, 1 }
 0x319   : > { %3763 = vmatmul.mubr.bf16.gmra.mrb[144].mxu1 %v7959_v49  ;;  %v8089_v31 = vsel %vm6789_vm2, %v8073_v8, %v2913_v28  ;;  %v2954_v7 = vsel %vm6789_vm2, %v2834_v15, %v2906_v34  ;;  %v3209_v25 = vrot.slane %v2953_v6, 1  ;;  %v2842_v63 = vrot.slane %v2769_v10, 7 }
 0x31a   : > { %3770 = vmatprep.mubr.bf16.mxu1 %v8021_v4  ;;  %v3052_v56 = vor.u32 %v3051_v40, %v3047_v29  ;;  %v3063_v45 = vrot.slane %v3061_v51, 1  ;;  %v8106_v36 = vsel %vm6789_vm2, %v2766_v17, %v2841_v13  ;;  %v3059_v5 = vshrl.u32 %v8080_v38, 16 }
 0x31b   : > { %v8109_v32 = vsel %vm974_vm4, %v3208_v60, %v3209_v25  ;;  %v3066_v15 = vshll.u32 %v2954_v7, 16  ;;  %v2843_v18 = vshll.u32 %v7904_v9, 16  ;;  %v2907_v54 = vrot.slane %v2839_v61, 7 }
 0x31c   : > { %3932 = vmatmul.mubr.bf16.gmra.mrb[180].mxu0 %v8029_v47  ;;  %v8101_v58 = vsel %vm748_vm3, %v3052_v56, %v3056_v12  ;;  %v3064_v11 = vor.u32 %v3063_v45, %v3059_v5  ;;  %v3073_v22 = vshll.u32 %v8106_v36, 16  ;;  %v2772_v17 = vshrl.u32 %v7906_v27, 16 }
 0x31d   : > { %3939 = vmatprep.mubr.bf16.mxu0 %v8026_v3  ;;  %v2845_v14 = vor.u32 %v2843_v18, %v2842_v63  ;;  %v3068_v26 = vrot.slane %v3066_v15, 1  ;;  %v3211_v6 = vrot.slane %v8080_v38, 1  ;;  %v2955_v40 = vsel %vm6789_vm2, %v2838_v1, %v2907_v54 }
 0x31e   : > { %v3212_v9 = vrot.slane %v2954_v7, 1  ;;  %v3075_v29 = vrot.slane %v3073_v22, 1  ;;  %v2846_v61 = vrot.slane %v2772_v17, 7  ;;  %v3071_v56 = vshrl.u32 %v8106_v36, 16 }
 0x31f   : > { %v8122_v28 = vsel %vm748_vm3, %v3064_v11, %v3068_v26  ;;  %v8127_v21 = vsel %vm6789_vm2, %v2769_v10, %v2845_v14  ;;  %v3078_v1 = vshll.u32 %v2955_v40, 16  ;;  %v2847_v51 = vshll.u32 %v7906_v27, 16 }
 0x320   : > { %v8130_v34 = vsel %vm974_vm4, %v3211_v6, %v3212_v9  ;;  %v2908_v13 = vrot.slane %v2843_v18, 7  ;;  %v3076_v12 = vor.u32 %v3075_v29, %v3071_v56  ;;  %v3085_v60 = vshll.u32 %v8127_v21, 16 }
 0x321   : > { %3771 = vmatmul.mubr.bf16.gmra.mrb[148].mxu1 %v7980_v57  ;;  %v2849_v7 = vor.u32 %v2847_v51, %v2846_v61  ;;  %v2775_v10 = vshrl.u32 %v7908_v46, 16  ;;  %v3080_v25 = vrot.slane %v3078_v1, 1  ;;  %v3214_v45 = vrot.slane %v8106_v36, 1 }
 0x322   : > { %3778 = vmatprep.mubr.bf16.mxu1 %v8044_v16  ;;  %v2956_v5 = vsel %vm6789_vm2, %v2842_v63, %v2908_v13  ;;  %v3215_v27 = vrot.slane %v2955_v40, 1  ;;  %v3087_v18 = vrot.slane %v3085_v60, 1  ;;  %v3083_v14 = vshrl.u32 %v8127_v21, 16 }
 0x323   : > { %v8143_v15 = vsel %vm748_vm3, %v3076_v12, %v3080_v25  ;;  %v8148_v54 = vsel %vm6789_vm2, %v2772_v17, %v2849_v7  ;;  %v2850_v11 = vrot.slane %v2775_v10, 7  ;;  %v3090_v63 = vshll.u32 %v2956_v5, 16 }
 0x324   : > { %3940 = vmatmul.mubr.bf16.gmra.mrb[184].mxu0 %v8052_v24  ;;  %v8151_v22 = vsel %vm974_vm4, %v3214_v45, %v3215_v27  ;;  %v2851_v26 = vshll.u32 %v7908_v46, 16  ;;  %v2909_v6 = vrot.slane %v2847_v51, 7  ;;  %v3088_v40 = vor.u32 %v3087_v18, %v3083_v14 }
 0x325   : > { %3947 = vmatprep.mubr.bf16.mxu0 %v8049_v44  ;;  %v3097_v9 = vshll.u32 %v8148_v54, 16  ;;  %v2778_v17 = vshrl.u32 %v7910_v35, 16  ;;  %v3092_v56 = vrot.slane %v3090_v63, 1  ;;  %v3217_v1 = vrot.slane %v8127_v21, 1 }
 0x326   : > { %v2853_v29 = vor.u32 %v2851_v26, %v2850_v11  ;;  %v2957_v13 = vsel %vm6789_vm2, %v2846_v61, %v2909_v6  ;;  %v3218_v46 = vrot.slane %v2956_v5, 1  ;;  %v3095_v45 = vshrl.u32 %v8148_v54, 16 }
 0x327   : > { %v8164_v12 = vsel %vm748_vm3, %v3088_v40, %v3092_v56  ;;  %v3099_v51 = vrot.slane %v3097_v9, 1  ;;  %v2854_v7 = vrot.slane %v2778_v17, 7  ;;  %v3102_v61 = vshll.u32 %v2957_v13, 16 }
 0x328   : > { %v8169_v60 = vsel %vm6789_vm2, %v2775_v10, %v2853_v29  ;;  %v8172_v25 = vsel %vm974_vm4, %v3217_v1, %v3218_v46  ;;  %v2855_v27 = vshll.u32 %v7910_v35, 16  ;;  %v2910_v18 = vrot.slane %v2851_v26, 7 }
 0x329   : > { %3779 = vmatmul.mubr.bf16.gmra.mrb[152].mxu1 %v8002_v0  ;;  %v3100_v5 = vor.u32 %v3099_v51, %v3095_v45  ;;  %v3109_v14 = vshll.u32 %v8169_v60, 16  ;;  %v2781_v10 = vshrl.u32 %v7816_v62, 16  ;;  %v3104_v6 = vrot.slane %v3102_v61, 1 }
 0x32a   : > { %3786 = vmatprep.mubr.bf16.mxu1 %v8069_v37  ;;  %v2857_v63 = vor.u32 %v2855_v27, %v2854_v7  ;;  %v3220_v40 = vrot.slane %v8148_v54, 1  ;;  %v2958_v9 = vsel %vm6789_vm2, %v2850_v11, %v2910_v18  ;;  %v3221_v35 = vrot.slane %v2957_v13, 1 }
 0x32b   : > { %v8185_v29 = vsel %vm748_vm3, %v3100_v5, %v3104_v6  ;;  %v3111_v26 = vrot.slane %v3109_v14, 1  ;;  %v2858_v56 = vrot.slane %v2781_v10, 7  ;;  %v3107_v51 = vshrl.u32 %v8169_v60, 16 }
 0x32c   : > { %3948 = vmatmul.mubr.bf16.gmra.mrb[188].mxu0 %v8083_v42  ;;  %v8190_v1 = vsel %vm6789_vm2, %v2778_v17, %v2857_v63  ;;  %v8193_v46 = vsel %vm974_vm4, %v3220_v40, %v3221_v35  ;;  %v3114_v11 = vshll.u32 %v2958_v9, 16  ;;  %v2859_v45 = vshll.u32 %v7816_v62, 16 }
 0x32d   : > { %3955 = vmatprep.mubr.bf16.mxu0 %v8080_v38  ;;  %v2911_v61 = vrot.slane %v2855_v27, 7  ;;  %v3112_v13 = vor.u32 %v3111_v26, %v3107_v51  ;;  %v3121_v18 = vshll.u32 %v8190_v1, 16  ;;  %v3223_v17 = vrot.slane %v8169_v60, 1 }
 0x32e   : > { %v2861_v5 = vor.u32 %v2859_v45, %v2858_v56  ;;  %v3116_v14 = vrot.slane %v3114_v11, 1  ;;  %v3224_v62 = vrot.slane %v2958_v9, 1  ;;  %v3119_v26 = vshrl.u32 %v8190_v1, 16 }
 0x32f   : > { %v2959_v63 = vsel %vm6789_vm2, %v2854_v7, %v2911_v61  ;;  %v3123_v40 = vrot.slane %v3121_v18, 1  ;;  %v2912_v7 = vrot.slane %v2859_v45, 7 }
 0x330   : > { %v8205_v6 = vsel %vm748_vm3, %v3112_v13, %v3116_v14  ;;  %v8210_v27 = vsel %vm6789_vm2, %v2781_v10, %v2861_v5  ;;  %v8213_v35 = vsel %vm974_vm4, %v3223_v17, %v3224_v62  ;;  %v3126_v51 = vshll.u32 %v2959_v63, 16 }
 0x331   : > { %3787 = vmatmul.mubr.bf16.gmra.mrb[156].mxu1 %v8026_v3  ;;  %v3124_v11 = vor.u32 %v3123_v40, %v3119_v26  ;;  %v3133_v9 = vshll.u32 %v8210_v27, 16  ;;  %v3226_v13 = vrot.slane %v8190_v1, 1  ;;  %v2865_v10 = vor.u32 %v2863_v41, %v8073_v8 }
 0x332   : > { %3794 = vmatprep.mubr.bf16.mxu1 %v8101_v58  ;;  %v3128_v61 = vrot.slane %v3126_v51, 1  ;;  %v2960_v18 = vsel %vm6789_vm2, %v2858_v56, %v2912_v7  ;;  %v3227_v45 = vrot.slane %v2959_v63, 1  ;;  %v3131_v62 = vshrl.u32 %v8210_v27, 16 }
 0x333   : > { %v3135_v14 = vrot.slane %v3133_v9, 1  ;;  %v3138_v40 = vshll.u32 %v2960_v18, 16  ;;  %v8239_v41 = vsel %vm6789_vm2, %v2784_v52, %v2865_v10  ;;  %v3229_v63 = vrot.slane %v8210_v27, 1  ;;  %v6345_v52 = vld [vmem:[#allocation7 + $0x210] sm:$0xff]  }
 0x334   : > { %3956 = vmatmul.mubr.bf16.gmra.mrb[192].mxu0 %v8109_v32  ;;  %v8227_v5 = vsel %vm748_vm3, %v3124_v11, %v3128_v61  ;;  %v8231_v17 = vsel %vm974_vm4, %v3226_v13, %v3227_v45  ;;  %v3230_v51 = vrot.slane %v2960_v18, 1  ;;  %v3248_v18 = vshrl.u32 %v8239_v41, 16 }
 0x335   : > { %3963 = vmatprep.mubr.bf16.mxu0 %v8106_v36  ;;  %v3136_v8 = vor.u32 %v3135_v14, %v3131_v62  ;;  %v3140_v56 = vrot.slane %v3138_v40, 1  ;;  %v3255_v45 = vshll.u32 %v8089_v31, 16 }
 0x336   : > { %v8249_v23 = vsel %vm974_vm4, %v3229_v63, %v3230_v51 }
 0x337   : > { %v8245_v26 = vsel %vm748_vm3, %v3136_v8, %v3140_v56 }
 0x339   : > { %3795 = vmatmul.mubr.bf16.gmra.mrb[160].mxu1 %v8049_v44 }
 0x33a   : > { %3802 = vmatprep.mubr.bf16.mxu1 %v8122_v28 }
 0x33c   : > { %3964 = vmatmul.mubr.bf16.gmra.mrb[196].mxu0 %v8130_v34 }
 0x33d   : > { %3971 = vmatprep.mubr.bf16.mxu0 %v8127_v21 }
 0x341   : > { %3803 = vmatmul.mubr.bf16.gmra.mrb[164].mxu1 %v8080_v38 }
 0x342   : > { %3810 = vmatprep.mubr.bf16.mxu1 %v8143_v15 }
 0x344   : > { %3972 = vmatmul.mubr.bf16.gmra.mrb[200].mxu0 %v8151_v22 }
 0x345   : > { %3979 = vmatprep.mubr.bf16.mxu0 %v8148_v54 }
 0x349   : > { %3811 = vmatmul.mubr.bf16.gmra.mrb[168].mxu1 %v8106_v36 }
 0x34a   : > { %3818 = vmatprep.mubr.bf16.mxu1 %v8164_v12 }
 0x34c   : > { %3980 = vmatmul.mubr.bf16.gmra.mrb[204].mxu0 %v8172_v25 }
 0x34d   : > { %3987 = vmatprep.mubr.bf16.mxu0 %v8169_v60 }
 0x351   : > { %3819 = vmatmul.mubr.bf16.gmra.mrb[172].mxu1 %v8127_v21 }
 0x352   : > { %3826 = vmatprep.mubr.bf16.mxu1 %v8185_v29 }
 0x354   : > { %3988 = vmatmul.mubr.bf16.gmra.mrb[208].mxu0 %v8193_v46 }
 0x355   : > { %3995 = vmatprep.mubr.bf16.mxu0 %v8190_v1 }
 0x359   : > { %3827 = vmatmul.mubr.bf16.gmra.mrb[176].mxu1 %v8148_v54 }
 0x35a   : > { %3834 = vmatprep.mubr.bf16.mxu1 %v8205_v6 }
 0x35c   : > { %3996 = vmatmul.mubr.bf16.gmra.mrb[212].mxu0 %v8213_v35 }
 0x35d   : > { %4003 = vmatprep.mubr.bf16.mxu0 %v8210_v27 }
 0x361   : > { %3835 = vmatmul.mubr.bf16.gmra.mrb[180].mxu1 %v8169_v60 }
 0x362   : > { %3842 = vmatprep.mubr.bf16.mxu1 %v8227_v5 }
 0x364   : > { %4004 = vmatmul.mubr.bf16.gmra.mrb[216].mxu0 %v8231_v17 }
 0x365   : > { %4011 = vmatprep.mubr.bf16.mxu0 %v8239_v41 }
 0x369   : > { %3843 = vmatmul.mubr.bf16.gmra.mrb[184].mxu1 %v8190_v1 }
 0x36a   : > { %3850 = vmatprep.mubr.bf16.mxu1 %v8245_v26 }
 0x36c   : > { %4012 = vmatmul.mubr.bf16.gmra.mrb[220].mxu0 %v8249_v23 }
 0x36d   : > { %4213 = vmatprep.mubr.bf16.mxu0 %v7934_v19 }
 0x371   : > { %3851 = vmatmul.mubr.bf16.gmra.mrb[188].mxu1 %v8210_v27 }
 0x372   : > { %4052 = vmatprep.mubr.bf16.mxu1 %v7947_v43  ;;  %v6346_v43 = vld [vmem:[#allocation7 + $0x218] sm:$0xff]  }
 0x374   : > { %4214 = vmatmul.mubr.bf16.vlgmr.msra.gmra.mrb[224].mxu0 %v7917_v55  ;;  %v6347_v55 = vld [vmem:[#allocation7 + $0x220] sm:$0xff]  }
 0x375   : > { %4221 = vmatprep.mubr.bf16.mxu0 %v7975_v53 }
 0x379   : > { %4053 = vmatmul.mubr.bf16.vlgmr.msra.gmra.mrb[192].mxu1 %v7939_v30  ;;  %v6348_v30 = vld [vmem:[#allocation7 + $0x228] sm:$0xff]  }
 0x37a   : > { %4060 = vmatprep.mubr.bf16.mxu1 %v7927_v39  ;;  %6087 = vmatpush3.bf16.msra.mxu1 %v8008_v20 }
 0x37b   : > { %6088 = vmatprep.subr.bf16.mxu1 %v6344_v48 }
 0x37c   : > { %4222 = vmatmul.mubr.bf16.gmra.mrb[228].mxu0 %v7944_v59  ;;  %v6349_v59 = vld [vmem:[#allocation7 + $0x230] sm:$0xff]  }
 0x37d   : > { %4229 = vmatprep.mubr.bf16.mxu0 %v7997_v33 }
 0x37e   : > { %6089 = vmatpush3.bf16.msra.mxu1 %v6344_v48 }
 0x37f   : > { %6090 = vmatprep.subr.bf16.mxu1 %v6345_v52 }
 0x381   : > { %4061 = vmatmul.mubr.bf16.gmra.mrb[196].mxu1 %v7934_v19  ;;  %v6350_v19 = vld [vmem:[#allocation7 + $0x238] sm:$0xff]  }
 0x382   : > { %4068 = vmatprep.mubr.bf16.mxu1 %v7983_v50  ;;  %6091 = vmatpush3.bf16.msra.mxu1 %v6345_v52  ;;  %v3257_v52 = vrot.slane %v3255_v45, 1 }
 0x383   : > { %6092 = vmatprep.subr.bf16.mxu1 %v6346_v43 }
 0x384   : > { %4230 = vmatmul.mubr.bf16.gmra.mrb[232].mxu0 %v7959_v49 }
 0x385   : > { %4237 = vmatprep.mubr.bf16.mxu0 %v8021_v4 }
 0x386   : > { %6093 = vmatpush3.bf16.msra.mxu1 %v6346_v43 }
 0x387   : > { %6094 = vmatprep.subr.bf16.mxu1 %v6347_v55 }
 0x389   : > { %4069 = vmatmul.mubr.bf16.gmra.mrb[200].mxu1 %v7975_v53 }
 0x38a   : > { %4076 = vmatprep.mubr.bf16.mxu1 %v8005_v2  ;;  %6095 = vmatpush3.bf16.msra.mxu1 %v6347_v55 }
 0x38b   : > { %6096 = vmatprep.subr.bf16.mxu1 %v6348_v30 }
 0x38c   : > { %4238 = vmatmul.mubr.bf16.gmra.mrb[236].mxu0 %v7980_v57 }
 0x38d   : > { %4245 = vmatprep.mubr.bf16.mxu0 %v8044_v16 }
 0x38e   : > { %6097 = vmatpush3.bf16.msra.mxu1 %v6348_v30 }
 0x38f   : > { %6098 = vmatprep.subr.bf16.mxu1 %v6349_v59 }
 0x391   : > { %4077 = vmatmul.mubr.bf16.gmra.mrb[204].mxu1 %v7997_v33 }
 0x392   : > { %4084 = vmatprep.mubr.bf16.mxu1 %v8029_v47  ;;  %6099 = vmatpush3.bf16.msra.mxu1 %v6349_v59 }
 0x393   : > { %6100 = vmatprep.subr.bf16.mxu1 %v6350_v19 }
 0x394   : > { %4246 = vmatmul.mubr.bf16.gmra.mrb[240].mxu0 %v8002_v0 }
 0x395   : > { %4253 = vmatprep.mubr.bf16.mxu0 %v8069_v37 }
 0x396   : > { %6101 = vmatpush3.bf16.msra.mxu1 %v6350_v19 }
 0x399   : > { %4085 = vmatmul.mubr.bf16.gmra.mrb[208].mxu1 %v8021_v4 }
 0x39a   : > { %4092 = vmatprep.mubr.bf16.mxu1 %v8052_v24 }
 0x39c   : > { %4254 = vmatmul.mubr.bf16.gmra.mrb[244].mxu0 %v8026_v3 }
 0x39d   : > { %4261 = vmatprep.mubr.bf16.mxu0 %v8101_v58 }
 0x3a1   : > { %4093 = vmatmul.mubr.bf16.gmra.mrb[212].mxu1 %v8044_v16 }
 0x3a2   : > { %4100 = vmatprep.mubr.bf16.mxu1 %v8083_v42 }
 0x3a4   : > { %4262 = vmatmul.mubr.bf16.gmra.mrb[248].mxu0 %v8049_v44 }
 0x3a5   : > { %4269 = vmatprep.mubr.bf16.mxu0 %v8122_v28 }
 0x3a9   : > { %4101 = vmatmul.mubr.bf16.gmra.mrb[216].mxu1 %v8069_v37 }
 0x3aa   : > { %4108 = vmatprep.mubr.bf16.mxu1 %v8109_v32 }
 0x3ac   : > { %4270 = vmatmul.mubr.bf16.gmra.mrb[252].mxu0 %v8080_v38 }
 0x3ad   : > { %4277 = vmatprep.mubr.bf16.mxu0 %v8143_v15 }
 0x3b1   : > { %4109 = vmatmul.mubr.bf16.gmra.mrb[220].mxu1 %v8101_v58 }
 0x3b2   : > { %4116 = vmatprep.mubr.bf16.mxu1 %v8130_v34 }
 0x3b4   : > { %4278 = vmatmul.mubr.bf16.gmra.mrb[0].mxu0 %v8106_v36 }
 0x3b5   : > { %4285 = vmatprep.mubr.bf16.mxu0 %v8164_v12 }
 0x3b9   : > { %4117 = vmatmul.mubr.bf16.gmra.mrb[224].mxu1 %v8122_v28 }
 0x3ba   : > { %4124 = vmatprep.mubr.bf16.mxu1 %v8151_v22 }
 0x3bc   : > { %4286 = vmatmul.mubr.bf16.gmra.mrb[4].mxu0 %v8127_v21  ;;  %v3250_v21 = vshll.u32 %v8239_v41, 16 }
 0x3bd   : > { %4293 = vmatprep.mubr.bf16.mxu0 %v8185_v29 }
 0x3be   : > { %v3252_v9 = vrot.slane %v3250_v21, 1 }
 0x3c0   : > { %v3253_v56 = vor.u32 %v3252_v9, %v3248_v18 }
 0x3c1   : > { %4125 = vmatmul.mubr.bf16.gmra.mrb[228].mxu1 %v8143_v15 }
 0x3c2   : > { %4132 = vmatprep.mubr.bf16.mxu1 %v8172_v25  ;;  %v3258_v30 = vsel %vm748_vm3, %v3253_v56, %v3257_v52 }
 0x3c4   : > { %4294 = vmatmul.mubr.bf16.gmra.mrb[8].mxu0 %v8148_v54 }
 0x3c5   : > { %4301 = vmatprep.mubr.bf16.mxu0 %v8205_v6 }
 0x3c7   : > { %v5694_v49 = vpop.f32.mrb[160].mxu0 }
 0x3c8   : > { %v5695_v53 = vpop.f32.mrb[161].mxu0 }
 0x3c9   : > { %v5696_v57 = vadd.f32 %v5695_v53, %v5694_v49  ;;  %v5697_v33 = vpop.f32.mrb[162].mxu0  ;;  %4133 = vmatmul.mubr.bf16.gmra.mrb[232].mxu1 %v8164_v12 }
 0x3ca   : > { %v5698_v0 = vpop.f32.mrb[163].mxu0  ;;  %4140 = vmatprep.mubr.bf16.mxu1 %v8193_v46 }
 0x3cb   : > { %v5699_v20 = vadd.f32 %v5698_v0, %v5697_v33 }
 0x3cc   : > { %v5582_v4 = vpop.f32.mrb[128].mxu1  ;;  %4302 = vmatmul.mubr.bf16.gmra.mrb[12].mxu0 %v8169_v60 }
 0x3cd   : > { %v5583_v3 = vpop.f32.mrb[129].mxu1  ;;  %4309 = vmatprep.mubr.bf16.mxu0 %v8227_v5 }
 0x3ce   : > { %v5584_v16 = vadd.f32 %v5583_v3, %v5582_v4  ;;  %v5585_v44 = vpop.f32.mrb[130].mxu1 }
 0x3cf   : > { %v5586_v37 = vpop.f32.mrb[131].mxu1  ;;  %v5700_v38 = vpop.f32.mrb[164].mxu0 }
 0x3d0   : > { %v8302_v58 = vadd.f32 %v5696_v57, %v5584_v16  ;;  %v5587_v36 = vadd.f32 %v5586_v37, %v5585_v44  ;;  %v5701_v28 = vpop.f32.mrb[165].mxu0 }
 0x3d1   : > { %v5702_v15 = vadd.f32 %v5701_v28, %v5700_v38  ;;  %v5703_v54 = vpop.f32.mrb[166].mxu0  ;;  %4141 = vmatmul.mubr.bf16.gmra.mrb[236].mxu1 %v8185_v29 }
 0x3d2   : > { %v8306_v12 = vadd.f32 %v5699_v20, %v5587_v36  ;;  %v5704_v60 = vpop.f32.mrb[167].mxu0  ;;  %4148 = vmatprep.mubr.bf16.mxu1 %v8213_v35  ;;  %v3262_v36 = vrot.slane %v8239_v41, 1 }
 0x3d3   : > { %v5705_v7 = vadd.f32 %v5704_v60, %v5703_v54 }
 0x3d4   : > { %v5588_v11 = vpop.f32.mrb[132].mxu1  ;;  %4310 = vmatmul.mubr.bf16.gmra.mrb[16].mxu0 %v8190_v1 }
 0x3d5   : > { %v5589_v61 = vpop.f32.mrb[133].mxu1  ;;  %4317 = vmatprep.mubr.bf16.mxu0 %v8245_v26 }
 0x3d6   : > { %v5590_v13 = vadd.f32 %v5589_v61, %v5588_v11  ;;  %v5591_v10 = vpop.f32.mrb[134].mxu1 }
 0x3d7   : > { %v5592_v29 = vpop.f32.mrb[135].mxu1  ;;  %v5706_v14 = vpop.f32.mrb[168].mxu0 }
 0x3d8   : > { %v8313_v62 = vadd.f32 %v5702_v15, %v5590_v13  ;;  %v5593_v40 = vadd.f32 %v5592_v29, %v5591_v10  ;;  %v5707_v8 = vpop.f32.mrb[169].mxu0 }
 0x3d9   : > { %v5708_v63 = vadd.f32 %v5707_v8, %v5706_v14  ;;  %v5709_v51 = vpop.f32.mrb[170].mxu0  ;;  %4149 = vmatmul.mubr.bf16.gmra.mrb[240].mxu1 %v8205_v6 }
 0x3da   : > { %v8316_v1 = vadd.f32 %v5705_v7, %v5593_v40  ;;  %v5710_v48 = vpop.f32.mrb[171].mxu0  ;;  %4156 = vmatprep.mubr.bf16.mxu1 %v8231_v17 }
 0x3db   : > { %v5711_v43 = vadd.f32 %v5710_v48, %v5709_v51 }
 0x3dc   : > { %v5594_v55 = vpop.f32.mrb[136].mxu1  ;;  %4318 = vmatmul.mubr.bf16.gmra.mrb[20].mxu0 %v8210_v27 }
 0x3dd   : > { %v5595_v59 = vpop.f32.mrb[137].mxu1  ;;  %4325 = vmatprep.mubr.bf16.mxu0 %v3258_v30 }
 0x3de   : > { %v5596_v19 = vadd.f32 %v5595_v59, %v5594_v55  ;;  %v5597_v49 = vpop.f32.mrb[138].mxu1 }
 0x3df   : > { %v5598_v53 = vpop.f32.mrb[139].mxu1  ;;  %v5712_v57 = vpop.f32.mrb[172].mxu0 }
 0x3e0   : > { %v8321_v33 = vadd.f32 %v5708_v63, %v5596_v19  ;;  %v5599_v6 = vadd.f32 %v5598_v53, %v5597_v49  ;;  %v5713_v0 = vpop.f32.mrb[173].mxu0 }
 0x3e1   : > { %v5714_v20 = vadd.f32 %v5713_v0, %v5712_v57  ;;  %v5715_v4 = vpop.f32.mrb[174].mxu0  ;;  %4157 = vmatmul.mubr.bf16.gmra.mrb[244].mxu1 %v8227_v5  ;;  %v3263_v5 = vrot.slane %v8089_v31, 1 }
 0x3e2   : > { %v8324_v3 = vadd.f32 %v5711_v43, %v5599_v6  ;;  %v5716_v16 = vpop.f32.mrb[175].mxu0  ;;  %4164 = vmatprep.mubr.bf16.mxu1 %v8249_v23 }
 0x3e3   : > { %v5717_v44 = vadd.f32 %v5716_v16, %v5715_v4  ;;  %v8335_v13 = vsel %vm974_vm4, %v3262_v36, %v3263_v5 }
 0x3e4   : > { %v5600_v37 = vpop.f32.mrb[140].mxu1  ;;  %4326 = vmatmul.mubr.bf16.gmra.mrb[24].mxu0 %v8239_v41 }
 0x3e5   : > { %v5601_v38 = vpop.f32.mrb[141].mxu1  ;;  %4333 = vmatprep.mubr.bf16.mxu0 %v8245_v26 }
 0x3e6   : > { %v5602_v28 = vadd.f32 %v5601_v38, %v5600_v37  ;;  %v5603_v21 = vpop.f32.mrb[142].mxu1 }
 0x3e7   : > { %v5604_v15 = vpop.f32.mrb[143].mxu1  ;;  %v5718_v54 = vpop.f32.mrb[176].mxu0 }
 0x3e8   : > { %v8331_v60 = vadd.f32 %v5714_v20, %v5602_v28  ;;  %v5605_v7 = vadd.f32 %v5604_v15, %v5603_v21  ;;  %v5719_v11 = vpop.f32.mrb[177].mxu0 }
 0x3e9   : > { %v5720_v9 = vadd.f32 %v5719_v11, %v5718_v54  ;;  %v5721_v61 = vpop.f32.mrb[178].mxu0  ;;  %4165 = vmatmul.mubr.bf16.gmra.mrb[248].mxu1 %v8245_v26 }
 0x3ea   : > { %v8337_v10 = vadd.f32 %v5717_v44, %v5605_v7  ;;  %v5722_v41 = vpop.f32.mrb[179].mxu0  ;;  %4172 = vmatprep.mubr.bf16.mxu1 %v8335_v13 }
 0x3eb   : > { %v5723_v18 = vadd.f32 %v5722_v41, %v5721_v61 }
 0x3ec   : > { %v5606_v45 = vpop.f32.mrb[144].mxu1  ;;  %4334 = vmatmul.mubr.bf16.gmra.mrb[28].mxu0 %v8210_v27 }
 0x3ed   : > { %v5607_v31 = vpop.f32.mrb[145].mxu1 }
 0x3ee   : > { %v5608_v29 = vadd.f32 %v5607_v31, %v5606_v45  ;;  %v5609_v14 = vpop.f32.mrb[146].mxu1 }
 0x3ef   : > { %v5610_v40 = vpop.f32.mrb[147].mxu1  ;;  %v5724_v8 = vpop.f32.mrb[180].mxu0 }
 0x3f0   : > { %v8341_v56 = vadd.f32 %v5720_v9, %v5608_v29  ;;  %v5611_v26 = vadd.f32 %v5610_v40, %v5609_v14  ;;  %v5725_v63 = vpop.f32.mrb[181].mxu0 }
 0x3f1   : > { %v5726_v51 = vadd.f32 %v5725_v63, %v5724_v8  ;;  %v5727_v48 = vpop.f32.mrb[182].mxu0  ;;  %4173 = vmatmul.mubr.bf16.gmra.mrb[252].mxu1 %v3258_v30 }
 0x3f2   : > { %v8343_v52 = vadd.f32 %v5723_v18, %v5611_v26  ;;  %v5728_v43 = vpop.f32.mrb[183].mxu0  ;;  %6102 = vmatprep.mubr.bf16.mxu1 %v7927_v39 }
 0x3f3   : > { %v5729_v55 = vadd.f32 %v5728_v43, %v5727_v48 }
 0x3f4   : > { %v5612_v59 = vpop.f32.mrb[148].mxu1 }
 0x3f5   : > { %v5613_v27 = vpop.f32.mrb[149].mxu1 }
 0x3f6   : > { %v5614_v19 = vadd.f32 %v5613_v27, %v5612_v59  ;;  %v5615_v49 = vpop.f32.mrb[150].mxu1 }
 0x3f7   : > { %v5616_v53 = vpop.f32.mrb[151].mxu1  ;;  %v5730_v57 = vpop.f32.mrb[184].mxu0 }
 0x3f8   : > { %v8346_v6 = vadd.f32 %v5726_v51, %v5614_v19  ;;  %v5617_v0 = vadd.f32 %v5616_v53, %v5615_v49  ;;  %v5731_v20 = vpop.f32.mrb[185].mxu0 }
 0x3f9   : > { %v5732_v4 = vadd.f32 %v5731_v20, %v5730_v57  ;;  %v5733_v16 = vpop.f32.mrb[186].mxu0  ;;  %6103 = vmatmul.mubr.bf16.vlgmr.msra.gmra.mrb[0].mxu1 %v7983_v50 }
 0x3fa   : > { %v8349_v30 = vadd.f32 %v5729_v55, %v5617_v0  ;;  %v5734_v44 = vpop.f32.mrb[187].mxu0  ;;  %6106 = vmatprep.mubr.bf16.mxu1 %v8005_v2 }
 0x3fb   : > { %v5735_v39 = vadd.f32 %v5734_v44, %v5733_v16 }
 0x3fc   : > { %v5618_v37 = vpop.f32.mrb[152].mxu1 }
 0x3fd   : > { %v5619_v38 = vpop.f32.mrb[153].mxu1 }
 0x3fe   : > { %v5620_v36 = vadd.f32 %v5619_v38, %v5618_v37  ;;  %v5621_v28 = vpop.f32.mrb[154].mxu1 }
 0x3ff   : > { %v5622_v21 = vpop.f32.mrb[155].mxu1  ;;  %v5736_v15 = vpop.f32.mrb[188].mxu0 }
 0x400   : > { %v8352_v54 = vadd.f32 %v5732_v4, %v5620_v36  ;;  %v5623_v5 = vadd.f32 %v5622_v21, %v5621_v28  ;;  %v5737_v7 = vpop.f32.mrb[189].mxu0 }
 0x401   : > { %v5738_v11 = vadd.f32 %v5737_v7, %v5736_v15  ;;  %v5739_v9 = vpop.f32.mrb[190].mxu0  ;;  %6107 = vmatmul.mubr.bf16.gmra.mrb[4].mxu1 %v8029_v47 }
 0x402   : > { %v8355_v50 = vadd.f32 %v5735_v39, %v5623_v5  ;;  %v5740_v61 = vpop.f32.mrb[191].mxu0  ;;  %6110 = vmatprep.mubr.bf16.mxu1 %v8052_v24 }
 0x403   : > { %v5741_v2 = vadd.f32 %v5740_v61, %v5739_v9 }
 0x404   : > { %v5624_v41 = vpop.f32.mrb[156].mxu1 }
 0x405   : > { %v5625_v18 = vpop.f32.mrb[157].mxu1 }
 0x406   : > { %v5626_v45 = vadd.f32 %v5625_v18, %v5624_v41  ;;  %v5627_v31 = vpop.f32.mrb[158].mxu1 }
 0x407   : > { %v5628_v29 = vpop.f32.mrb[159].mxu1  ;;  %v5742_v14 = vpop.f32.mrb[192].mxu0 }
 0x408   : > { %v8358_v40 = vadd.f32 %v5738_v11, %v5626_v45  ;;  %v5629_v8 = vadd.f32 %v5628_v29, %v5627_v31  ;;  %v5743_v26 = vpop.f32.mrb[193].mxu0 }
 0x409   : > { %v5744_v63 = vadd.f32 %v5743_v26, %v5742_v14  ;;  %v5745_v51 = vpop.f32.mrb[194].mxu0  ;;  %6111 = vmatmul.mubr.bf16.gmra.mrb[8].mxu1 %v8083_v42 }
 0x40a   : > { %v8361_v47 = vadd.f32 %v5741_v2, %v5629_v8  ;;  %v5746_v48 = vpop.f32.mrb[195].mxu0  ;;  %6114 = vmatprep.mubr.bf16.mxu1 %v8109_v32 }
 0x40b   : > { %v5747_v24 = vadd.f32 %v5746_v48, %v5745_v51 }
 0x40c   : > { %v5630_v43 = vpop.f32.mrb[160].mxu1 }
 0x40d   : > { %v5631_v55 = vpop.f32.mrb[161].mxu1 }
 0x40e   : > { %v5632_v59 = vadd.f32 %v5631_v55, %v5630_v43  ;;  %v5633_v27 = vpop.f32.mrb[162].mxu1 }
 0x40f   : > { %v5634_v19 = vpop.f32.mrb[163].mxu1  ;;  %v5748_v49 = vpop.f32.mrb[196].mxu0 }
 0x410   : > { %v8364_v53 = vadd.f32 %v5744_v63, %v5632_v59  ;;  %v5635_v57 = vadd.f32 %v5634_v19, %v5633_v27  ;;  %v5749_v0 = vpop.f32.mrb[197].mxu0 }
 0x411   : > { %v5750_v20 = vadd.f32 %v5749_v0, %v5748_v49  ;;  %v5751_v4 = vpop.f32.mrb[198].mxu0  ;;  %6115 = vmatmul.mubr.bf16.gmra.mrb[12].mxu1 %v8130_v34 }
 0x412   : > { %v8367_v42 = vadd.f32 %v5747_v24, %v5635_v57  ;;  %v5752_v16 = vpop.f32.mrb[199].mxu0  ;;  %6118 = vmatprep.mubr.bf16.mxu1 %v8151_v22 }
 0x413   : > { %v5753_v32 = vadd.f32 %v5752_v16, %v5751_v4 }
 0x414   : > { %v5636_v44 = vpop.f32.mrb[164].mxu1 }
 0x415   : > { %v5637_v39 = vpop.f32.mrb[165].mxu1 }
 0x416   : > { %v5638_v37 = vadd.f32 %v5637_v39, %v5636_v44  ;;  %v5639_v38 = vpop.f32.mrb[166].mxu1 }
 0x417   : > { %v5640_v36 = vpop.f32.mrb[167].mxu1  ;;  %v5754_v28 = vpop.f32.mrb[200].mxu0 }
 0x418   : > { %v8370_v21 = vadd.f32 %v5750_v20, %v5638_v37  ;;  %v5641_v15 = vadd.f32 %v5640_v36, %v5639_v38  ;;  %v5755_v5 = vpop.f32.mrb[201].mxu0 }
 0x419   : > { %v5756_v7 = vadd.f32 %v5755_v5, %v5754_v28  ;;  %v5757_v11 = vpop.f32.mrb[202].mxu0  ;;  %6119 = vmatmul.mubr.bf16.gmra.mrb[16].mxu1 %v8172_v25 }
 0x41a   : > { %v8373_v34 = vadd.f32 %v5753_v32, %v5641_v15  ;;  %v5758_v9 = vpop.f32.mrb[203].mxu0  ;;  %6122 = vmatprep.mubr.bf16.mxu1 %v8193_v46 }
 0x41b   : > { %v5759_v22 = vadd.f32 %v5758_v9, %v5757_v11 }
 0x41c   : > { %v5642_v61 = vpop.f32.mrb[168].mxu1 }
 0x41d   : > { %v5643_v2 = vpop.f32.mrb[169].mxu1 }
 0x41e   : > { %v5644_v41 = vadd.f32 %v5643_v2, %v5642_v61  ;;  %v5645_v18 = vpop.f32.mrb[170].mxu1 }
 0x41f   : > { %v5646_v45 = vpop.f32.mrb[171].mxu1  ;;  %v5760_v31 = vpop.f32.mrb[204].mxu0 }
 0x420   : > { %v8376_v29 = vadd.f32 %v5756_v7, %v5644_v41  ;;  %v5647_v14 = vadd.f32 %v5646_v45, %v5645_v18  ;;  %v5761_v8 = vpop.f32.mrb[205].mxu0 }
 0x421   : > { %v5762_v26 = vadd.f32 %v5761_v8, %v5760_v31  ;;  %v5763_v63 = vpop.f32.mrb[206].mxu0  ;;  %6123 = vmatmul.mubr.bf16.gmra.mrb[20].mxu1 %v8213_v35 }
 0x422   : > { %v8379_v25 = vadd.f32 %v5759_v22, %v5647_v14  ;;  %v5764_v51 = vpop.f32.mrb[207].mxu0  ;;  %6126 = vmatprep.mubr.bf16.mxu1 %v8231_v17 }
 0x423   : > { %v5765_v46 = vadd.f32 %v5764_v51, %v5763_v63 }
 0x424   : > { %v5648_v48 = vpop.f32.mrb[172].mxu1 }
 0x425   : > { %v5649_v24 = vpop.f32.mrb[173].mxu1 }
 0x426   : > { %v5650_v43 = vadd.f32 %v5649_v24, %v5648_v48  ;;  %v5651_v55 = vpop.f32.mrb[174].mxu1 }
 0x427   : > { %v5652_v59 = vpop.f32.mrb[175].mxu1  ;;  %v5766_v27 = vpop.f32.mrb[208].mxu0 }
 0x428   : > { %v8382_v19 = vadd.f32 %v5762_v26, %v5650_v43  ;;  %v5653_v49 = vadd.f32 %v5652_v59, %v5651_v55  ;;  %v5767_v57 = vpop.f32.mrb[209].mxu0 }
 0x429   : > { %v5768_v0 = vadd.f32 %v5767_v57, %v5766_v27  ;;  %v5769_v20 = vpop.f32.mrb[210].mxu0  ;;  %6127 = vmatmul.mubr.bf16.gmra.mrb[24].mxu1 %v8249_v23 }
 0x42a   : > { %v8385_v35 = vadd.f32 %v5765_v46, %v5653_v49  ;;  %v5770_v4 = vpop.f32.mrb[211].mxu0  ;;  %6130 = vmatprep.mubr.bf16.mxu1 %v8335_v13 }
 0x42b   : > { %v5771_v17 = vadd.f32 %v5770_v4, %v5769_v20 }
 0x42c   : > { %v5654_v16 = vpop.f32.mrb[176].mxu1 }
 0x42d   : > { %v5655_v32 = vpop.f32.mrb[177].mxu1 }
 0x42e   : > { %v5656_v44 = vadd.f32 %v5655_v32, %v5654_v16  ;;  %v5657_v39 = vpop.f32.mrb[178].mxu1 }
 0x42f   : > { %v5658_v37 = vpop.f32.mrb[179].mxu1  ;;  %v5772_v38 = vpop.f32.mrb[212].mxu0 }
 0x430   : > { %v8388_v36 = vadd.f32 %v5768_v0, %v5656_v44  ;;  %v5659_v28 = vadd.f32 %v5658_v37, %v5657_v39  ;;  %v5773_v15 = vpop.f32.mrb[213].mxu0 }
 0x431   : > { %v5774_v5 = vadd.f32 %v5773_v15, %v5772_v38  ;;  %v5775_v7 = vpop.f32.mrb[214].mxu0  ;;  %6131 = vmatmul.mubr.bf16.gmra.mrb[28].mxu1 %v8249_v23 }
 0x432   : > { %v8391_v11 = vadd.f32 %v5771_v17, %v5659_v28  ;;  %v5776_v9 = vpop.f32.mrb[215].mxu0 }
 0x433   : > { %v5777_v22 = vadd.f32 %v5776_v9, %v5775_v7 }
 0x434   : > { %v5660_v13 = vpop.f32.mrb[180].mxu1 }
 0x435   : > { %v5661_v61 = vpop.f32.mrb[181].mxu1 }
 0x436   : > { %v5662_v2 = vadd.f32 %v5661_v61, %v5660_v13  ;;  %v5663_v41 = vpop.f32.mrb[182].mxu1 }
 0x437   : > { %v5664_v18 = vpop.f32.mrb[183].mxu1  ;;  %v5778_v45 = vpop.f32.mrb[216].mxu0 }
 0x438   : > { %v8393_v31 = vadd.f32 %v5774_v5, %v5662_v2  ;;  %v5665_v14 = vadd.f32 %v5664_v18, %v5663_v41  ;;  %v5779_v8 = vpop.f32.mrb[217].mxu0 }
 0x439   : > { %v5780_v26 = vadd.f32 %v5779_v8, %v5778_v45  ;;  %v5781_v63 = vpop.f32.mrb[218].mxu0 }
 0x43a   : > { %v8395_v51 = vadd.f32 %v5777_v22, %v5665_v14  ;;  %v5782_v46 = vpop.f32.mrb[219].mxu0 }
 0x43b   : > { %v5783_v23 = vadd.f32 %v5782_v46, %v5781_v63 }
 0x43c   : > { %v5666_v48 = vpop.f32.mrb[184].mxu1 }
 0x43d   : > { %v5667_v24 = vpop.f32.mrb[185].mxu1 }
 0x43e   : > { %v5668_v43 = vadd.f32 %v5667_v24, %v5666_v48  ;;  %v5669_v55 = vpop.f32.mrb[186].mxu1 }
 0x43f   : > { %v5670_v59 = vpop.f32.mrb[187].mxu1  ;;  %v5784_v27 = vpop.f32.mrb[220].mxu0 }
 0x440   : > { %v8397_v49 = vadd.f32 %v5780_v26, %v5668_v43  ;;  %v5671_v57 = vadd.f32 %v5670_v59, %v5669_v55  ;;  %v5785_v0 = vpop.f32.mrb[221].mxu0 }
 0x441   : > { %v5786_v20 = vadd.f32 %v5785_v0, %v5784_v27  ;;  %v5787_v4 = vpop.f32.mrb[222].mxu0 }
 0x442   : > { %v8399_v17 = vadd.f32 %v5783_v23, %v5671_v57  ;;  %v5788_v16 = vpop.f32.mrb[223].mxu0 }
 0x443   : > { %v5789_v32 = vadd.f32 %v5788_v16, %v5787_v4 }
 0x444   : > { %v5672_v44 = vpop.f32.mrb[188].mxu1 }
 0x445   : > { %v5673_v39 = vpop.f32.mrb[189].mxu1 }
 0x446   : > { %v5674_v37 = vadd.f32 %v5673_v39, %v5672_v44  ;;  %v5675_v38 = vpop.f32.mrb[190].mxu1 }
 0x447   : > { %v5676_v28 = vpop.f32.mrb[191].mxu1  ;;  %v5918_v15 = vpop.f32.mrb[224].mxu0 }
 0x448   : > { %v8401_v5 = vadd.f32 %v5786_v20, %v5674_v37  ;;  %v5677_v7 = vadd.f32 %v5676_v28, %v5675_v38  ;;  %v5919_v9 = vpop.f32.mrb[225].mxu0 }
 0x449   : > { %v5920_v22 = vadd.f32 %v5919_v9, %v5918_v15  ;;  %v5921_v13 = vpop.f32.mrb[226].mxu0 }
 0x44a   : > { %v8403_v61 = vadd.f32 %v5789_v32, %v5677_v7  ;;  %v5922_v2 = vpop.f32.mrb[227].mxu0 }
 0x44b   : > { %v5923_v41 = vadd.f32 %v5922_v2, %v5921_v13 }
 0x44c   : > { %v5806_v18 = vpop.f32.mrb[192].mxu1 }
 0x44d   : > { %v5807_v45 = vpop.f32.mrb[193].mxu1 }
 0x44e   : > { %v5808_v14 = vadd.f32 %v5807_v45, %v5806_v18  ;;  %v5809_v8 = vpop.f32.mrb[194].mxu1 }
 0x44f   : > { %v5810_v26 = vpop.f32.mrb[195].mxu1  ;;  %v5924_v63 = vpop.f32.mrb[228].mxu0 }
 0x450   : > { %v4055_v46 = vadd.f32 %v5808_v14, %v8302_v58  ;;  %v5811_v23 = vadd.f32 %v5810_v26, %v5809_v8  ;;  %v5925_v48 = vpop.f32.mrb[229].mxu0 }
 0x451   : > { %v5926_v24 = vadd.f32 %v5925_v48, %v5924_v63  ;;  %v5927_v43 = vpop.f32.mrb[230].mxu0 }
 0x452   : > { %v4058_v55 = vadd.f32 %v5811_v23, %v8306_v12  ;;  %v5928_v59 = vpop.f32.mrb[231].mxu0  ;;  %v8407_v27 = vadd.f32 %v5920_v22, %v4055_v46 }
 0x453   : > { %v5929_v57 = vadd.f32 %v5928_v59, %v5927_v43 }
 0x454   : > { %v5812_v0 = vpop.f32.mrb[196].mxu1  ;;  %v8409_v20 = vadd.f32 %v5923_v41, %v4058_v55 }
 0x455   : > { %v5813_v4 = vpop.f32.mrb[197].mxu1 }
 0x456   : > { %v5814_v16 = vadd.f32 %v5813_v4, %v5812_v0  ;;  %v5815_v32 = vpop.f32.mrb[198].mxu1 }
 0x457   : > { %v5816_v44 = vpop.f32.mrb[199].mxu1  ;;  %v5930_v39 = vpop.f32.mrb[232].mxu0 }
 0x458   : > { %v4063_v58 = vadd.f32 %v5814_v16, %v8313_v62  ;;  %v5817_v37 = vadd.f32 %v5816_v44, %v5815_v32  ;;  %v5931_v38 = vpop.f32.mrb[233].mxu0 }
 0x459   : > { %v5932_v28 = vadd.f32 %v5931_v38, %v5930_v39  ;;  %v5933_v15 = vpop.f32.mrb[234].mxu0 }
 0x45a   : > { %v4066_v12 = vadd.f32 %v5817_v37, %v8316_v1  ;;  %v5934_v7 = vpop.f32.mrb[235].mxu0  ;;  %v8413_v9 = vadd.f32 %v5926_v24, %v4063_v58 }
 0x45b   : > { %v5935_v22 = vadd.f32 %v5934_v7, %v5933_v15 }
 0x45c   : > { %v5818_v13 = vpop.f32.mrb[200].mxu1  ;;  %v8415_v2 = vadd.f32 %v5929_v57, %v4066_v12 }
 0x45d   : > { %v5819_v41 = vpop.f32.mrb[201].mxu1 }
 0x45e   : > { %v5820_v18 = vadd.f32 %v5819_v41, %v5818_v13  ;;  %v5821_v45 = vpop.f32.mrb[202].mxu1 }
 0x45f   : > { %v5822_v14 = vpop.f32.mrb[203].mxu1  ;;  %v5936_v8 = vpop.f32.mrb[236].mxu0 }
 0x460   : > { %v4071_v62 = vadd.f32 %v5820_v18, %v8321_v33  ;;  %v5823_v26 = vadd.f32 %v5822_v14, %v5821_v45  ;;  %v5937_v63 = vpop.f32.mrb[237].mxu0 }
 0x461   : > { %v5938_v46 = vadd.f32 %v5937_v63, %v5936_v8  ;;  %v5939_v23 = vpop.f32.mrb[238].mxu0 }
 0x462   : > { %v4074_v1 = vadd.f32 %v5823_v26, %v8324_v3  ;;  %v5940_v48 = vpop.f32.mrb[239].mxu0  ;;  %v8419_v24 = vadd.f32 %v5932_v28, %v4071_v62 }
 0x463   : > { %v5941_v43 = vadd.f32 %v5940_v48, %v5939_v23 }
 0x464   : > { %v5824_v55 = vpop.f32.mrb[204].mxu1  ;;  %v8421_v59 = vadd.f32 %v5935_v22, %v4074_v1 }
 0x465   : > { %v5825_v57 = vpop.f32.mrb[205].mxu1 }
 0x466   : > { %v5826_v0 = vadd.f32 %v5825_v57, %v5824_v55  ;;  %v5827_v4 = vpop.f32.mrb[206].mxu1 }
 0x467   : > { %v5828_v16 = vpop.f32.mrb[207].mxu1  ;;  %v5942_v32 = vpop.f32.mrb[240].mxu0 }
 0x468   : > { %v4079_v33 = vadd.f32 %v5826_v0, %v8331_v60  ;;  %v5829_v44 = vadd.f32 %v5828_v16, %v5827_v4  ;;  %v5943_v39 = vpop.f32.mrb[241].mxu0 }
 0x469   : > { %v5944_v58 = vadd.f32 %v5943_v39, %v5942_v32  ;;  %v5945_v37 = vpop.f32.mrb[242].mxu0 }
 0x46a   : > { %v4082_v3 = vadd.f32 %v5829_v44, %v8337_v10  ;;  %v5946_v38 = vpop.f32.mrb[243].mxu0  ;;  %v8425_v28 = vadd.f32 %v5938_v46, %v4079_v33 }
 0x46b   : > { %v5947_v15 = vadd.f32 %v5946_v38, %v5945_v37 }
 0x46c   : > { %v5830_v12 = vpop.f32.mrb[208].mxu1  ;;  %v8427_v7 = vadd.f32 %v5941_v43, %v4082_v3 }
 0x46d   : > { %v5831_v22 = vpop.f32.mrb[209].mxu1 }
 0x46e   : > { %v5832_v13 = vadd.f32 %v5831_v22, %v5830_v12  ;;  %v5833_v41 = vpop.f32.mrb[210].mxu1 }
 0x46f   : > { %v5834_v18 = vpop.f32.mrb[211].mxu1  ;;  %v5948_v45 = vpop.f32.mrb[244].mxu0 }
 0x470   : > { %v4087_v60 = vadd.f32 %v5832_v13, %v8341_v56  ;;  %v5835_v14 = vadd.f32 %v5834_v18, %v5833_v41  ;;  %v5949_v8 = vpop.f32.mrb[245].mxu0 }
 0x471   : > { %v5950_v62 = vadd.f32 %v5949_v8, %v5948_v45  ;;  %v5951_v26 = vpop.f32.mrb[246].mxu0 }
 0x472   : > { %v4090_v10 = vadd.f32 %v5835_v14, %v8343_v52  ;;  %v5952_v63 = vpop.f32.mrb[247].mxu0  ;;  %v8431_v46 = vadd.f32 %v5944_v58, %v4087_v60 }
 0x473   : > { %v5953_v23 = vadd.f32 %v5952_v63, %v5951_v26 }
 0x474   : > { %v5836_v1 = vpop.f32.mrb[212].mxu1  ;;  %v8433_v48 = vadd.f32 %v5947_v15, %v4090_v10 }
 0x475   : > { %v5837_v43 = vpop.f32.mrb[213].mxu1 }
 0x476   : > { %v5838_v55 = vadd.f32 %v5837_v43, %v5836_v1  ;;  %v5839_v57 = vpop.f32.mrb[214].mxu1 }
 0x477   : > { %v5840_v0 = vpop.f32.mrb[215].mxu1  ;;  %v5954_v4 = vpop.f32.mrb[248].mxu0 }
 0x478   : > { %v4095_v56 = vadd.f32 %v5838_v55, %v8346_v6  ;;  %v5841_v16 = vadd.f32 %v5840_v0, %v5839_v57  ;;  %v5955_v32 = vpop.f32.mrb[249].mxu0 }
 0x479   : > { %v5956_v33 = vadd.f32 %v5955_v32, %v5954_v4  ;;  %v5957_v44 = vpop.f32.mrb[250].mxu0 }
 0x47a   : > { %v4098_v52 = vadd.f32 %v5841_v16, %v8349_v30  ;;  %v5958_v39 = vpop.f32.mrb[251].mxu0  ;;  %v8437_v58 = vadd.f32 %v5950_v62, %v4095_v56 }
 0x47b   : > { %v5959_v37 = vadd.f32 %v5958_v39, %v5957_v44 }
 0x47c   : > { %v5842_v3 = vpop.f32.mrb[216].mxu1  ;;  %v8439_v38 = vadd.f32 %v5953_v23, %v4098_v52 }
 0x47d   : > { %v5843_v15 = vpop.f32.mrb[217].mxu1 }
 0x47e   : > { %v5844_v12 = vadd.f32 %v5843_v15, %v5842_v3  ;;  %v5845_v22 = vpop.f32.mrb[218].mxu1 }
 0x47f   : > { %v5846_v13 = vpop.f32.mrb[219].mxu1  ;;  %v5960_v41 = vpop.f32.mrb[252].mxu0 }
 0x480   : > { %v4103_v6 = vadd.f32 %v5844_v12, %v8352_v54  ;;  %v5847_v18 = vadd.f32 %v5846_v13, %v5845_v22  ;;  %v5961_v45 = vpop.f32.mrb[253].mxu0 }
 0x481   : > { %v5962_v60 = vadd.f32 %v5961_v45, %v5960_v41  ;;  %v5963_v14 = vpop.f32.mrb[254].mxu0 }
 0x482   : > { %v4106_v30 = vadd.f32 %v5847_v18, %v8355_v50  ;;  %v5964_v8 = vpop.f32.mrb[255].mxu0  ;;  %v8443_v62 = vadd.f32 %v5956_v33, %v4103_v6 }
 0x483   : > { %v5965_v26 = vadd.f32 %v5964_v8, %v5963_v14 }
 0x484   : > { %v5848_v10 = vpop.f32.mrb[220].mxu1  ;;  %v8445_v63 = vadd.f32 %v5959_v37, %v4106_v30 }
 0x485   : > { %v5849_v23 = vpop.f32.mrb[221].mxu1 }
 0x486   : > { %v5850_v1 = vadd.f32 %v5849_v23, %v5848_v10  ;;  %v5851_v43 = vpop.f32.mrb[222].mxu1 }
 0x487   : > { %v5852_v55 = vpop.f32.mrb[223].mxu1  ;;  %v5966_v57 = vpop.f32.mrb[0].mxu0 }
 0x488   : > { %v4111_v54 = vadd.f32 %v5850_v1, %v8358_v40  ;;  %v5853_v0 = vadd.f32 %v5852_v55, %v5851_v43  ;;  %v5967_v4 = vpop.f32.mrb[1].mxu0 }
 0x489   : > { %v5968_v56 = vadd.f32 %v5967_v4, %v5966_v57  ;;  %v5969_v16 = vpop.f32.mrb[2].mxu0 }
 0x48a   : > { %v4114_v50 = vadd.f32 %v5853_v0, %v8361_v47  ;;  %v5970_v32 = vpop.f32.mrb[3].mxu0  ;;  %v8449_v33 = vadd.f32 %v5962_v60, %v4111_v54 }
 0x48b   : > { %v5971_v44 = vadd.f32 %v5970_v32, %v5969_v16 }
 0x48c   : > { %v5854_v52 = vpop.f32.mrb[224].mxu1  ;;  %v8451_v39 = vadd.f32 %v5965_v26, %v4114_v50 }
 0x48d   : > { %v5855_v37 = vpop.f32.mrb[225].mxu1 }
 0x48e   : > { %v5856_v3 = vadd.f32 %v5855_v37, %v5854_v52  ;;  %v5857_v15 = vpop.f32.mrb[226].mxu1 }
 0x48f   : > { %v5858_v12 = vpop.f32.mrb[227].mxu1  ;;  %v5972_v22 = vpop.f32.mrb[4].mxu0 }
 0x490   : > { %v4119_v40 = vadd.f32 %v5856_v3, %v8364_v53  ;;  %v5859_v13 = vadd.f32 %v5858_v12, %v5857_v15  ;;  %v5973_v41 = vpop.f32.mrb[5].mxu0 }
 0x491   : > { %v5974_v6 = vadd.f32 %v5973_v41, %v5972_v22  ;;  %v5975_v18 = vpop.f32.mrb[6].mxu0 }
 0x492   : > { %v4122_v47 = vadd.f32 %v5859_v13, %v8367_v42  ;;  %v5976_v45 = vpop.f32.mrb[7].mxu0  ;;  %v8455_v60 = vadd.f32 %v5968_v56, %v4119_v40 }
 0x493   : > { %v5977_v14 = vadd.f32 %v5976_v45, %v5975_v18 }
 0x494   : > { %v5860_v30 = vpop.f32.mrb[228].mxu1  ;;  %v8457_v8 = vadd.f32 %v5971_v44, %v4122_v47 }
 0x495   : > { %v5861_v26 = vpop.f32.mrb[229].mxu1 }
 0x496   : > { %v5862_v10 = vadd.f32 %v5861_v26, %v5860_v30  ;;  %v5863_v23 = vpop.f32.mrb[230].mxu1 }
 0x497   : > { %v5864_v1 = vpop.f32.mrb[231].mxu1  ;;  %v5978_v43 = vpop.f32.mrb[8].mxu0 }
 0x498   : > { %v4127_v53 = vadd.f32 %v5862_v10, %v8370_v21  ;;  %v5865_v55 = vadd.f32 %v5864_v1, %v5863_v23  ;;  %v5979_v57 = vpop.f32.mrb[9].mxu0 }
 0x499   : > { %v5980_v54 = vadd.f32 %v5979_v57, %v5978_v43  ;;  %v5981_v0 = vpop.f32.mrb[10].mxu0 }
 0x49a   : > { %v4130_v42 = vadd.f32 %v5865_v55, %v8373_v34  ;;  %v5982_v4 = vpop.f32.mrb[11].mxu0  ;;  %v8461_v56 = vadd.f32 %v5974_v6, %v4127_v53 }
 0x49b   : > { %v5983_v16 = vadd.f32 %v5982_v4, %v5981_v0 }
 0x49c   : > { %v5866_v50 = vpop.f32.mrb[232].mxu1  ;;  %v8463_v32 = vadd.f32 %v5977_v14, %v4130_v42 }
 0x49d   : > { %v5867_v44 = vpop.f32.mrb[233].mxu1 }
 0x49e   : > { %v5868_v52 = vadd.f32 %v5867_v44, %v5866_v50  ;;  %v5869_v37 = vpop.f32.mrb[234].mxu1 }
 0x49f   : > { %v5870_v3 = vpop.f32.mrb[235].mxu1  ;;  %v5984_v15 = vpop.f32.mrb[12].mxu0 }
 0x4a0   : > { %v4135_v21 = vadd.f32 %v5868_v52, %v8376_v29  ;;  %v5871_v12 = vadd.f32 %v5870_v3, %v5869_v37  ;;  %v5985_v22 = vpop.f32.mrb[13].mxu0 }
 0x4a1   : > { %v5986_v40 = vadd.f32 %v5985_v22, %v5984_v15  ;;  %v5987_v13 = vpop.f32.mrb[14].mxu0 }
 0x4a2   : > { %v4138_v34 = vadd.f32 %v5871_v12, %v8379_v25  ;;  %v5988_v41 = vpop.f32.mrb[15].mxu0  ;;  %v8467_v6 = vadd.f32 %v5980_v54, %v4135_v21 }
 0x4a3   : > { %v5989_v18 = vadd.f32 %v5988_v41, %v5987_v13 }
 0x4a4   : > { %v5872_v47 = vpop.f32.mrb[236].mxu1  ;;  %v8469_v45 = vadd.f32 %v5983_v16, %v4138_v34 }
 0x4a5   : > { %v5873_v14 = vpop.f32.mrb[237].mxu1 }
 0x4a6   : > { %v5874_v30 = vadd.f32 %v5873_v14, %v5872_v47  ;;  %v5875_v26 = vpop.f32.mrb[238].mxu1 }
 0x4a7   : > { %v5876_v10 = vpop.f32.mrb[239].mxu1  ;;  %v5990_v23 = vpop.f32.mrb[16].mxu0 }
 0x4a8   : > { %v4143_v29 = vadd.f32 %v5874_v30, %v8382_v19  ;;  %v5877_v1 = vadd.f32 %v5876_v10, %v5875_v26  ;;  %v5991_v43 = vpop.f32.mrb[17].mxu0 }
 0x4a9   : > { %v5992_v53 = vadd.f32 %v5991_v43, %v5990_v23  ;;  %v5993_v55 = vpop.f32.mrb[18].mxu0 }
 0x4aa   : > { %v4146_v25 = vadd.f32 %v5877_v1, %v8385_v35  ;;  %v5994_v57 = vpop.f32.mrb[19].mxu0  ;;  %v8473_v54 = vadd.f32 %v5986_v40, %v4143_v29 }
 0x4ab   : > { %v5995_v0 = vadd.f32 %v5994_v57, %v5993_v55 }
 0x4ac   : > { %v5878_v42 = vpop.f32.mrb[240].mxu1  ;;  %v8475_v4 = vadd.f32 %v5989_v18, %v4146_v25 }
 0x4ad   : > { %v5879_v16 = vpop.f32.mrb[241].mxu1 }
 0x4ae   : > { %v5880_v50 = vadd.f32 %v5879_v16, %v5878_v42  ;;  %v5881_v44 = vpop.f32.mrb[242].mxu1 }
 0x4af   : > { %v5882_v52 = vpop.f32.mrb[243].mxu1  ;;  %v5996_v37 = vpop.f32.mrb[20].mxu0 }
 0x4b0   : > { %v4151_v19 = vadd.f32 %v5880_v50, %v8388_v36  ;;  %v5883_v3 = vadd.f32 %v5882_v52, %v5881_v44  ;;  %v5997_v15 = vpop.f32.mrb[21].mxu0 }
 0x4b1   : > { %v5998_v21 = vadd.f32 %v5997_v15, %v5996_v37  ;;  %v5999_v12 = vpop.f32.mrb[22].mxu0 }
 0x4b2   : > { %v4154_v35 = vadd.f32 %v5883_v3, %v8391_v11  ;;  %v6000_v22 = vpop.f32.mrb[23].mxu0  ;;  %v8479_v40 = vadd.f32 %v5992_v53, %v4151_v19 }
 0x4b3   : > { %v6001_v13 = vadd.f32 %v6000_v22, %v5999_v12 }
 0x4b4   : > { %v5884_v34 = vpop.f32.mrb[244].mxu1  ;;  %v8481_v41 = vadd.f32 %v5995_v0, %v4154_v35 }
 0x4b5   : > { %v5885_v18 = vpop.f32.mrb[245].mxu1 }
 0x4b6   : > { %v5886_v47 = vadd.f32 %v5885_v18, %v5884_v34  ;;  %v5887_v14 = vpop.f32.mrb[246].mxu1 }
 0x4b7   : > { %v5888_v30 = vpop.f32.mrb[247].mxu1  ;;  %v6002_v26 = vpop.f32.mrb[24].mxu0 }
 0x4b8   : > { %v4159_v36 = vadd.f32 %v5886_v47, %v8393_v31  ;;  %v5889_v10 = vadd.f32 %v5888_v30, %v5887_v14  ;;  %v6003_v23 = vpop.f32.mrb[25].mxu0 }
 0x4b9   : > { %v6004_v29 = vadd.f32 %v6003_v23, %v6002_v26  ;;  %v6005_v1 = vpop.f32.mrb[26].mxu0 }
 0x4ba   : > { %v4162_v11 = vadd.f32 %v5889_v10, %v8395_v51  ;;  %v6006_v43 = vpop.f32.mrb[27].mxu0  ;;  %v8485_v53 = vadd.f32 %v5998_v21, %v4159_v36 }
 0x4bb   : > { %v6007_v55 = vadd.f32 %v6006_v43, %v6005_v1 }
 0x4bc   : > { %v5890_v25 = vpop.f32.mrb[248].mxu1  ;;  %v8487_v57 = vadd.f32 %v6001_v13, %v4162_v11 }
 0x4bd   : > { %v5891_v0 = vpop.f32.mrb[249].mxu1 }
 0x4be   : > { %v5892_v42 = vadd.f32 %v5891_v0, %v5890_v25  ;;  %v5893_v16 = vpop.f32.mrb[250].mxu1 }
 0x4bf   : > { %v5894_v50 = vpop.f32.mrb[251].mxu1  ;;  %v6008_v44 = vpop.f32.mrb[28].mxu0 }
 0x4c0   : > { %v4167_v31 = vadd.f32 %v5892_v42, %v8397_v49  ;;  %v5895_v52 = vadd.f32 %v5894_v50, %v5893_v16  ;;  %v6009_v37 = vpop.f32.mrb[29].mxu0 }
 0x4c1   : > { %v6010_v19 = vadd.f32 %v6009_v37, %v6008_v44  ;;  %v6011_v3 = vpop.f32.mrb[30].mxu0 }
 0x4c2   : > { %v4170_v51 = vadd.f32 %v5895_v52, %v8399_v17  ;;  %v6012_v15 = vpop.f32.mrb[31].mxu0  ;;  %v8491_v21 = vadd.f32 %v6004_v29, %v4167_v31 }
 0x4c3   : > { %v6013_v12 = vadd.f32 %v6012_v15, %v6011_v3 }
 0x4c4   : > { %v5896_v35 = vpop.f32.mrb[252].mxu1  ;;  %v8493_v22 = vadd.f32 %v6007_v55, %v4170_v51 }
 0x4c5   : > { %v5897_v13 = vpop.f32.mrb[253].mxu1 }
 0x4c6   : > { %v5898_v34 = vadd.f32 %v5897_v13, %v5896_v35  ;;  %v5899_v18 = vpop.f32.mrb[254].mxu1 }
 0x4c7   : > { %v5900_v47 = vpop.f32.mrb[255].mxu1 }
 0x4c8   : > { %v4175_v14 = vadd.f32 %v5898_v34, %v8401_v5  ;;  %v5901_v49 = vadd.f32 %v5900_v47, %v5899_v18 }
 0x4ca   : > { %v4178_v30 = vadd.f32 %v5901_v49, %v8403_v61  ;;  %v8497_v26 = vadd.f32 %v6010_v19, %v4175_v14 }
 0x4cc   : > { %v6104_v36 = vpop.f32.mrb[0].mxu1  ;;  %v8499_v17 = vadd.f32 %v6013_v12, %v4178_v30 }
 0x4cd   : > { %v8502_v10 = vadd.f32 %v6104_v36, %v8413_v9  ;;  %v4376_v23 = vpop.f32.mrb[1].mxu1 }
 0x4ce   : > { %v8505_v29 = vadd.f32 %v4376_v23, %v8407_v27  ;;  %v6105_v1 = vpop.f32.mrb[2].mxu1 }
 0x4cf   : > { %v8508_v11 = vadd.f32 %v6105_v1, %v8415_v2  ;;  %v4379_v5 = vpop.f32.mrb[3].mxu1  ;;  %v4543_v27 = vmul.f32 %v8502_v10, %v8502_v10 }
 0x4d0   : > { %v8511_v43 = vadd.f32 %v4379_v5, %v8409_v20  ;;  %v4541_v61 = vmul.f32 %v8505_v29, %v8505_v29 }
 0x4d1   : > { %v4544_v16 = vmul.f32 %v8508_v11, %v8508_v11 }
 0x4d2   : > { %v4503_v55 = vadd.f32 %v8511_v43, %v8505_v29  ;;  %v4542_v9 = vmul.f32 %v8511_v43, %v8511_v43 }
 0x4d4   : > { %v4504_v25 = vadd.f32 %v4503_v55, %v8502_v10  ;;  %v4573_v2 = vadd.f32 %v4542_v9, %v4541_v61  ;;  %v6108_v0 = vpop.f32.mrb[4].mxu1 }
 0x4d5   : > { %v8523_v42 = vadd.f32 %v6108_v0, %v8425_v28  ;;  %v4392_v20 = vpop.f32.mrb[5].mxu1 }
 0x4d6   : > { %v4574_v50 = vadd.f32 %v4573_v2, %v4543_v27  ;;  %v8528_v44 = vadd.f32 %v4392_v20, %v8419_v24  ;;  %v4505_v31 = vadd.f32 %v4504_v25, %v8508_v11  ;;  %v6109_v52 = vpop.f32.mrb[6].mxu1 }
 0x4d7   : > { %v8532_v37 = vadd.f32 %v6109_v52, %v8427_v7  ;;  %v4395_v19 = vpop.f32.mrb[7].mxu1  ;;  %v4547_v7 = vmul.f32 %v8523_v42, %v8523_v42 }
 0x4d8   : > { %v4506_v3 = vadd.f32 %v4505_v31, %v8528_v44  ;;  %v4545_v28 = vmul.f32 %v8528_v44, %v8528_v44  ;;  %v4575_v51 = vadd.f32 %v4574_v50, %v4544_v16  ;;  %v8538_v15 = vadd.f32 %v4395_v19, %v8421_v59 }
 0x4d9   : > { %v4548_v59 = vmul.f32 %v8532_v37, %v8532_v37 }
 0x4da   : > { %v4576_v12 = vadd.f32 %v4575_v51, %v4545_v28  ;;  %v4507_v24 = vadd.f32 %v4506_v3, %v8538_v15  ;;  %v4546_v35 = vmul.f32 %v8538_v15, %v8538_v15 }
 0x4dc   : > { %v4508_v13 = vadd.f32 %v4507_v24, %v8523_v42  ;;  %v4577_v34 = vadd.f32 %v4576_v12, %v4546_v35  ;;  %v6112_v18 = vpop.f32.mrb[8].mxu1 }
 0x4dd   : > { %v8547_v47 = vadd.f32 %v6112_v18, %v8437_v58  ;;  %v4408_v14 = vpop.f32.mrb[9].mxu1 }
 0x4de   : > { %v4578_v49 = vadd.f32 %v4577_v34, %v4547_v7  ;;  %v8552_v30 = vadd.f32 %v4408_v14, %v8431_v46  ;;  %v4509_v36 = vadd.f32 %v4508_v13, %v8532_v37  ;;  %v6113_v23 = vpop.f32.mrb[10].mxu1 }
 0x4df   : > { %v8556_v1 = vadd.f32 %v6113_v23, %v8439_v38  ;;  %v4411_v5 = vpop.f32.mrb[11].mxu1  ;;  %v4551_v38 = vmul.f32 %v8547_v47, %v8547_v47 }
 0x4e0   : > { %v4510_v61 = vadd.f32 %v4509_v36, %v8552_v30  ;;  %v4549_v58 = vmul.f32 %v8552_v30, %v8552_v30  ;;  %v4579_v55 = vadd.f32 %v4578_v49, %v4548_v59  ;;  %v8562_v9 = vadd.f32 %v4411_v5, %v8433_v48 }
 0x4e1   : > { %v4552_v48 = vmul.f32 %v8556_v1, %v8556_v1 }
 0x4e2   : > { %v4580_v27 = vadd.f32 %v4579_v55, %v4549_v58  ;;  %v4511_v46 = vadd.f32 %v4510_v61, %v8562_v9  ;;  %v4550_v25 = vmul.f32 %v8562_v9, %v8562_v9 }
 0x4e4   : > { %v4512_v2 = vadd.f32 %v4511_v46, %v8547_v47  ;;  %v4581_v0 = vadd.f32 %v4580_v27, %v4550_v25  ;;  %v6116_v20 = vpop.f32.mrb[12].mxu1 }
 0x4e5   : > { %v8571_v16 = vadd.f32 %v6116_v20, %v8449_v33  ;;  %v4424_v50 = vpop.f32.mrb[13].mxu1 }
 0x4e6   : > { %v4582_v31 = vadd.f32 %v4581_v0, %v4551_v38  ;;  %v8576_v52 = vadd.f32 %v4424_v50, %v8443_v62  ;;  %v4513_v19 = vadd.f32 %v4512_v2, %v8556_v1  ;;  %v6117_v3 = vpop.f32.mrb[14].mxu1 }
 0x4e7   : > { %v8580_v28 = vadd.f32 %v6117_v3, %v8451_v39  ;;  %v4427_v51 = vpop.f32.mrb[15].mxu1  ;;  %v4555_v39 = vmul.f32 %v8571_v16, %v8571_v16 }
 0x4e8   : > { %v4514_v12 = vadd.f32 %v4513_v19, %v8576_v52  ;;  %v4553_v33 = vmul.f32 %v8576_v52, %v8576_v52  ;;  %v4583_v24 = vadd.f32 %v4582_v31, %v4552_v48  ;;  %v8586_v35 = vadd.f32 %v4427_v51, %v8445_v63 }
 0x4e9   : > { %v4556_v63 = vmul.f32 %v8580_v28, %v8580_v28 }
 0x4ea   : > { %v4584_v7 = vadd.f32 %v4583_v24, %v4553_v33  ;;  %v4515_v62 = vadd.f32 %v4514_v12, %v8586_v35  ;;  %v4554_v13 = vmul.f32 %v8586_v35, %v8586_v35 }
 0x4ec   : > { %v4516_v34 = vadd.f32 %v4515_v62, %v8571_v16  ;;  %v4585_v18 = vadd.f32 %v4584_v7, %v4554_v13  ;;  %v6120_v14 = vpop.f32.mrb[16].mxu1 }
 0x4ed   : > { %v8595_v59 = vadd.f32 %v6120_v14, %v8461_v56  ;;  %v4440_v49 = vpop.f32.mrb[17].mxu1 }
 0x4ee   : > { %v4586_v36 = vadd.f32 %v4585_v18, %v4555_v39  ;;  %v8600_v23 = vadd.f32 %v4440_v49, %v8455_v60  ;;  %v4517_v5 = vadd.f32 %v4516_v34, %v8580_v28  ;;  %v6121_v61 = vpop.f32.mrb[18].mxu1 }
 0x4ef   : > { %v8604_v58 = vadd.f32 %v6121_v61, %v8463_v32  ;;  %v4443_v55 = vpop.f32.mrb[19].mxu1  ;;  %v4559_v32 = vmul.f32 %v8595_v59, %v8595_v59 }
 0x4f0   : > { %v4518_v27 = vadd.f32 %v4517_v5, %v8600_v23  ;;  %v4557_v56 = vmul.f32 %v8600_v23, %v8600_v23  ;;  %v4587_v46 = vadd.f32 %v4586_v36, %v4556_v63  ;;  %v8610_v25 = vadd.f32 %v4443_v55, %v8457_v8 }
 0x4f1   : > { %v4560_v8 = vmul.f32 %v8604_v58, %v8604_v58 }
 0x4f2   : > { %v4588_v38 = vadd.f32 %v4587_v46, %v4557_v56  ;;  %v4519_v60 = vadd.f32 %v4518_v27, %v8610_v25  ;;  %v4558_v2 = vmul.f32 %v8610_v25, %v8610_v25 }
 0x4f4   : > { %v4520_v0 = vadd.f32 %v4519_v60, %v8595_v59  ;;  %v4589_v20 = vadd.f32 %v4588_v38, %v4558_v2  ;;  %v6124_v50 = vpop.f32.mrb[20].mxu1 }
 0x4f5   : > { %v8619_v48 = vadd.f32 %v6124_v50, %v8473_v54  ;;  %v4456_v31 = vpop.f32.mrb[21].mxu1 }
 0x4f6   : > { %v4590_v19 = vadd.f32 %v4589_v20, %v4559_v32  ;;  %v8624_v3 = vadd.f32 %v4456_v31, %v8467_v6  ;;  %v4521_v51 = vadd.f32 %v4520_v0, %v8604_v58  ;;  %v6125_v12 = vpop.f32.mrb[22].mxu1 }
 0x4f7   : > { %v8628_v33 = vadd.f32 %v6125_v12, %v8475_v4  ;;  %v4459_v24 = vpop.f32.mrb[23].mxu1  ;;  %v4563_v4 = vmul.f32 %v8619_v48, %v8619_v48 }
 0x4f8   : > { %v4522_v7 = vadd.f32 %v4521_v51, %v8624_v3  ;;  %v4561_v54 = vmul.f32 %v8624_v3, %v8624_v3  ;;  %v4591_v62 = vadd.f32 %v4590_v19, %v4560_v8  ;;  %v8634_v13 = vadd.f32 %v4459_v24, %v8469_v45 }
 0x4f9   : > { %v4564_v45 = vmul.f32 %v8628_v33, %v8628_v33 }
 0x4fa   : > { %v4592_v39 = vadd.f32 %v4591_v62, %v4561_v54  ;;  %v4523_v6 = vadd.f32 %v4522_v7, %v8634_v13  ;;  %v4562_v34 = vmul.f32 %v8634_v13, %v8634_v13 }
 0x4fc   : > { %v4524_v18 = vadd.f32 %v4523_v6, %v8619_v48  ;;  %v4593_v14 = vadd.f32 %v4592_v39, %v4562_v34  ;;  %v6128_v49 = vpop.f32.mrb[24].mxu1 }
 0x4fd   : > { %v8643_v63 = vadd.f32 %v6128_v49, %v8485_v53  ;;  %v4472_v36 = vpop.f32.mrb[25].mxu1 }
 0x4fe   : > { %v4594_v5 = vadd.f32 %v4593_v14, %v4563_v4  ;;  %v8648_v61 = vadd.f32 %v4472_v36, %v8479_v40  ;;  %v4525_v55 = vadd.f32 %v4524_v18, %v8628_v33  ;;  %v6129_v27 = vpop.f32.mrb[26].mxu1 }
 0x4ff   : > { %v8652_v56 = vadd.f32 %v6129_v27, %v8487_v57  ;;  %v4475_v46 = vpop.f32.mrb[27].mxu1  ;;  %v4567_v57 = vmul.f32 %v8643_v63, %v8643_v63 }
 0x500   : > { %v4526_v38 = vadd.f32 %v4525_v55, %v8648_v61  ;;  %v4565_v53 = vmul.f32 %v8648_v61, %v8648_v61  ;;  %v4595_v60 = vadd.f32 %v4594_v5, %v4564_v45  ;;  %v8658_v2 = vadd.f32 %v4475_v46, %v8481_v41 }
 0x501   : > { %v4568_v41 = vmul.f32 %v8652_v56, %v8652_v56 }
 0x502   : > { %v4596_v32 = vadd.f32 %v4595_v60, %v4565_v53  ;;  %v4527_v40 = vadd.f32 %v4526_v38, %v8658_v2  ;;  %v4566_v0 = vmul.f32 %v8658_v2, %v8658_v2 }
 0x504   : > { %v4528_v20 = vadd.f32 %v4527_v40, %v8643_v63  ;;  %v4597_v50 = vadd.f32 %v4596_v32, %v4566_v0  ;;  %v6132_v31 = vpop.f32.mrb[28].mxu1 }
 0x505   : > { %v8667_v8 = vadd.f32 %v6132_v31, %v8497_v26  ;;  %v4488_v19 = vpop.f32.mrb[29].mxu1 }
 0x506   : > { %v4598_v51 = vadd.f32 %v4597_v50, %v4567_v57  ;;  %v8672_v12 = vadd.f32 %v4488_v19, %v8491_v21  ;;  %v4529_v24 = vadd.f32 %v4528_v20, %v8652_v56  ;;  %v6133_v7 = vpop.f32.mrb[30].mxu1 }
 0x507   : > { %v8676_v54 = vadd.f32 %v6133_v7, %v8499_v17  ;;  %v4491_v62 = vpop.f32.mrb[31].mxu1  ;;  %v4571_v17 = vmul.f32 %v8667_v8, %v8667_v8 }
 0x508   : > { %v4530_v39 = vadd.f32 %v4529_v24, %v8672_v12  ;;  %v4569_v26 = vmul.f32 %v8672_v12, %v8672_v12  ;;  %v4599_v6 = vadd.f32 %v4598_v51, %v4568_v41  ;;  %v8682_v34 = vadd.f32 %v4491_v62, %v8493_v22 }
 0x509   : > { %v4572_v36 = vmul.f32 %v8676_v54, %v8676_v54 }
 0x50a   : > { %v4600_v4 = vadd.f32 %v4599_v6, %v4569_v26  ;;  %v4531_v21 = vadd.f32 %v4530_v39, %v8682_v34  ;;  %v4570_v18 = vmul.f32 %v8682_v34, %v8682_v34 }
 0x50c   : > { %v4532_v14 = vadd.f32 %v4531_v21, %v8667_v8  ;;  %v4601_v49 = vadd.f32 %v4600_v4, %v4570_v18 }
 0x50e   : > { %v4533_v45 = vadd.f32 %v4532_v14, %v8676_v54  ;;  %v4602_v5 = vadd.f32 %v4601_v49, %v4571_v17 }
 0x510   : > { %v4534_v22 = vrot.slane %v4533_v45, 4  ;;  %v4603_v55 = vadd.f32 %v4602_v5, %v4572_v36  ;;  %v8769_v36 = vld [vmem:[%s9000_s6] ss:$0 sm:$0xff] }
 0x512   : > { %v4535_v27 = vadd.f32 %v4534_v22, %v4533_v45  ;;  %v4604_v46 = vrot.slane %v4603_v55, 4 }
 0x514   : > { %v4536_v38 = vrot.slane %v4535_v27, 2  ;;  %v4605_v53 = vadd.f32 %v4604_v46, %v4603_v55 }
 0x516   : > { %v4537_v60 = vadd.f32 %v4536_v38, %v4535_v27  ;;  %v4606_v32 = vrot.slane %v4605_v53, 2 }
 0x518   : > { %v4538_v40 = vrot.slane %v4537_v60, 1  ;;  %v4607_v0 = vadd.f32 %v4606_v32, %v4605_v53 }
 0x51a   : > { %v4539_v57 = vadd.f32 %v4538_v40, %v4537_v60  ;;  %v4608_v20 = vrot.slane %v4607_v0, 1 }
 0x51c   : > { %v8693_v50 = vmul.f32 0.00390625, %v4539_v57  ;;  %v4609_v31 = vadd.f32 %v4608_v20, %v4607_v0 }
 0x51e   : > { %v4610_v19 = vmul.f32 0.00390625, %v4609_v31  ;;  %v4611_v41 = vmul.f32 %v8693_v50, %v8693_v50  ;;  %v4643_v51 = vsub.f32 %v8682_v34, %v8693_v50  ;;  %v4623_v7 = vsub.f32 %v8562_v9, %v8693_v50 }
 0x51f   : > { %v4625_v62 = vsub.f32 %v8556_v1, %v8693_v50  ;;  %v4626_v26 = vsub.f32 %v8576_v52, %v8693_v50  ;;  %v4627_v6 = vsub.f32 %v8586_v35, %v8693_v50  ;;  %v4628_v4 = vsub.f32 %v8571_v16, %v8693_v50 }
 0x520   : > { %v4612_v24 = vsub.f32 %v4610_v19, %v4611_v41  ;;  %v4629_v34 = vsub.f32 %v8580_v28, %v8693_v50  ;;  %v4630_v21 = vsub.f32 %v8600_v23, %v8693_v50  ;;  %v4631_v9 = vsub.f32 %v8610_v25, %v8693_v50  ;;  %v6355_v19 = vld [vmem:[%s6773_s21 + $0xe8] sm:$0xff] }
 0x521   : > { %v4632_v1 = vsub.f32 %v8595_v59, %v8693_v50  ;;  %v4633_v52 = vsub.f32 %v8604_v58, %v8693_v50  ;;  %v4634_v35 = vsub.f32 %v8624_v3, %v8693_v50  ;;  %v4635_v16 = vsub.f32 %v8634_v13, %v8693_v50 }
 0x522   : > { %v4613_v39 = vmax.f32 %v4612_v24, 0.0  ;;  %v4636_v28 = vsub.f32 %v8619_v48, %v8693_v50  ;;  %v4637_v23 = vsub.f32 %v8628_v33, %v8693_v50  ;;  %v4638_v25 = vsub.f32 %v8648_v61, %v8693_v50 }
 0x523   : > { %v4639_v59 = vsub.f32 %v8658_v2, %v8693_v50  ;;  %v4640_v58 = vsub.f32 %v8643_v63, %v8693_v50  ;;  %v4641_v3 = vsub.f32 %v8652_v56, %v8693_v50  ;;  %v4642_v13 = vsub.f32 %v8672_v12, %v8693_v50 }
 0x524   : > { %v4646_v18 = vadd.f32 1e-05, %v4613_v39  ;;  %v4644_v48 = vsub.f32 %v8667_v8, %v8693_v50  ;;  %v4645_v33 = vsub.f32 %v8676_v54, %v8693_v50  ;;  %v4614_v61 = vsub.f32 %v8505_v29, %v8693_v50  ;;  %v8756_v29 = vld [vmem:[%s8999_s5] ss:$0 sm:$0xff] }
 0x525   : > { %v4615_v2 = vsub.f32 %v8511_v43, %v8693_v50  ;;  %v4616_v63 = vsub.f32 %v8502_v10, %v8693_v50  ;;  %v4617_v56 = vsub.f32 %v8508_v11, %v8693_v50  ;;  %v4618_v12 = vsub.f32 %v8528_v44, %v8693_v50 }
 0x526   : > { %6353 = vrsqrt.f32 %v4646_v18  ;;  %v4619_v8 = vsub.f32 %v8538_v15, %v8693_v50  ;;  %v4620_v43 = vsub.f32 %v8523_v42, %v8693_v50  ;;  %v4621_v10 = vsub.f32 %v8532_v37, %v8693_v50 }
 0x527   : > { %v4622_v11 = vsub.f32 %v8552_v30, %v8693_v50  ;;  %v4624_v44 = vsub.f32 %v8547_v47, %v8693_v50 }
 0x530   : > { %v6354_v17 = vpop.eup %6353 }
 0x531   : > { %v4677_v54 = vmul.f32 %v6354_v17, %v4643_v51  ;;  %v4648_v15 = vmul.f32 %v6354_v17, %v4614_v61  ;;  %v4649_v14 = vmul.f32 %v6354_v17, %v4615_v2  ;;  %v4650_v49 = vmul.f32 %v6354_v17, %v4616_v63 }
 0x532   : > { %v4651_v45 = vmul.f32 %v6354_v17, %v4617_v56  ;;  %v4652_v42 = vmul.f32 %v6354_v17, %v4618_v12  ;;  %v4653_v5 = vmul.f32 %v6354_v17, %v4619_v8  ;;  %v4654_v22 = vmul.f32 %v6354_v17, %v4620_v43 }
 0x533   : > { %v4715_v37 = vmul.f32 %v8756_v29, %v4677_v54  ;;  %v4655_v30 = vmul.f32 %v6354_v17, %v4621_v10  ;;  %v4656_v55 = vmul.f32 %v6354_v17, %v4622_v11  ;;  %v4657_v27 = vmul.f32 %v6354_v17, %v4623_v7 }
 0x534   : > { %v4658_v47 = vmul.f32 %v6354_v17, %v4624_v44  ;;  %v4659_v46 = vmul.f32 %v6354_v17, %v4625_v62  ;;  %v4660_v38 = vmul.f32 %v6354_v17, %v4626_v26  ;;  %v4661_v53 = vmul.f32 %v6354_v17, %v4627_v6 }
 0x535   : > { %v4753_v60 = vadd.f32 %v8769_v36, %v4715_v37  ;;  %v4662_v32 = vmul.f32 %v6354_v17, %v4628_v4  ;;  %v4663_v40 = vmul.f32 %v6354_v17, %v4629_v34  ;;  %v4664_v0 = vmul.f32 %v6354_v17, %v4630_v21 }
 0x536   : > { %v4665_v57 = vmul.f32 %v6354_v17, %v4631_v9  ;;  %v4666_v20 = vmul.f32 %v6354_v17, %v4632_v1  ;;  %v4667_v50 = vmul.f32 %v6354_v17, %v4633_v52  ;;  %v4668_v31 = vmul.f32 %v6354_v17, %v4634_v35 }
 0x537   : > { %v4785_v41 = vadd.f32 %v6355_v19, %v4753_v60  ;;  %v4669_v51 = vmul.f32 %v6354_v17, %v4635_v16  ;;  %v4670_v24 = vmul.f32 %v6354_v17, %v4636_v28  ;;  %v4671_v39 = vmul.f32 %v6354_v17, %v4637_v23 }
 0x538   : > { %v4672_v7 = vmul.f32 %v6354_v17, %v4638_v25  ;;  %v4673_v18 = vmul.f32 %v6354_v17, %v4639_v59  ;;  %v4674_v62 = vmul.f32 %v6354_v17, %v4640_v58  ;;  %v4675_v26 = vmul.f32 %v6354_v17, %v4641_v3 }
 0x539   : > { %4817 = vst [vmem:[%s8776_s12 + $0xe8] sm:$0xff] %v4785_v41  ;;  %v4676_v6 = vmul.f32 %v6354_v17, %v4642_v13  ;;  %v4678_v4 = vmul.f32 %v6354_v17, %v4644_v48  ;;  %v4679_v34 = vmul.f32 %v6354_v17, %v4645_v33  ;;  %v4686_v21 = vmul.f32 %v8756_v29, %v4648_v15 }
 0x53a   : > { %v4687_v9 = vmul.f32 %v8756_v29, %v4649_v14  ;;  %v4688_v1 = vmul.f32 %v8756_v29, %v4650_v49  ;;  %v4689_v52 = vmul.f32 %v8756_v29, %v4651_v45  ;;  %v4690_v35 = vmul.f32 %v8756_v29, %v4652_v42 }
 0x53b   : > { %v4691_v16 = vmul.f32 %v8756_v29, %v4653_v5  ;;  %v4692_v28 = vmul.f32 %v8756_v29, %v4654_v22  ;;  %v4693_v23 = vmul.f32 %v8756_v29, %v4655_v30  ;;  %v4694_v25 = vmul.f32 %v8756_v29, %v4656_v55 }
 0x53c   : > { %v4695_v59 = vmul.f32 %v8756_v29, %v4657_v27  ;;  %v4696_v58 = vmul.f32 %v8756_v29, %v4658_v47  ;;  %v4697_v3 = vmul.f32 %v8756_v29, %v4659_v46  ;;  %v4698_v13 = vmul.f32 %v8756_v29, %v4660_v38 }
 0x53d   : > { %v4699_v48 = vmul.f32 %v8756_v29, %v4661_v53  ;;  %v4700_v33 = vmul.f32 %v8756_v29, %v4662_v32  ;;  %v4701_v61 = vmul.f32 %v8756_v29, %v4663_v40  ;;  %v4702_v2 = vmul.f32 %v8756_v29, %v4664_v0 }
 0x53e   : > { %v4703_v63 = vmul.f32 %v8756_v29, %v4665_v57  ;;  %v4704_v56 = vmul.f32 %v8756_v29, %v4666_v20  ;;  %v4705_v12 = vmul.f32 %v8756_v29, %v4667_v50  ;;  %v4706_v8 = vmul.f32 %v8756_v29, %v4668_v31 }
 0x53f   : > { %v4707_v17 = vmul.f32 %v8756_v29, %v4669_v51  ;;  %v4708_v43 = vmul.f32 %v8756_v29, %v4670_v24  ;;  %v4709_v10 = vmul.f32 %v8756_v29, %v4671_v39  ;;  %v4710_v11 = vmul.f32 %v8756_v29, %v4672_v7 }
 0x540   : > { %v4711_v44 = vmul.f32 %v8756_v29, %v4673_v18  ;;  %v4712_v54 = vmul.f32 %v8756_v29, %v4674_v62  ;;  %v4713_v15 = vmul.f32 %v8756_v29, %v4675_v26  ;;  %v4714_v14 = vmul.f32 %v8756_v29, %v4676_v6 }
 0x541   : > { %v4716_v49 = vmul.f32 %v8756_v29, %v4678_v4  ;;  %v4717_v45 = vmul.f32 %v8756_v29, %v4679_v34  ;;  %v4724_v42 = vadd.f32 %v8769_v36, %v4686_v21  ;;  %v4725_v5 = vadd.f32 %v8769_v36, %v4687_v9  ;;  %v6356_v34 = vld [vmem:[%s6773_s21] sm:$0xff]  ;;  %v6357_v9 = vld [vmem:[%s6773_s21 + $0x8] sm:$0xff] }
 0x542   : > { %v4726_v22 = vadd.f32 %v8769_v36, %v4688_v1  ;;  %v4727_v37 = vadd.f32 %v8769_v36, %v4689_v52  ;;  %v4728_v30 = vadd.f32 %v8769_v36, %v4690_v35  ;;  %v4729_v55 = vadd.f32 %v8769_v36, %v4691_v16  ;;  %v6358_v52 = vld [vmem:[%s6773_s21 + $0x10] sm:$0xff]  ;;  %v6359_v16 = vld [vmem:[%s6773_s21 + $0x18] sm:$0xff] }
 0x543   : > { %v4730_v27 = vadd.f32 %v8769_v36, %v4692_v28  ;;  %v4731_v47 = vadd.f32 %v8769_v36, %v4693_v23  ;;  %v4732_v46 = vadd.f32 %v8769_v36, %v4694_v25  ;;  %v4733_v29 = vadd.f32 %v8769_v36, %v4695_v59  ;;  %v6360_v23 = vld [vmem:[%s6773_s21 + $0x20] sm:$0xff]  ;;  %v6361_v59 = vld [vmem:[%s6773_s21 + $0x28] sm:$0xff] }
 0x544   : > { %v4734_v38 = vadd.f32 %v8769_v36, %v4696_v58  ;;  %v4735_v53 = vadd.f32 %v8769_v36, %v4697_v3  ;;  %v4736_v60 = vadd.f32 %v8769_v36, %v4698_v13  ;;  %v4737_v32 = vadd.f32 %v8769_v36, %v4699_v48  ;;  %v6362_v58 = vld [vmem:[%s6773_s21 + $0x30] sm:$0xff]  ;;  %v6363_v13 = vld [vmem:[%s6773_s21 + $0x38] sm:$0xff] }
 0x545   : > { %v4738_v40 = vadd.f32 %v8769_v36, %v4700_v33  ;;  %v4739_v0 = vadd.f32 %v8769_v36, %v4701_v61  ;;  %v4740_v57 = vadd.f32 %v8769_v36, %v4702_v2  ;;  %v4741_v20 = vadd.f32 %v8769_v36, %v4703_v63  ;;  %v6364_v33 = vld [vmem:[%s6773_s21 + $0x40] sm:$0xff]  ;;  %v6365_v2 = vld [vmem:[%s6773_s21 + $0x48] sm:$0xff] }
 0x546   : > { %v4742_v50 = vadd.f32 %v8769_v36, %v4704_v56  ;;  %v8830_v31 = vadd.f32 %v8769_v36, %v4705_v12  ;;  %v8833_v19 = vadd.f32 %v8769_v36, %v4706_v8  ;;  %v8836_v41 = vadd.f32 %v8769_v36, %v4707_v17  ;;  %v6366_v56 = vld [vmem:[%s6773_s21 + $0x50] sm:$0xff]  ;;  %v6367_v8 = vld [vmem:[%s6773_s21 + $0x58] sm:$0xff] }
 0x547   : > { %v8839_v51 = vadd.f32 %v8769_v36, %v4708_v43  ;;  %v8842_v24 = vadd.f32 %v8769_v36, %v4709_v10  ;;  %v8845_v39 = vadd.f32 %v8769_v36, %v4710_v11  ;;  %v8848_v7 = vadd.f32 %v8769_v36, %v4711_v44  ;;  %v6368_v43 = vld [vmem:[%s6773_s21 + $0x60] sm:$0xff]  ;;  %v6369_v11 = vld [vmem:[%s6773_s21 + $0x68] sm:$0xff] }
 0x548   : > { %v8851_v18 = vadd.f32 %v8769_v36, %v4712_v54  ;;  %v8854_v62 = vadd.f32 %v8769_v36, %v4713_v15  ;;  %v8857_v26 = vadd.f32 %v8769_v36, %v4714_v14  ;;  %v8860_v6 = vadd.f32 %v8769_v36, %v4716_v49  ;;  %v6370_v54 = vld [vmem:[%s6773_s21 + $0x70] sm:$0xff]  ;;  %v6371_v14 = vld [vmem:[%s6773_s21 + $0x78] sm:$0xff] }
 0x549   : > { %v8863_v4 = vadd.f32 %v8769_v36, %v4717_v45  ;;  %v4756_v21 = vadd.f32 %v6356_v34, %v4724_v42  ;;  %v4757_v1 = vadd.f32 %v6357_v9, %v4725_v5  ;;  %v4758_v35 = vadd.f32 %v6358_v52, %v4726_v22  ;;  %v6372_v45 = vld [vmem:[%s6773_s21 + $0x80] sm:$0xff]  ;;  %v6373_v5 = vld [vmem:[%s6773_s21 + $0x88] sm:$0xff]  ;;  %v6386_v34 = vld [vmem:[%s6773_s21 + $0xf8] sm:$0xff] }
 0x54a   : > { %v4759_v28 = vadd.f32 %v6359_v16, %v4727_v37  ;;  %v4760_v25 = vadd.f32 %v6360_v23, %v4728_v30  ;;  %v4761_v36 = vadd.f32 %v6361_v59, %v4729_v55  ;;  %v4762_v3 = vadd.f32 %v6362_v58, %v4730_v27  ;;  %v6374_v37 = vld [vmem:[%s6773_s21 + $0x90] sm:$0xff]  ;;  %v6375_v55 = vld [vmem:[%s6773_s21 + $0x98] sm:$0xff] }
 0x54b   : > { %v4763_v48 = vadd.f32 %v6363_v13, %v4731_v47  ;;  %v4764_v61 = vadd.f32 %v6364_v33, %v4732_v46  ;;  %v4765_v63 = vadd.f32 %v6365_v2, %v4733_v29  ;;  %v4766_v12 = vadd.f32 %v6366_v56, %v4734_v38  ;;  %4788 = vst [vmem:[%s8776_s12] sm:$0xff] %v4756_v21  ;;  %v6376_v47 = vld [vmem:[%s6773_s21 + $0xa0] sm:$0xff]  ;;  %v6377_v29 = vld [vmem:[%s6773_s21 + $0xa8] sm:$0xff] }
 0x54c   : > { %4789 = vst [vmem:[%s8776_s12 + $0x8] sm:$0xff] %v4757_v1  ;;  %4790 = vst [vmem:[%s8776_s12 + $0x10] sm:$0xff] %v4758_v35  ;;  %v4767_v17 = vadd.f32 %v6367_v8, %v4735_v53  ;;  %v4768_v10 = vadd.f32 %v6368_v43, %v4736_v60  ;;  %v4769_v44 = vadd.f32 %v6369_v11, %v4737_v32  ;;  %v6378_v53 = vld [vmem:[%s6773_s21 + $0xb0] sm:$0xff]  ;;  %v6379_v32 = vld [vmem:[%s6773_s21 + $0xb8] sm:$0xff] }
 0x54d   : > { %v4770_v15 = vadd.f32 %v6370_v54, %v4738_v40  ;;  %4791 = vst [vmem:[%s8776_s12 + $0x18] sm:$0xff] %v4759_v28  ;;  %4792 = vst [vmem:[%s8776_s12 + $0x20] sm:$0xff] %v4760_v25  ;;  %v4771_v49 = vadd.f32 %v6371_v14, %v4739_v0  ;;  %v4772_v42 = vadd.f32 %v6372_v45, %v4740_v57  ;;  %v6380_v0 = vld [vmem:[%s6773_s21 + $0xc0] sm:$0xff] }
 0x54e   : > { %4793 = vst [vmem:[%s8776_s12 + $0x28] sm:$0xff] %v4761_v36  ;;  %4794 = vst [vmem:[%s8776_s12 + $0x30] sm:$0xff] %v4762_v3  ;;  %v4773_v22 = vadd.f32 %v6373_v5, %v4741_v20  ;;  %v4774_v30 = vadd.f32 %v6374_v37, %v4742_v50  ;;  %v4775_v27 = vadd.f32 %v6375_v55, %v8830_v31  ;;  %v6381_v20 = vld [vmem:[%s6773_s21 + $0xc8] sm:$0xff]  ;;  %v6382_v31 = vld [vmem:[%s6773_s21 + $0xd0] sm:$0xff] }
 0x54f   : > { %4795 = vst [vmem:[%s8776_s12 + $0x38] sm:$0xff] %v4763_v48  ;;  %4796 = vst [vmem:[%s8776_s12 + $0x40] sm:$0xff] %v4764_v61  ;;  %v4776_v46 = vadd.f32 %v6376_v47, %v8833_v19  ;;  %v4777_v38 = vadd.f32 %v6377_v29, %v8836_v41  ;;  %v4778_v60 = vadd.f32 %v6378_v53, %v8839_v51  ;;  %v6383_v41 = vld [vmem:[%s6773_s21 + $0xd8] sm:$0xff] }
 0x550   : > { %4797 = vst [vmem:[%s8776_s12 + $0x48] sm:$0xff] %v4765_v63  ;;  %4798 = vst [vmem:[%s8776_s12 + $0x50] sm:$0xff] %v4766_v12  ;;  %v4779_v40 = vadd.f32 %v6379_v32, %v8842_v24  ;;  %v4780_v57 = vadd.f32 %v6380_v0, %v8845_v39  ;;  %v4781_v50 = vadd.f32 %v6381_v20, %v8848_v7  ;;  %v6384_v24 = vld [vmem:[%s6773_s21 + $0xe0] sm:$0xff]  ;;  %v6385_v7 = vld [vmem:[%s6773_s21 + $0xf0] sm:$0xff]  ;;  %s6552_s21 = smov [#allocation8]  }
 0x551   : > { %4799 = vst [vmem:[%s8776_s12 + $0x58] sm:$0xff] %v4767_v17  ;;  %4800 = vst [vmem:[%s8776_s12 + $0x60] sm:$0xff] %v4768_v10  ;;  %v4782_v19 = vadd.f32 %v6382_v31, %v8851_v18  ;;  %v4783_v51 = vadd.f32 %v6383_v41, %v8854_v62  ;;  %v4784_v39 = vadd.f32 %v6384_v24, %v8857_v26  ;;  %s6477_s11 = sshll.u32 %s6552_s21, 4  ;;  %s6478_s11 = int_to_ptr.vmem [resolvable:$false] %s6477_s11 }
 0x552   : > { %4801 = vst [vmem:[%s8776_s12 + $0x68] sm:$0xff] %v4769_v44  ;;  %4802 = vst [vmem:[%s8776_s12 + $0x70] sm:$0xff] %v4770_v15  ;;  %v4786_v18 = vadd.f32 %v6385_v7, %v8860_v6  ;;  %v4787_v21 = vadd.f32 %v6386_v34, %v8863_v4  ;;  %s6479_s22 = scalar_lea.vmem %s6478_s11, 8192  ;;  %p6480_p7 = scmp.lt.s32.totalorder %s8930_s29, %s6478_s11 }
 0x553   : > { %4803 = vst [vmem:[%s8776_s12 + $0x78] sm:$0xff] %v4771_v49  ;;  %4804 = vst [vmem:[%s8776_s12 + $0x80] sm:$0xff] %v4772_v42  ;;  %p6481_p9 = scmp.lt.s32.totalorder %s6479_s22, %s6473_s20 }
 0x554   : > { %4805 = vst [vmem:[%s8776_s12 + $0x88] sm:$0xff] %v4773_v22  ;;  %4806 = vst [vmem:[%s8776_s12 + $0x90] sm:$0xff] %v4774_v30 }
 0x555   : > { %4807 = vst [vmem:[%s8776_s12 + $0x98] sm:$0xff] %v4775_v27  ;;  %4808 = vst [vmem:[%s8776_s12 + $0xa0] sm:$0xff] %v4776_v46  ;;  %p6482_p12 = por %p6481_p9, %p6480_p7 }
 0x556   : > { %4809 = vst [vmem:[%s8776_s12 + $0xa8] sm:$0xff] %v4777_v38  ;;  %4810 = vst [vmem:[%s8776_s12 + $0xb0] sm:$0xff] %v4778_v60 }
 0x557   : > { %4811 = vst [vmem:[%s8776_s12 + $0xb8] sm:$0xff] %v4779_v40  ;;  %4812 = vst [vmem:[%s8776_s12 + $0xc0] sm:$0xff] %v4780_v57  ;;  %p6483_p2 = pnand %p6482_p12, %p6476_p3 }
 0x558   : > { %4813 = vst [vmem:[%s8776_s12 + $0xc8] sm:$0xff] %v4781_v50  ;;  %4814 = vst [vmem:[%s8776_s12 + $0xd0] sm:$0xff] %v4782_v19 }
 0x559   : > { %4815 = vst [vmem:[%s8776_s12 + $0xd8] sm:$0xff] %v4783_v51  ;;  %4816 = vst [vmem:[%s8776_s12 + $0xe0] sm:$0xff] %v4784_v39 }
 0x55a   : > { %4818 = vst [vmem:[%s8776_s12 + $0xf0] sm:$0xff] %v4786_v18  ;;  %4819 = vst [vmem:[%s8776_s12 + $0xf8] sm:$0xff] %v4787_v21 }
 0x55b   : > { %6486 = shalt.err (!%p6483_p2)
}
 0x55c   : > { %s6487_s10 = scalar_lea.hbm %s8926_s9, 4096  ;;  %s6491_s12 = scalar_lea.hbm %s9001_s7, 8192 }
 0x55d   : > { %p6488_p13 = scmp.ne.s32.totalorder %s8926_s9, %s6487_s10  ;;  %p6492_p4 = scmp.lt.u32.totalorder %s8926_s9, %s9001_s7 }
 0x55e   : > { %p6493_p5 = scmp.lt.u32.totalorder %s6491_s12, %s6487_s10  ;;  %p6495_p11 = scmp.lt.u32.totalorder %s6487_s10, %s8926_s9 }
 0x55f   : > { %p6489_p6 = pnand %p6488_p13, %p9032_p0 }
 0x560   : > { %p6494_p8 = por %p6493_p5, %p6492_p4 }
 0x561   : > { %p6490_p10 = pneg %p6489_p6 }
 0x562   : > { %p6496_p1 = por %p6495_p11, %p6494_p8 }
 0x564   : > { %p6497_p3 = pnand %p6496_p1, %p6490_p10 }
 0x566   : > { %6500 = shalt.err (!%p6497_p3)
}
 0x567   : > { %s6553_s30 = smov 128   ;;  %s6554_s20 = smov 8  }
 0x568   : > { %6144 = dma.vmem_to_hbm [thread:$0]  (%p9032_p0), %s8930_s29, 4096, %s8926_s9, %s4821_s28, %s6553_s30, %s6553_s30, %s6554_s20  }
 0x569 PF: > { %s4849_s21 = sand.u32 1, %s6531_s24   ;;  %p9033_p7 = scmp.ne.s32.totalorder %s9008_s8, 0 }
 0x56a   : > { %p9034_p9 = scmp.ge.s32.totalorder %s6543_s27, 2  ;;  %s4850_s11 = scalar_lea.sflag [#allocation4], %s4849_s21 }
 0x56c   : > { %p6158_p12 = pnand %p9034_p9, %p9033_p7 }
 0x56e   : > { %6526 = dma.done.wait (!%p6158_p12), %s4850_s11, 4096  }
 0x56f   : > { %6528 = vsyncadd (!%p6158_p12), %s4850_s11, 4294963200  ;;  %p21_p2 = scmp.ge.s32.totalorder %s6705_s13, 4   ;;  %s9035_s24 = smov %s6535_s25 }
 0x570   : > { %s9036_s25 = smov %s6539_s26  ;;  %s9037_s26 = smov %s6721_s17 }
 0x571   : > { %s9038_s27 = smov %s6705_s13  ;;  %23 = sbr.rel (!%p21_p2) target bundleno = 6 (0x6), region = 101 }
 0x578   :  { %4855 = vsyncpa [#allocation3], 1 }
 0x579   :  { %4857 = vsyncpa [#allocation3 + $0x1], 1 }
 0x57a   :  { %4858 = vsyncpa [#allocation6], 1 }
 0x57b   :  { %4859 = vsyncpa [#allocation4], 1 }
 0x57c   :  { %4861 = vsyncpa [#allocation4 + $0x1], 1 }

</bundles_post_ra>
